<compile_context>
chip_gen: v7x
topology: tpu7x:2x2x1
jax: 0.10.0
libtpu: 0.0.40
codegen_flags: <defaults>
</compile_context>

<pallas_src>
import jax
import jax.numpy as jnp
import numpy as np
from jax.experimental import pallas as pl
from jax.experimental.pallas import tpu as pltpu

BN_EPS = 1e-5
_LPAD = 8          # left zero-pad columns of the stage-2 scratch (sublane aligned)


def _round_up(x, m):
    return (x + m - 1) // m * m


# ------------------------------ fused kernel ------------------------------- #

def _bottleneck_kernel(x_ref, w1_ref, b1_ref, w2_ref, b2_ref, w3_ref, b3_ref,
                       o_ref, xp_ref):
    # x_ref : (1, H, W, Cin)        bf16 (also the identity residual)
    # w1_ref: (Cin, Cmid)           bf16 (BN1 scale folded in)
    # w2_ref: (3, 3, Cmid, Cmid)    bf16 (BN2 scale folded in, HWIO)
    # w3_ref: (Cmid, Cout)          bf16 (BN3 scale folded in)
    # b*_ref: (1, C)                f32
    # o_ref : (1, H, W, Cout)       f32
    # xp_ref: (H+2, Wp, Cmid)       bf16 VMEM scratch, interior at cols [8, 8+W)
    _, H, W, Cin = x_ref.shape
    Hp, Wp, Cmid = xp_ref.shape
    Cout = o_ref.shape[3]

    xb = x_ref[0].reshape(H * W, Cin)                       # bf16 MXU operand

    # ---- stage 1: 1x1 conv (folded BN scale) + bias + ReLU -----------------
    y1 = jnp.dot(xb, w1_ref[...], preferred_element_type=jnp.float32)
    y1 = jnp.maximum(y1 + b1_ref[...], 0.0)                 # (H*W, Cmid) f32

    # ---- zero only the border strips of the padded scratch (every step; the
    # interior is fully rewritten below, so no full-buffer memset) -----------
    xp_ref[:, pl.ds(0, _LPAD), :] = jnp.zeros((Hp, _LPAD, Cmid), xp_ref.dtype)
    xp_ref[:, pl.ds(_LPAD + W, Wp - _LPAD - W), :] = (
        jnp.zeros((Hp, Wp - _LPAD - W, Cmid), xp_ref.dtype))
    zrow = jnp.zeros((W, Cmid), xp_ref.dtype)
    xp_ref[0, pl.ds(_LPAD, W), :] = zrow                    # top pad row
    xp_ref[H + 1, pl.ds(_LPAD, W), :] = zrow                # bottom pad row

    # interior store: column offset _LPAD=8 -> sublane-aligned; single bf16 cast
    xp_ref[pl.ds(1, H), pl.ds(_LPAD, W), :] = (
        y1.astype(xp_ref.dtype).reshape(H, W, Cmid))

    # ---- stage 2: 3x3 conv (stride 1, pad 1) + bias + ReLU ------------------
    # 9 accumulating K=Cmid matmuls straight off the bf16 scratch; acc seeded
    # from the first dot (no zero-init, no concatenate temporaries).
    acc = None
    for dy in range(3):                                     # static unroll
        for dx in range(3):
            patch = xp_ref[pl.ds(dy, H), pl.ds(_LPAD - 1 + dx, W), :]
            c = jnp.dot(patch.reshape(H * W, Cmid), w2_ref[dy, dx],
                        preferred_element_type=jnp.float32)
            acc = c if acc is None else acc + c
    y2 = jnp.maximum(acc + b2_ref[...], 0.0).astype(jnp.bfloat16)

    # ---- stage 3: 1x1 conv + bias + residual add (f32) + ReLU ---------------
    y3 = jnp.dot(y2, w3_ref[...], preferred_element_type=jnp.float32)
    res = x_ref[0].reshape(H * W, Cout).astype(jnp.float32)
    y3 = jnp.maximum(y3 + b3_ref[...] + res, 0.0)
    o_ref[...] = y3.reshape(1, H, W, Cout).astype(o_ref.dtype)


# ------------------------------ host wrapper -------------------------------- #

def bottleneck_forward(x_nhwc, p):
    """Fused Bottleneck forward. NHWC activations, no layout transposes."""
    x = x_nhwc.astype(jnp.bfloat16)                 # bf16 activation stream
    N, H, W, Cin = x.shape
    Cmid = p["w1"].shape[1]
    Cout = p["w3"].shape[1]
    assert Cin == Cout, "identity residual requires inplanes == planes*expansion"
    assert W % 8 == 0 and Cmid % 128 == 0 and Cout % 128 == 0
    # TODO(synk): stride!=1 / downsample paths of Bottleneck are not implemented.

    # Fold inference-mode BN scale into the conv weights; biases stay in f32.
    w1 = (p["w1"] * p["s1"]).astype(jnp.bfloat16)                       # (Cin, Cmid)
    w2 = (p["w2"] * p["s2"].reshape(1, 1, 1, Cmid)).astype(jnp.bfloat16)  # (3,3,Cmid,Cmid)
    w3 = (p["w3"] * p["s3"]).astype(jnp.bfloat16)                       # (Cmid, Cout)
    b1, b2, b3 = p["b1"], p["b2"], p["b3"]                              # (1, C) f32

    # padded scratch width: 8 aligned left-pad columns + W + >=1 zero column,
    # rounded so the right strip zeroing is an aligned 8-sublane group.
    Wp = _LPAD + _round_up(W + 1, 8)

    def rep(arr):
        # full-array (replicated) block, resident in VMEM for every grid step
        return pl.BlockSpec(arr.shape, lambda n: (0,) * arr.ndim)

    out = pl.pallas_call(
        _bottleneck_kernel,
        grid=(N,),
        in_specs=[
            pl.BlockSpec((1, H, W, Cin), lambda n: (n, 0, 0, 0)),
            rep(w1), rep(b1), rep(w2), rep(b2), rep(w3), rep(b3),
        ],
        out_specs=pl.BlockSpec((1, H, W, Cout), lambda n: (n, 0, 0, 0)),
        out_shape=jax.ShapeDtypeStruct((N, H, W, Cout), jnp.float32),
        scratch_shapes=[pltpu.VMEM((H + 2, Wp, Cmid), jnp.bfloat16)],
        compiler_params=pltpu.CompilerParams(
            dimension_semantics=("parallel",),
            vmem_limit_bytes=48 * 1024 * 1024,   # fits v7x's 64 MiB; fine on v6e/v5e
        ),
    )(x, w1, b1, w2, b2, w3, b3)
    return out


# ------------------------- deterministic parameters ------------------------- #

def init_params(key, inplanes, planes, expansion=4):
    cmid = planes
    cout = planes * expansion
    ks = jax.random.split(key, 15)

    def bn_fold(kg, kb, km, kv, c):
        gamma = 1.0 + 0.1 * jax.random.normal(kg, (c,), jnp.float32)
        beta = 0.1 * jax.random.normal(kb, (c,), jnp.float32)
        mean = 0.1 * jax.random.normal(km, (c,), jnp.float32)
        var = jnp.abs(jax.random.normal(kv, (c,), jnp.float32)) + 0.5
        scale = gamma / jnp.sqrt(var + BN_EPS)
        bias = beta - mean * scale
        return scale.reshape(1, c), bias.reshape(1, c)

    s1, b1 = bn_fold(ks[0], ks[1], ks[2], ks[3], cmid)
    s2, b2 = bn_fold(ks[4], ks[5], ks[6], ks[7], cmid)
    s3, b3 = bn_fold(ks[8], ks[9], ks[10], ks[11], cout)

    # fan-in scaled weights keep activation magnitudes O(1) through the block
    w1 = jax.random.normal(ks[12], (inplanes, cmid), jnp.float32) / np.sqrt(inplanes)
    w2 = jax.random.normal(ks[13], (3, 3, cmid, cmid), jnp.float32) / np.sqrt(9 * cmid)
    w3 = jax.random.normal(ks[14], (cmid, cout), jnp.float32) / np.sqrt(cmid)

    return {"w1": w1, "w2": w2, "w3": w3,      # conv1 (1x1), conv2 (3x3 HWIO), conv3 (1x1)
            "s1": s1, "b1": b1, "s2": s2, "b2": b2, "s3": s3, "b3": b3}


# --------------------------- pure-JAX reference ----------------------------- #

def ref_forward(x_nhwc, p):
    dn = ("NHWC", "HWIO", "NHWC")
    y = jax.lax.conv_general_dilated(x_nhwc, p["w1"][None, None], (1, 1), "VALID",
                                     dimension_numbers=dn)
    y = jnp.maximum(y * p["s1"] + p["b1"], 0.0)
    y = jax.lax.conv_general_dilated(y, p["w2"], (1, 1), ((1, 1), (1, 1)),
                                     dimension_numbers=dn)
    y = jnp.maximum(y * p["s2"] + p["b2"], 0.0)
    y = jax.lax.conv_general_dilated(y, p["w3"][None, None], (1, 1), "VALID",
                                     dimension_numbers=dn)
    y = y * p["s3"] + p["b3"] + x_nhwc
    return jnp.maximum(y, 0.0)


# ----------------------------------- main ----------------------------------- #

if __name__ == "__main__":
    # Realistic bottleneck channel widths (lane-dense, identity residual), with
    # enough batch for grid depth (8 steps -> >=4 per v7x TensorCore) and
    # H*W = 256 rows of M per MXU matmul.
    inplanes, planes = 512, 128
    N, H, W = 8, 16, 16

    key = jax.random.PRNGKey(0)
    kx, kp = jax.random.split(key)
    x = jax.random.normal(kx, (N, H, W, inplanes), jnp.float32)    # NHWC
    params = init_params(kp, inplanes, planes)

    out = jax.block_until_ready(bottleneck_forward(x, params))

    # kernel consumes bf16 activations; feed the reference the same rounded input
    x_q = x.astype(jnp.bfloat16).astype(jnp.float32)
    ref = ref_forward(x_q, params)
    assert out.shape == (N, H, W, inplanes), out.shape
    # bf16 MXU operands (f32 accumulation) vs f32 reference -> relaxed tolerance
    np.testing.assert_allclose(np.asarray(out), np.asarray(ref), rtol=2e-2, atol=5e-2)
    print("KERNEL_OK")
</pallas_src>

<mosaic_0001>
module attributes {stable_mosaic.version = 11 : i64} {
  func.func @_bottleneck_kernel(%arg0: i32, %arg1: memref<1x16x16x512xbf16, #tpu.memory_space<vmem>>, %arg2: memref<512x128xbf16, #tpu.memory_space<vmem>>, %arg3: memref<1x128xf32, #tpu.memory_space<vmem>>, %arg4: memref<3x3x128x128xbf16, #tpu.memory_space<vmem>>, %arg5: memref<1x128xf32, #tpu.memory_space<vmem>>, %arg6: memref<128x512xbf16, #tpu.memory_space<vmem>>, %arg7: memref<1x512xf32, #tpu.memory_space<vmem>>, %arg8: memref<1x16x16x512xf32, #tpu.memory_space<vmem>>, %arg9: memref<18x32x128xbf16, #tpu.memory_space<vmem>>) attributes {dimension_semantics = [#tpu.dimension_semantics<parallel>], iteration_bounds = array<i64: 8>, scalar_prefetch = 0 : i64, scratch_operands = 1 : i64, tpu.core_type = #tpu.core_type<tc>, window_params = [{transform_indices = @transform_0, window_bounds = array<i64: 1, 16, 16, 512>}, {pipeline_mode = #tpu.pipeline_mode<synchronous>, transform_indices = @transform_1, window_bounds = array<i64: 512, 128>}, {pipeline_mode = #tpu.pipeline_mode<synchronous>, transform_indices = @transform_2, window_bounds = array<i64: 1, 128>}, {pipeline_mode = #tpu.pipeline_mode<synchronous>, transform_indices = @transform_3, window_bounds = array<i64: 3, 3, 128, 128>}, {pipeline_mode = #tpu.pipeline_mode<synchronous>, transform_indices = @transform_4, window_bounds = array<i64: 1, 128>}, {pipeline_mode = #tpu.pipeline_mode<synchronous>, transform_indices = @transform_5, window_bounds = array<i64: 128, 512>}, {pipeline_mode = #tpu.pipeline_mode<synchronous>, transform_indices = @transform_6, window_bounds = array<i64: 1, 512>}, {transform_indices = @transform_7, window_bounds = array<i64: 1, 16, 16, 512>}]} {
    %c0 = arith.constant 0 : index
    %c0_0 = arith.constant 0 : index
    %c0_1 = arith.constant 0 : index
    %c0_2 = arith.constant 0 : index
    %0 = vector.load %arg1[%c0, %c0_0, %c0_1, %c0_2] : memref<1x16x16x512xbf16, #tpu.memory_space<vmem>>, vector<1x16x16x512xbf16>
    %1 = vector.shape_cast %0 : vector<1x16x16x512xbf16> to vector<16x16x512xbf16>
    %2 = vector.shape_cast %1 : vector<16x16x512xbf16> to vector<256x512xbf16>
    %c0_3 = arith.constant 0 : index
    %c0_4 = arith.constant 0 : index
    %3 = vector.load %arg2[%c0_3, %c0_4] : memref<512x128xbf16, #tpu.memory_space<vmem>>, vector<512x128xbf16>
    %cst = arith.constant dense<0.000000e+00> : vector<256x128xf32>
    %4 = tpu.matmul %2, %3, %cst {dimension_numbers = #tpu.dot_dimension_numbers<[1], [0], [0], [1], [0, 0, 1, 1], [], []>} : vector<256x512xbf16>, vector<512x128xbf16>, vector<256x128xf32> -> vector<256x128xf32>
    %c0_5 = arith.constant 0 : index
    %c0_6 = arith.constant 0 : index
    %5 = vector.load %arg3[%c0_5, %c0_6] : memref<1x128xf32, #tpu.memory_space<vmem>>, vector<1x128xf32>
    %6 = vector.broadcast %5 : vector<1x128xf32> to vector<256x128xf32>
    %7 = arith.addf %4, %6 : vector<256x128xf32>
    %cst_7 = arith.constant 0.000000e+00 : f32
    %8 = vector.broadcast %cst_7 : f32 to vector<256x128xf32>
    %9 = arith.maximumf %7, %8 : vector<256x128xf32>
    %cst_8 = arith.constant 0.000000e+00 : bf16
    %10 = vector.broadcast %cst_8 : bf16 to vector<18x8x128xbf16>
    %c0_9 = arith.constant 0 : index
    %c0_10 = arith.constant 0 : index
    %c0_11 = arith.constant 0 : index
    %11 = vector.load %arg9[%c0_9, %c0_10, %c0_11] : memref<18x32x128xbf16, #tpu.memory_space<vmem>>, vector<18x8x128xbf16>
    tpu.vector_store %arg9[%c0_9, %c0_10, %c0_11], %10 {strides = array<i32>} : memref<18x32x128xbf16, #tpu.memory_space<vmem>>, vector<18x8x128xbf16>,
    %cst_12 = arith.constant 0.000000e+00 : bf16
    %12 = vector.broadcast %cst_12 : bf16 to vector<18x8x128xbf16>
    %c0_13 = arith.constant 0 : index
    %c24 = arith.constant 24 : index
    %c0_14 = arith.constant 0 : index
    %13 = vector.load %arg9[%c0_13, %c24, %c0_14] : memref<18x32x128xbf16, #tpu.memory_space<vmem>>, vector<18x8x128xbf16>
    tpu.vector_store %arg9[%c0_13, %c24, %c0_14], %12 {strides = array<i32>} : memref<18x32x128xbf16, #tpu.memory_space<vmem>>, vector<18x8x128xbf16>,
    %cst_15 = arith.constant 0.000000e+00 : bf16
    %14 = vector.broadcast %cst_15 : bf16 to vector<16x128xbf16>
    %c0_16 = arith.constant 0 : index
    %c8 = arith.constant 8 : index
    %c0_17 = arith.constant 0 : index
    %15 = vector.load %arg9[%c0_16, %c8, %c0_17] : memref<18x32x128xbf16, #tpu.memory_space<vmem>>, vector<1x16x128xbf16>
    %16 = vector.shape_cast %15 : vector<1x16x128xbf16> to vector<16x128xbf16>
    %17 = vector.shape_cast %14 : vector<16x128xbf16> to vector<1x16x128xbf16>
    tpu.vector_store %arg9[%c0_16, %c8, %c0_17], %17 {strides = array<i32>} : memref<18x32x128xbf16, #tpu.memory_space<vmem>>, vector<1x16x128xbf16>,
    %c17 = arith.constant 17 : index
    %c8_18 = arith.constant 8 : index
    %c0_19 = arith.constant 0 : index
    %18 = vector.load %arg9[%c17, %c8_18, %c0_19] : memref<18x32x128xbf16, #tpu.memory_space<vmem>>, vector<1x16x128xbf16>
    %19 = vector.shape_cast %18 : vector<1x16x128xbf16> to vector<16x128xbf16>
    %20 = vector.shape_cast %14 : vector<16x128xbf16> to vector<1x16x128xbf16>
    tpu.vector_store %arg9[%c17, %c8_18, %c0_19], %20 {strides = array<i32>} : memref<18x32x128xbf16, #tpu.memory_space<vmem>>, vector<1x16x128xbf16>,
    %21 = arith.truncf %9 : vector<256x128xf32> to vector<256x128xbf16>
    %22 = vector.shape_cast %21 : vector<256x128xbf16> to vector<16x16x128xbf16>
    %c1 = arith.constant 1 : index
    %c8_20 = arith.constant 8 : index
    %c0_21 = arith.constant 0 : index
    %23 = vector.load %arg9[%c1, %c8_20, %c0_21] : memref<18x32x128xbf16, #tpu.memory_space<vmem>>, vector<16x16x128xbf16>
    tpu.vector_store %arg9[%c1, %c8_20, %c0_21], %22 {strides = array<i32>} : memref<18x32x128xbf16, #tpu.memory_space<vmem>>, vector<16x16x128xbf16>,
    %c0_22 = arith.constant 0 : index
    %c7 = arith.constant 7 : index
    %c0_23 = arith.constant 0 : index
    %24 = vector.load %arg9[%c0_22, %c7, %c0_23] : memref<18x32x128xbf16, #tpu.memory_space<vmem>>, vector<16x16x128xbf16>
    %25 = vector.shape_cast %24 : vector<16x16x128xbf16> to vector<256x128xbf16>
    %c0_24 = arith.constant 0 : index
    %c0_25 = arith.constant 0 : index
    %c0_26 = arith.constant 0 : index
    %c0_27 = arith.constant 0 : index
    %26 = vector.load %arg4[%c0_24, %c0_25, %c0_26, %c0_27] : memref<3x3x128x128xbf16, #tpu.memory_space<vmem>>, vector<1x1x128x128xbf16>
    %27 = vector.shape_cast %26 : vector<1x1x128x128xbf16> to vector<128x128xbf16>
    %cst_28 = arith.constant dense<0.000000e+00> : vector<256x128xf32>
    %28 = tpu.matmul %25, %27, %cst_28 {dimension_numbers = #tpu.dot_dimension_numbers<[1], [0], [0], [1], [0, 0, 1, 1], [], []>} : vector<256x128xbf16>, vector<128x128xbf16>, vector<256x128xf32> -> vector<256x128xf32>
    %c0_29 = arith.constant 0 : index
    %c8_30 = arith.constant 8 : index
    %c0_31 = arith.constant 0 : index
    %29 = vector.load %arg9[%c0_29, %c8_30, %c0_31] : memref<18x32x128xbf16, #tpu.memory_space<vmem>>, vector<16x16x128xbf16>
    %30 = vector.shape_cast %29 : vector<16x16x128xbf16> to vector<256x128xbf16>
    %c0_32 = arith.constant 0 : index
    %c1_33 = arith.constant 1 : index
    %c0_34 = arith.constant 0 : index
    %c0_35 = arith.constant 0 : index
    %31 = vector.load %arg4[%c0_32, %c1_33, %c0_34, %c0_35] : memref<3x3x128x128xbf16, #tpu.memory_space<vmem>>, vector<1x1x128x128xbf16>
    %32 = vector.shape_cast %31 : vector<1x1x128x128xbf16> to vector<128x128xbf16>
    %cst_36 = arith.constant dense<0.000000e+00> : vector<256x128xf32>
    %33 = tpu.matmul %30, %32, %cst_36 {dimension_numbers = #tpu.dot_dimension_numbers<[1], [0], [0], [1], [0, 0, 1, 1], [], []>} : vector<256x128xbf16>, vector<128x128xbf16>, vector<256x128xf32> -> vector<256x128xf32>
    %34 = arith.addf %28, %33 : vector<256x128xf32>
    %c0_37 = arith.constant 0 : index
    %c9 = arith.constant 9 : index
    %c0_38 = arith.constant 0 : index
    %35 = vector.load %arg9[%c0_37, %c9, %c0_38] : memref<18x32x128xbf16, #tpu.memory_space<vmem>>, vector<16x16x128xbf16>
    %36 = vector.shape_cast %35 : vector<16x16x128xbf16> to vector<256x128xbf16>
    %c0_39 = arith.constant 0 : index
    %c2 = arith.constant 2 : index
    %c0_40 = arith.constant 0 : index
    %c0_41 = arith.constant 0 : index
    %37 = vector.load %arg4[%c0_39, %c2, %c0_40, %c0_41] : memref<3x3x128x128xbf16, #tpu.memory_space<vmem>>, vector<1x1x128x128xbf16>
    %38 = vector.shape_cast %37 : vector<1x1x128x128xbf16> to vector<128x128xbf16>
    %cst_42 = arith.constant dense<0.000000e+00> : vector<256x128xf32>
    %39 = tpu.matmul %36, %38, %cst_42 {dimension_numbers = #tpu.dot_dimension_numbers<[1], [0], [0], [1], [0, 0, 1, 1], [], []>} : vector<256x128xbf16>, vector<128x128xbf16>, vector<256x128xf32> -> vector<256x128xf32>
    %40 = arith.addf %34, %39 : vector<256x128xf32>
    %c1_43 = arith.constant 1 : index
    %c7_44 = arith.constant 7 : index
    %c0_45 = arith.constant 0 : index
    %41 = vector.load %arg9[%c1_43, %c7_44, %c0_45] : memref<18x32x128xbf16, #tpu.memory_space<vmem>>, vector<16x16x128xbf16>
    %42 = vector.shape_cast %41 : vector<16x16x128xbf16> to vector<256x128xbf16>
    %c1_46 = arith.constant 1 : index
    %c0_47 = arith.constant 0 : index
    %c0_48 = arith.constant 0 : index
    %c0_49 = arith.constant 0 : index
    %43 = vector.load %arg4[%c1_46, %c0_47, %c0_48, %c0_49] : memref<3x3x128x128xbf16, #tpu.memory_space<vmem>>, vector<1x1x128x128xbf16>
    %44 = vector.shape_cast %43 : vector<1x1x128x128xbf16> to vector<128x128xbf16>
    %cst_50 = arith.constant dense<0.000000e+00> : vector<256x128xf32>
    %45 = tpu.matmul %42, %44, %cst_50 {dimension_numbers = #tpu.dot_dimension_numbers<[1], [0], [0], [1], [0, 0, 1, 1], [], []>} : vector<256x128xbf16>, vector<128x128xbf16>, vector<256x128xf32> -> vector<256x128xf32>
    %46 = arith.addf %40, %45 : vector<256x128xf32>
    %c1_51 = arith.constant 1 : index
    %c8_52 = arith.constant 8 : index
    %c0_53 = arith.constant 0 : index
    %47 = vector.load %arg9[%c1_51, %c8_52, %c0_53] : memref<18x32x128xbf16, #tpu.memory_space<vmem>>, vector<16x16x128xbf16>
    %48 = vector.shape_cast %47 : vector<16x16x128xbf16> to vector<256x128xbf16>
    %c1_54 = arith.constant 1 : index
    %c1_55 = arith.constant 1 : index
    %c0_56 = arith.constant 0 : index
    %c0_57 = arith.constant 0 : index
    %49 = vector.load %arg4[%c1_54, %c1_55, %c0_56, %c0_57] : memref<3x3x128x128xbf16, #tpu.memory_space<vmem>>, vector<1x1x128x128xbf16>
    %50 = vector.shape_cast %49 : vector<1x1x128x128xbf16> to vector<128x128xbf16>
    %cst_58 = arith.constant dense<0.000000e+00> : vector<256x128xf32>
    %51 = tpu.matmul %48, %50, %cst_58 {dimension_numbers = #tpu.dot_dimension_numbers<[1], [0], [0], [1], [0, 0, 1, 1], [], []>} : vector<256x128xbf16>, vector<128x128xbf16>, vector<256x128xf32> -> vector<256x128xf32>
    %52 = arith.addf %46, %51 : vector<256x128xf32>
    %c1_59 = arith.constant 1 : index
    %c9_60 = arith.constant 9 : index
    %c0_61 = arith.constant 0 : index
    %53 = vector.load %arg9[%c1_59, %c9_60, %c0_61] : memref<18x32x128xbf16, #tpu.memory_space<vmem>>, vector<16x16x128xbf16>
    %54 = vector.shape_cast %53 : vector<16x16x128xbf16> to vector<256x128xbf16>
    %c1_62 = arith.constant 1 : index
    %c2_63 = arith.constant 2 : index
    %c0_64 = arith.constant 0 : index
    %c0_65 = arith.constant 0 : index
    %55 = vector.load %arg4[%c1_62, %c2_63, %c0_64, %c0_65] : memref<3x3x128x128xbf16, #tpu.memory_space<vmem>>, vector<1x1x128x128xbf16>
    %56 = vector.shape_cast %55 : vector<1x1x128x128xbf16> to vector<128x128xbf16>
    %cst_66 = arith.constant dense<0.000000e+00> : vector<256x128xf32>
    %57 = tpu.matmul %54, %56, %cst_66 {dimension_numbers = #tpu.dot_dimension_numbers<[1], [0], [0], [1], [0, 0, 1, 1], [], []>} : vector<256x128xbf16>, vector<128x128xbf16>, vector<256x128xf32> -> vector<256x128xf32>
    %58 = arith.addf %52, %57 : vector<256x128xf32>
    %c2_67 = arith.constant 2 : index
    %c7_68 = arith.constant 7 : index
    %c0_69 = arith.constant 0 : index
    %59 = vector.load %arg9[%c2_67, %c7_68, %c0_69] : memref<18x32x128xbf16, #tpu.memory_space<vmem>>, vector<16x16x128xbf16>
    %60 = vector.shape_cast %59 : vector<16x16x128xbf16> to vector<256x128xbf16>
    %c2_70 = arith.constant 2 : index
    %c0_71 = arith.constant 0 : index
    %c0_72 = arith.constant 0 : index
    %c0_73 = arith.constant 0 : index
    %61 = vector.load %arg4[%c2_70, %c0_71, %c0_72, %c0_73] : memref<3x3x128x128xbf16, #tpu.memory_space<vmem>>, vector<1x1x128x128xbf16>
    %62 = vector.shape_cast %61 : vector<1x1x128x128xbf16> to vector<128x128xbf16>
    %cst_74 = arith.constant dense<0.000000e+00> : vector<256x128xf32>
    %63 = tpu.matmul %60, %62, %cst_74 {dimension_numbers = #tpu.dot_dimension_numbers<[1], [0], [0], [1], [0, 0, 1, 1], [], []>} : vector<256x128xbf16>, vector<128x128xbf16>, vector<256x128xf32> -> vector<256x128xf32>
    %64 = arith.addf %58, %63 : vector<256x128xf32>
    %c2_75 = arith.constant 2 : index
    %c8_76 = arith.constant 8 : index
    %c0_77 = arith.constant 0 : index
    %65 = vector.load %arg9[%c2_75, %c8_76, %c0_77] : memref<18x32x128xbf16, #tpu.memory_space<vmem>>, vector<16x16x128xbf16>
    %66 = vector.shape_cast %65 : vector<16x16x128xbf16> to vector<256x128xbf16>
    %c2_78 = arith.constant 2 : index
    %c1_79 = arith.constant 1 : index
    %c0_80 = arith.constant 0 : index
    %c0_81 = arith.constant 0 : index
    %67 = vector.load %arg4[%c2_78, %c1_79, %c0_80, %c0_81] : memref<3x3x128x128xbf16, #tpu.memory_space<vmem>>, vector<1x1x128x128xbf16>
    %68 = vector.shape_cast %67 : vector<1x1x128x128xbf16> to vector<128x128xbf16>
    %cst_82 = arith.constant dense<0.000000e+00> : vector<256x128xf32>
    %69 = tpu.matmul %66, %68, %cst_82 {dimension_numbers = #tpu.dot_dimension_numbers<[1], [0], [0], [1], [0, 0, 1, 1], [], []>} : vector<256x128xbf16>, vector<128x128xbf16>, vector<256x128xf32> -> vector<256x128xf32>
    %70 = arith.addf %64, %69 : vector<256x128xf32>
    %c2_83 = arith.constant 2 : index
    %c9_84 = arith.constant 9 : index
    %c0_85 = arith.constant 0 : index
    %71 = vector.load %arg9[%c2_83, %c9_84, %c0_85] : memref<18x32x128xbf16, #tpu.memory_space<vmem>>, vector<16x16x128xbf16>
    %72 = vector.shape_cast %71 : vector<16x16x128xbf16> to vector<256x128xbf16>
    %c2_86 = arith.constant 2 : index
    %c2_87 = arith.constant 2 : index
    %c0_88 = arith.constant 0 : index
    %c0_89 = arith.constant 0 : index
    %73 = vector.load %arg4[%c2_86, %c2_87, %c0_88, %c0_89] : memref<3x3x128x128xbf16, #tpu.memory_space<vmem>>, vector<1x1x128x128xbf16>
    %74 = vector.shape_cast %73 : vector<1x1x128x128xbf16> to vector<128x128xbf16>
    %cst_90 = arith.constant dense<0.000000e+00> : vector<256x128xf32>
    %75 = tpu.matmul %72, %74, %cst_90 {dimension_numbers = #tpu.dot_dimension_numbers<[1], [0], [0], [1], [0, 0, 1, 1], [], []>} : vector<256x128xbf16>, vector<128x128xbf16>, vector<256x128xf32> -> vector<256x128xf32>
    %76 = arith.addf %70, %75 : vector<256x128xf32>
    %c0_91 = arith.constant 0 : index
    %c0_92 = arith.constant 0 : index
    %77 = vector.load %arg5[%c0_91, %c0_92] : memref<1x128xf32, #tpu.memory_space<vmem>>, vector<1x128xf32>
    %78 = vector.broadcast %77 : vector<1x128xf32> to vector<256x128xf32>
    %79 = arith.addf %76, %78 : vector<256x128xf32>
    %cst_93 = arith.constant 0.000000e+00 : f32
    %80 = vector.broadcast %cst_93 : f32 to vector<256x128xf32>
    %81 = arith.maximumf %79, %80 : vector<256x128xf32>
    %82 = arith.truncf %81 : vector<256x128xf32> to vector<256x128xbf16>
    %c0_94 = arith.constant 0 : index
    %c0_95 = arith.constant 0 : index
    %83 = vector.load %arg6[%c0_94, %c0_95] : memref<128x512xbf16, #tpu.memory_space<vmem>>, vector<128x512xbf16>
    %cst_96 = arith.constant dense<0.000000e+00> : vector<256x512xf32>
    %84 = tpu.matmul %82, %83, %cst_96 {dimension_numbers = #tpu.dot_dimension_numbers<[1], [0], [0], [1], [0, 0, 1, 1], [], []>} : vector<256x128xbf16>, vector<128x512xbf16>, vector<256x512xf32> -> vector<256x512xf32>
    %c0_97 = arith.constant 0 : index
    %c0_98 = arith.constant 0 : index
    %c0_99 = arith.constant 0 : index
    %c0_100 = arith.constant 0 : index
    %85 = vector.load %arg1[%c0_97, %c0_98, %c0_99, %c0_100] : memref<1x16x16x512xbf16, #tpu.memory_space<vmem>>, vector<1x16x16x512xbf16>
    %86 = vector.shape_cast %85 : vector<1x16x16x512xbf16> to vector<16x16x512xbf16>
    %87 = vector.shape_cast %86 : vector<16x16x512xbf16> to vector<256x512xbf16>
    %88 = arith.extf %87 : vector<256x512xbf16> to vector<256x512xf32>
    %c0_101 = arith.constant 0 : index
    %c0_102 = arith.constant 0 : index
    %89 = vector.load %arg7[%c0_101, %c0_102] : memref<1x512xf32, #tpu.memory_space<vmem>>, vector<1x512xf32>
    %90 = vector.broadcast %89 : vector<1x512xf32> to vector<256x512xf32>
    %91 = arith.addf %84, %90 : vector<256x512xf32>
    %92 = arith.addf %91, %88 : vector<256x512xf32>
    %cst_103 = arith.constant 0.000000e+00 : f32
    %93 = vector.broadcast %cst_103 : f32 to vector<256x512xf32>
    %94 = arith.maximumf %92, %93 : vector<256x512xf32>
    %95 = vector.shape_cast %94 : vector<256x512xf32> to vector<1x16x16x512xf32>
    %c0_104 = arith.constant 0 : index
    %c0_105 = arith.constant 0 : index
    %c0_106 = arith.constant 0 : index
    %c0_107 = arith.constant 0 : index
    %96 = vector.load %arg8[%c0_104, %c0_105, %c0_106, %c0_107] : memref<1x16x16x512xf32, #tpu.memory_space<vmem>>, vector<1x16x16x512xf32>
    tpu.vector_store %arg8[%c0_104, %c0_105, %c0_106, %c0_107], %95 {strides = array<i32>} : memref<1x16x16x512xf32, #tpu.memory_space<vmem>>, vector<1x16x16x512xf32>,
    return
  }
  func.func @transform_0(%arg0: i32) -> (i32, i32, i32, i32) {
    %c0_i32 = arith.constant 0 : i32
    %c0_i32_0 = arith.constant 0 : i32
    %c0_i32_1 = arith.constant 0 : i32
    %c0_i32_2 = arith.constant 0 : i32
    return %arg0, %c0_i32, %c0_i32_0, %c0_i32_1 : i32, i32, i32, i32
  }
  func.func @transform_1(%arg0: i32) -> (i32, i32) {
    %c0_i32 = arith.constant 0 : i32
    %c0_i32_0 = arith.constant 0 : i32
    %c0_i32_1 = arith.constant 0 : i32
    return %c0_i32, %c0_i32_0 : i32, i32
  }
  func.func @transform_2(%arg0: i32) -> (i32, i32) {
    %c0_i32 = arith.constant 0 : i32
    %c0_i32_0 = arith.constant 0 : i32
    %c0_i32_1 = arith.constant 0 : i32
    return %c0_i32, %c0_i32_0 : i32, i32
  }
  func.func @transform_3(%arg0: i32) -> (i32, i32, i32, i32) {
    %c0_i32 = arith.constant 0 : i32
    %c0_i32_0 = arith.constant 0 : i32
    %c0_i32_1 = arith.constant 0 : i32
    %c0_i32_2 = arith.constant 0 : i32
    %c0_i32_3 = arith.constant 0 : i32
    return %c0_i32, %c0_i32_0, %c0_i32_1, %c0_i32_2 : i32, i32, i32, i32
  }
  func.func @transform_4(%arg0: i32) -> (i32, i32) {
    %c0_i32 = arith.constant 0 : i32
    %c0_i32_0 = arith.constant 0 : i32
    %c0_i32_1 = arith.constant 0 : i32
    return %c0_i32, %c0_i32_0 : i32, i32
  }
  func.func @transform_5(%arg0: i32) -> (i32, i32) {
    %c0_i32 = arith.constant 0 : i32
    %c0_i32_0 = arith.constant 0 : i32
    %c0_i32_1 = arith.constant 0 : i32
    return %c0_i32, %c0_i32_0 : i32, i32
  }
  func.func @transform_6(%arg0: i32) -> (i32, i32) {
    %c0_i32 = arith.constant 0 : i32
    %c0_i32_0 = arith.constant 0 : i32
    %c0_i32_1 = arith.constant 0 : i32
    return %c0_i32, %c0_i32_0 : i32, i32
  }
  func.func @transform_7(%arg0: i32) -> (i32, i32, i32, i32) {
    %c0_i32 = arith.constant 0 : i32
    %c0_i32_0 = arith.constant 0 : i32
    %c0_i32_1 = arith.constant 0 : i32
    %c0_i32_2 = arith.constant 0 : i32
    return %arg0, %c0_i32, %c0_i32_0, %c0_i32_1 : i32, i32, i32, i32
  }
}

</mosaic_0001>

<bundles_post_ra>
// kernel: tpu_custom_call.1
= control target key start
LH: loop header
LB: loop body
LE: loop exit
PB: predicated region body
PF: predicated region fallthrough
CT: control target
= control target key end

     0   :  { %s11240_s0 = inlined_call_operand.hbm [shape: bf16[8,16,16,512], index: 0, kind: input, shape index: {}]   ;;  %s11241_s1 = inlined_call_operand.hbm [shape: bf16[512,128], index: 1, kind: input, shape index: {}]   ;;  %s11242_s2 = inlined_call_operand.hbm [shape: f32[1,128], index: 2, kind: input, shape index: {}]   ;;  %s11243_s3 = inlined_call_operand.hbm [shape: bf16[3,3,128,128], index: 3, kind: input, shape index: {}]   ;;  %s11244_s4 = inlined_call_operand.hbm [shape: f32[1,128], index: 4, kind: input, shape index: {}]   ;;  %s11245_s5 = inlined_call_operand.hbm [shape: bf16[128,512], index: 5, kind: input, shape index: {}]   ;;  %s11246_s6 = inlined_call_operand.hbm [shape: f32[1,512], index: 6, kind: input, shape index: {}]   ;;  %s11247_s7 = inlined_call_operand.hbm [shape: f32[8,16,16,512], index: 7, kind: output, shape index: {}]  }
   0x1   :  { %11251 = sst [smem:[#allocation21_spill]] %s11241_s1 }
   0x2   :  { %12 = vsyncpa [#allocation4], 0 }
   0x3   :  { %14 = vsyncpa [#allocation4 + $0x1], 0 }
   0x4   :  { %15 = vsyncpa [#allocation7], 0 }
   0x5   :  { %16 = vsyncpa [#allocation10], 0 }
   0x6   :  { %17 = vsyncpa [#allocation13], 0 }
   0x7   :  { %18 = vsyncpa [#allocation5], 0 }
   0x8   :  { %20 = vsyncpa [#allocation5 + $0x1], 0  ;;  %s9467_s24 = smov 0   ;;  %s9469_s25 = smov 0  }
   0x9   :  { %s9471_s26 = smov 0   ;;  %s9473_s27 = smov 0  }
   0xa LB: > { %s9412_s28 = smov [#allocation6]   ;;  %s9488_s30 = sadd.s32 4294967295, %s9410_s27   ;;  %s9410_s27 = sphi %s9473_s27, %s11274_s27   ;;  %s9406_s26 = sphi %s9471_s26, %s11273_s26   ;;  %s9402_s25 = sphi %s9469_s25, %s11272_s25   ;;  %s9398_s24 = sphi %s9467_s24, %s11271_s24  }
   0xb   : > { %s221_s29 = sshll.u32 %s9412_s28, 4  ;;  %p7395_p0 = scmp.ge.s32.totalorder %s9410_s27, 1  ;;  %s9493_s29 = int_to_ptr.vmem [resolvable:$true] %s221_s29 }
   0xc   : > { %p11248_p1 = scmp.eq.s32.totalorder %s9488_s30, 0  ;;  %p209_p2 = scmp.lt.s32.totalorder %s9410_s27, 9 }
   0xd   : > { %s9413_s9 = smov [#allocation9]   ;;  %s9414_s12 = smov [#allocation12]  }
   0xe   : > { %p9495_p3 = pnand %p7395_p0, %p209_p2  ;;  %s245_s10 = sshll.u32 %s9413_s9, 4  ;;  %s9507_s10 = int_to_ptr.vmem [resolvable:$true] %s245_s10 }
   0xf   : > { %s269_s13 = sshll.u32 %s9414_s12, 4  ;;  %s11254_s1 = sld [smem:[#allocation21_spill]]  ;;  %s9509_s13 = int_to_ptr.vmem [resolvable:$true] %s269_s13 }
  0x10   : > { %s11252_s8 = scalar_select %p9495_p3, 1, 0 }
  0x11   : > { %p8796_p4 = pneg %p9495_p3 }
  0x13   : > { %p9503_p5 = pnand %p8796_p4, %p11248_p1 }
  0x15   : > { %s9134_s16 = scalar_lea.hbm %s11254_s1, 4096  ;;  %p9519_p7 = pneg %p9503_p5 }
  0x16   : > { %p9135_p6 = scmp.ne.s32.totalorder %s11254_s1, %s9134_s16  ;;  %p9141_p10 = scmp.lt.u32.totalorder %s9134_s16, %s11254_s1 }
  0x18   : > { %p9137_p8 = pnand %p9519_p7, %p9135_p6 }
  0x1a   : > { %p9138_p9 = pneg %p9137_p8 }
  0x1c   : > { %p9143_p11 = pnand %p9141_p10, %p9138_p9 }
  0x1e   : > { %9146 = shalt.err (!%p9143_p11)
}
  0x1f   : > { %s9147_s22 = scalar_lea.vmem %s9493_s29, 4096  ;;  %p9155_p2 = scmp.lt.s32.totalorder %s9493_s29, %s9493_s29 }
  0x20   : > { %p9148_p12 = scmp.ne.s32.totalorder %s9493_s29, %s9147_s22  ;;  %p9156_p4 = scmp.lt.s32.totalorder %s9147_s22, %s9147_s22 }
  0x22   : > { %p9150_p13 = pnand %p9148_p12, %p9519_p7  ;;  %p9157_p6 = por %p9156_p4, %p9155_p2 }
  0x24   : > { %p9151_p0 = pneg %p9150_p13 }
  0x26   : > { %p9158_p8 = pnand %p9157_p6, %p9151_p0 }
  0x28   : > { %9161 = shalt.err (!%p9158_p8)
}
  0x29   : > { %s9415_s23 = smov 64   ;;  %s9416_s28 = smov 4  }
  0x2a   : > { %8799 = dma.hbm_to_vmem [thread:$0]  (!%p9503_p5), %s11254_s1, 4096, %s9493_s29, [#allocation7], %s9415_s23, %s9415_s23, %s9416_s28  }
  0x2b   : > { %s9162_s16 = scalar_lea.hbm %s11243_s3, 9216 }
  0x2c   : > { %p9163_p9 = scmp.ne.s32.totalorder %s11243_s3, %s9162_s16  ;;  %p9169_p12 = scmp.lt.u32.totalorder %s9162_s16, %s11243_s3 }
  0x2e   : > { %p9165_p10 = pnand %p9163_p9, %p9519_p7 }
  0x30   : > { %p9166_p11 = pneg %p9165_p10 }
  0x32   : > { %p9171_p13 = pnand %p9169_p12, %p9166_p11 }
  0x34   : > { %9174 = shalt.err (!%p9171_p13)
}
  0x35   : > { %s9175_s29 = scalar_lea.vmem %s9507_s10, 9216  ;;  %p9183_p6 = scmp.lt.s32.totalorder %s9507_s10, %s9507_s10 }
  0x36   : > { %p9176_p0 = scmp.ne.s32.totalorder %s9507_s10, %s9175_s29  ;;  %p9184_p8 = scmp.lt.s32.totalorder %s9175_s29, %s9175_s29 }
  0x38   : > { %p9178_p2 = pnand %p9176_p0, %p9519_p7  ;;  %p9185_p9 = por %p9184_p8, %p9183_p6 }
  0x3a   : > { %p9179_p4 = pneg %p9178_p2 }
  0x3c   : > { %p9186_p10 = pnand %p9185_p9, %p9179_p4 }
  0x3e   : > { %9189 = shalt.err (!%p9186_p10)
}
  0x3f   : > { %8805 = dma.hbm_to_vmem [thread:$0]  (!%p9503_p5), %s11243_s3, 9216, %s9507_s10, [#allocation10], %s9415_s23, %s9415_s23, %s9416_s28  }
  0x40   : > { %s9190_s15 = scalar_lea.hbm %s11245_s5, 4096 }
  0x41   : > { %p9191_p11 = scmp.ne.s32.totalorder %s11245_s5, %s9190_s15  ;;  %p9197_p0 = scmp.lt.u32.totalorder %s9190_s15, %s11245_s5 }
  0x43   : > { %p9193_p12 = pnand %p9191_p11, %p9519_p7 }
  0x45   : > { %p9194_p13 = pneg %p9193_p12 }
  0x47   : > { %p9199_p2 = pnand %p9197_p0, %p9194_p13 }
  0x49   : > { %9202 = shalt.err (!%p9199_p2)
}
  0x4a   : > { %s9203_s10 = scalar_lea.vmem %s9509_s13, 4096  ;;  %p9211_p9 = scmp.lt.s32.totalorder %s9509_s13, %s9509_s13 }
  0x4b   : > { %p9204_p4 = scmp.ne.s32.totalorder %s9509_s13, %s9203_s10  ;;  %p9212_p10 = scmp.lt.s32.totalorder %s9203_s10, %s9203_s10 }
  0x4d   : > { %p9206_p6 = pnand %p9204_p4, %p9519_p7  ;;  %p9213_p11 = por %p9212_p10, %p9211_p9 }
  0x4f   : > { %p9207_p8 = pneg %p9206_p6 }
  0x51   : > { %p9214_p12 = pnand %p9213_p11, %p9207_p8 }
  0x53   : > { %9217 = shalt.err (!%p9214_p12)
}
  0x54   : > { %s9417_s23 = smov 256   ;;  %s9418_s28 = smov 16  }
  0x55   : > { %8811 = dma.hbm_to_vmem [thread:$0]  (!%p9503_p5), %s11245_s5, 4096, %s9509_s13, [#allocation13], %s9417_s23, %s9417_s23, %s9418_s28  }
  0x56   : > { %s9419_s22 = smov [#allocation8]   ;;  %s9420_s12 = smov [#allocation11]  }
  0x57   : > { %s235_s9 = sshll.u32 %s9419_s22, 4  ;;  %s259_s14 = sshll.u32 %s9420_s12, 4  ;;  %s236_s9 = int_to_ptr.vmem [resolvable:$true] %s235_s9  ;;  %s260_s14 = int_to_ptr.vmem [resolvable:$true] %s259_s14 }
  0x58   : > { %s9218_s17 = scalar_lea.hbm %s11242_s2, 16 }
  0x59   : > { %p9219_p13 = scmp.ne.s32.totalorder %s11242_s2, %s9218_s17  ;;  %p9225_p4 = scmp.lt.u32.totalorder %s9218_s17, %s11242_s2 }
  0x5b   : > { %p9221_p0 = pnand %p9219_p13, %p9519_p7 }
  0x5d   : > { %p9222_p2 = pneg %p9221_p0 }
  0x5f   : > { %p9227_p6 = pnand %p9225_p4, %p9222_p2 }
  0x61   : > { %9230 = shalt.err (!%p9227_p6)
}
  0x62   : > { %s9231_s13 = scalar_lea.vmem %s236_s9, 16  ;;  %s9238_s21 = scalar_lea.vmem %s236_s9, 32 }
  0x63   : > { %p9232_p8 = scmp.ne.s32.totalorder %s236_s9, %s9231_s13  ;;  %p9239_p11 = scmp.lt.s32.totalorder %s236_s9, %s236_s9 }
  0x64   : > { %p9240_p12 = scmp.lt.s32.totalorder %s9238_s21, %s9231_s13 }
  0x65   : > { %p9234_p9 = pnand %p9232_p8, %p9519_p7 }
  0x66   : > { %p9241_p1 = por %p9240_p12, %p9239_p11 }
  0x67   : > { %p9235_p10 = pneg %p9234_p9 }
  0x69   : > { %p9242_p3 = pnand %p9241_p1, %p9235_p10 }
  0x6b   : > { %9245 = shalt.err (!%p9242_p3)
}
  0x6c   : > { %8802 = dma.hbm_to_vmem [thread:$0]  (!%p9503_p5), %s11242_s2, 16, %s236_s9, [#allocation7]  }
  0x6d   : > { %s9246_s15 = scalar_lea.hbm %s11244_s4, 16 }
  0x6e   : > { %p9247_p13 = scmp.ne.s32.totalorder %s11244_s4, %s9246_s15  ;;  %p9253_p3 = scmp.lt.u32.totalorder %s9246_s15, %s11244_s4 }
  0x70   : > { %p9249_p0 = pnand %p9247_p13, %p9519_p7 }
  0x72   : > { %p9250_p1 = pneg %p9249_p0 }
  0x74   : > { %p9255_p2 = pnand %p9253_p3, %p9250_p1 }
  0x76   : > { %9258 = shalt.err (!%p9255_p2)
}
  0x77   : > { %s9259_s10 = scalar_lea.vmem %s260_s14, 16  ;;  %s9266_s9 = scalar_lea.vmem %s260_s14, 32 }
  0x78   : > { %p9260_p4 = scmp.ne.s32.totalorder %s260_s14, %s9259_s10  ;;  %p9267_p9 = scmp.lt.s32.totalorder %s260_s14, %s260_s14 }
  0x79   : > { %p9268_p10 = scmp.lt.s32.totalorder %s9266_s9, %s9259_s10 }
  0x7a   : > { %p9262_p6 = pnand %p9260_p4, %p9519_p7 }
  0x7b   : > { %p9269_p11 = por %p9268_p10, %p9267_p9 }
  0x7c   : > { %p9263_p8 = pneg %p9262_p6 }
  0x7e   : > { %p9270_p12 = pnand %p9269_p11, %p9263_p8 }
  0x80   : > { %9273 = shalt.err (!%p9270_p12)
}
  0x81   : > { %8808 = dma.hbm_to_vmem [thread:$0]  (!%p9503_p5), %s11244_s4, 16, %s260_s14, [#allocation10]  }
  0x82   : > { %s9421_s29 = smov [#allocation14]   ;;  %s9274_s15 = scalar_lea.hbm %s11246_s6, 64 }
  0x83   : > { %s283_s22 = sshll.u32 %s9421_s29, 4  ;;  %p9275_p13 = scmp.ne.s32.totalorder %s11246_s6, %s9274_s15  ;;  %s284_s22 = int_to_ptr.vmem [resolvable:$true] %s283_s22 }
  0x84   : > { %p9281_p3 = scmp.lt.u32.totalorder %s9274_s15, %s11246_s6 }
  0x85   : > { %p9277_p0 = pnand %p9275_p13, %p9519_p7 }
  0x87   : > { %p9278_p1 = pneg %p9277_p0 }
  0x89   : > { %p9283_p2 = pnand %p9281_p3, %p9278_p1 }
  0x8b   : > { %9286 = shalt.err (!%p9283_p2)
}
  0x8c   : > { %s9287_s14 = scalar_lea.vmem %s284_s22, 64  ;;  %p9295_p9 = scmp.lt.s32.totalorder %s284_s22, %s284_s22 }
  0x8d   : > { %p9288_p4 = scmp.ne.s32.totalorder %s284_s22, %s9287_s14  ;;  %p9296_p10 = scmp.lt.s32.totalorder %s9287_s14, %s9287_s14 }
  0x8f   : > { %p9290_p6 = pnand %p9288_p4, %p9519_p7  ;;  %p9297_p11 = por %p9296_p10, %p9295_p9 }
  0x91   : > { %p9291_p8 = pneg %p9290_p6 }
  0x93   : > { %p9298_p12 = pnand %p9297_p11, %p9291_p8 }
  0x95   : > { %9301 = shalt.err (!%p9298_p12)
}
  0x96   : > { %8814 = dma.hbm_to_vmem [thread:$0]  (!%p9503_p5), %s11246_s6, 64, %s284_s22, [#allocation13]  }
  0x97   : > { %s7394_s19 = sadd.s32 4294967294, %s9410_s27   ;;  %s9645_s11 = sadd.s32 1, %s9410_s27  }
  0x98   : > { %s30_s13 = ssub.s32 %s9410_s27, %s9645_s11  ;;  %s33_s21 = sadd.s32 1, %s9406_s26 }
  0x99   : > { %p31_p7 = scmp.eq.s32.totalorder %s30_s13, 0  ;;  %p40_p13 = scmp.ne.s32.totalorder %s9406_s26, %s9402_s25 }
  0x9a   : > { %p41_p0 = scmp.eq.s32.totalorder %s9410_s27, 0  ;;  %p46_p1 = scmp.ne.s32.totalorder %s9402_s25, %s9398_s24 }
  0x9b   : > { %s9656_s29 = scalar_select %p31_p7, %s9406_s26, %s33_s21  }
  0x9c   : > { %p9658_p3 = por %p41_p0, %p40_p13  ;;  %p11257_p2 = scmp.eq.s32.totalorder %s9488_s30, 0 }
  0x9d   : > { %p196_p4 = scmp.eq.s32.totalorder %s9488_s30, 7  ;;  %p202_p6 = scmp.eq.s32.totalorder %s7394_s19, 7 }
  0x9e   : > { %p9664_p5 = por %p11257_p2, %p46_p1  ;;  %p8829_p8 = scmp.lt.s32.totalorder %s9410_s27, 8 }
  0x9f   : > { %s294_s12 = sand.u32 1, %s9406_s26   ;;  %p9671_p9 = por %p196_p4, %p40_p13 }
  0xa0   : > { %p9675_p10 = por %p202_p6, %p46_p1  ;;  %s7403_s17 = sshll.u32 %s294_s12, 9 }
  0xa1   : > { %s11259_s15 = scalar_select %p9671_p9, 1, 0 }
  0xa2   : > { %s11260_s16 = scalar_select %p9675_p10, 1, 0 }
  0xa3   : > { %s7622_s18 = sshll.u32 %s9410_s27, 13  ;;  %s298_s9 = scalar_lea.vmem [#allocation3], %s7403_s17 }
  0xa4   : > { %s9683_s10 = scalar_lea.hbm %s11240_s0, %s7622_s18  ;;  %s305_s19 = sshll.u32 %s298_s9, 4  ;;  %s9685_s19 = int_to_ptr.vmem [resolvable:$true] %s305_s19 }
  0xa5   : > { %p9689_p11 = pnand %p8829_p8, %p9658_p3  ;;  %s9693_s21 = scalar_lea.sflag [#allocation4], %s294_s12 }
  0xa6   : > { %s9302_s20 = scalar_lea.hbm %s9683_s10, 8192  ;;  %s9307_s1 = scalar_lea.hbm %s11240_s0, 65536 }
  0xa7   : > { %p9303_p12 = scmp.ne.s32.totalorder %s9683_s10, %s9302_s20  ;;  %p9304_p7 = pneg %p9689_p11 }
  0xa8   : > { %p9308_p1 = scmp.lt.u32.totalorder %s9683_s10, %s11240_s0  ;;  %p9309_p3 = scmp.lt.u32.totalorder %s9307_s1, %s9302_s20 }
  0xa9   : > { %p9305_p13 = pnand %p9304_p7, %p9303_p12  ;;  %p9311_p4 = scmp.lt.u32.totalorder %s9302_s20, %s9683_s10 }
  0xaa   : > { %p9310_p2 = por %p9309_p3, %p9308_p1 }
  0xab   : > { %p9306_p0 = pneg %p9305_p13 }
  0xac   : > { %p9312_p6 = por %p9311_p4, %p9310_p2 }
  0xae   : > { %p9313_p8 = pnand %p9312_p6, %p9306_p0 }
  0xb0   : > { %9316 = shalt.err (!%p9313_p8)
}
  0xb1   : > { %s9317_s12 = scalar_lea.vmem %s9685_s19, 8192  ;;  %s9422_s17 = smov [#allocation3]  }
  0xb2   : > { %p9318_p12 = scmp.ne.s32.totalorder %s9685_s19, %s9317_s12  ;;  %s9322_s18 = sshll.u32 %s9422_s17, 4  ;;  %s9323_s18 = int_to_ptr.vmem [resolvable:$false] %s9322_s18 }
  0xb3   : > { %s9324_s14 = scalar_lea.vmem %s9323_s18, 16384  ;;  %p9325_p9 = scmp.lt.s32.totalorder %s9685_s19, %s9323_s18 }
  0xb4   : > { %p9320_p13 = pnand %p9318_p12, %p9304_p7  ;;  %p9326_p1 = scmp.lt.s32.totalorder %s9324_s14, %s9317_s12 }
  0xb6   : > { %p9321_p10 = pneg %p9320_p13  ;;  %p9327_p3 = por %p9326_p1, %p9325_p9 }
  0xb8   : > { %p9328_p2 = pnand %p9327_p3, %p9321_p10 }
  0xba   : > { %9331 = shalt.err (!%p9328_p2)
}
  0xbb   : > { %8818 = dma.hbm_to_vmem [thread:$0]  (!%p9689_p11), %s9683_s10, 8192, %s9685_s19, %s9693_s21, %s9417_s23, %s9417_s23, %s9418_s28  }
  0xbc   : > { %p11262_p7 = scmp.ne.s32.totalorder %s11252_s8, 0 }
  0xbd   : > { %s9727_s20 = sand.u32 (!%p11262_p7), 1, %s9402_s25  }
  0xbe   : > { %317 = sbr.rel (%p11262_p7) target bundleno = 1819 (0x71b), region = 48  ;;  %s7407_s1 = sshll.u32 (!%p11262_p7), %s9727_s20, 9 }
  0xbf   : > { %s320_s9 = scalar_lea.sflag (!%p11262_p7), [#allocation4], %s9727_s20  ;;  %s9731_s12 = scalar_lea.vmem (!%p11262_p7), [#allocation3], %s7407_s1 }
  0xc5   : > { %9377 = dma.done.wait (%p9664_p5), %s320_s9, 8192  }
  0xc6   : > { %9379 = vsyncadd (%p9664_p5), %s320_s9, 4294959104  ;;  %p11263_p9 = scmp.eq.s32.totalorder %s9488_s30, 0 }
  0xc8   : > { %9381 = dma.done.wait (%p11263_p9), [#allocation7], 4112   ;;  %p11264_p10 = pmov %p11263_p9 }
  0xc9   : > { %p11265_p11 = pmov %p11263_p9 }
  0xca   : > { %9383 = vsyncadd (%p11264_p10), [#allocation7], 4294963184 }
  0xcb   : > { %9385 = dma.done.wait (%p11265_p11), [#allocation10], 9232   ;;  %p11266_p0 = pmov %p11263_p9 }
  0xcd   : > { %9387 = vsyncadd (%p11266_p0), [#allocation10], 4294958064  ;;  %p11267_p4 = pmov %p11266_p0 }
  0xce   : > { %p11268_p6 = pmov %p11266_p0 }
  0xcf   : > { %9389 = dma.done.wait (%p11267_p4), [#allocation13], 4160  }
  0xd0   : > { %9391 = vsyncadd (%p11268_p6), [#allocation13], 4294963136  ;;  %v8882_v0 = vld [vmem:[#allocation6 + $0x40] sm:$0xff]   ;;  %v8884_v2 = vld [vmem:[#allocation6 + $0x48] sm:$0xff]   ;;  %vm1903_vm0 = vcmask 1043456   ;;  %s7414_s8 = sshll.u32 %s9727_s20, 10 }
  0xd1   : > { %v8883_v1 = vld [vmem:[#allocation6] sm:$0xff]   ;;  %7624 = vmatprep.subr.bf16.mxu1 %v8882_v0  ;;  %v8885_v3 = vld [vmem:[#allocation6 + $0x8] sm:$0xff]   ;;  %v8886_v4 = vld [vmem:[#allocation6 + $0x50] sm:$0xff]   ;;  %vm1550_vm1 = vsmask.f32 4352  ;;  %s10861_s23 = scalar_lea.vmem [#allocation15], %s7414_s8 }
  0xd2   : > { %7625 = vmatpush3.bf16.msra.mxu1 %v8883_v1  ;;  %v8887_v5 = vld [vmem:[#allocation6 + $0x10] sm:$0xff]   ;;  %v8888_v6 = vld [vmem:[#allocation6 + $0x58] sm:$0xff]   ;;  %v8890_v8 = vld [vmem:[#allocation6 + $0x60] sm:$0xff]   ;;  %vm2419_vm2 = vsmask.f32 3328  ;;  %s7623_s28 = sshll.u32 %s9488_s30, 14 }
  0xd3   : > { %7626 = vmatprep.subr.bf16.mxu1 %v8884_v2  ;;  %v8889_v7 = vld [vmem:[#allocation6 + $0x18] sm:$0xff]   ;;  %v8891_v9 = vld [vmem:[#allocation6 + $0x20] sm:$0xff]   ;;  %v8892_v10 = vld [vmem:[#allocation6 + $0x68] sm:$0xff]   ;;  %s7264_s22 = sshll.u32 %s10861_s23, 4  ;;  %s11192_s13 = scalar_lea.hbm %s11247_s7, %s7623_s28  ;;  %s11194_s22 = int_to_ptr.vmem [resolvable:$true] %s7264_s22 }
  0xd4   : > { %v8900_v11 = vld [vmem:[%s9731_s12 + $0x4] ss:$16 sps:$4 sm:$0xff]   ;;  %v8893_v12 = vld [vmem:[#allocation6 + $0x28] sm:$0xff]   ;;  %v8896_v15 = vld [vmem:[#allocation6 + $0x78] sm:$0xff]   ;;  %s7251_s30 = scalar_lea.sflag [#allocation5], %s9727_s20  ;;  %s9332_s21 = scalar_lea.vmem %s11194_s22, 16384 }
  0xd5   : > { %1058 = vmatprep.mubr.bf16.mxu1 %v8900_v11  ;;  %v8894_v13 = vld [vmem:[#allocation6 + $0x70] sm:$0xff]   ;;  %v8897_v16 = vld [vmem:[#allocation6 + $0x38] sm:$0xff]   ;;  %v8901_v17 = vld [vmem:[#allocation6 + $0xc0] sm:$0xff]   ;;  %p9333_p5 = scmp.ne.s32.totalorder %s11194_s22, %s9332_s21  ;;  %p11269_p8 = scmp.ne.s32.totalorder %s11259_s15, 0 }
  0xd6   : > { %7627 = vmatpush3.bf16.msra.mxu1 %v8885_v3  ;;  %v8895_v14 = vld [vmem:[#allocation6 + $0x30] sm:$0xff]   ;;  %v8902_v19 = vld [vmem:[#allocation6 + $0x80] sm:$0xff]   ;;  %v8909_v21 = vld [vmem:[#allocation6 + $0xc8] sm:$0xff]   ;;  %s9424_s17 = smov [#allocation15]  }
  0xd7   : > { %7628 = vmatprep.subr.bf16.mxu1 %v8886_v4  ;;  %v8898_v18 = vld [vmem:[%s9731_s12] ss:$16 sps:$4 sm:$0xff]   ;;  %v8903_v20 = vld [vmem:[%s9731_s12 + $0x24] ss:$16 sps:$4 sm:$0xff]   ;;  %v8910_v22 = vld [vmem:[#allocation6 + $0x88] sm:$0xff]   ;;  %p9334_p12 = pnand %p9333_p5, %p11269_p8  ;;  %s9336_s18 = sshll.u32 %s9424_s17, 4  ;;  %s9337_s18 = int_to_ptr.vmem [resolvable:$false] %s9336_s18 }
  0xd8   : > { %v8917_v23 = vld [vmem:[#allocation6 + $0xd0] sm:$0xff]   ;;  %v8925_v27 = vld [vmem:[#allocation6 + $0xd8] sm:$0xff]   ;;  %v8933_v29 = vld [vmem:[#allocation6 + $0xe0] sm:$0xff]   ;;  %s9338_s14 = scalar_lea.vmem %s9337_s18, 32768  ;;  %p9339_p1 = scmp.lt.s32.totalorder %s11194_s22, %s9337_s18 }
  0xd9   : > { %v8905_v24 = vld [vmem:[%s9731_s12 + $0x20] ss:$16 sps:$4 sm:$0xff]   ;;  %v8906_v25 = vld [vmem:[%s9731_s12 + $0x44] ss:$16 sps:$4 sm:$0xff]   ;;  %v8926_v28 = vld [vmem:[#allocation6 + $0x98] sm:$0xff]   ;;  %p9335_p13 = pneg %p9334_p12  ;;  %p9340_p3 = scmp.lt.s32.totalorder %s9338_s14, %s9332_s21 }
  0xda   : > { %7629 = vmatpush3.bf16.msra.mxu1 %v8887_v5  ;;  %v8918_v26 = vld [vmem:[#allocation6 + $0x90] sm:$0xff]   ;;  %v8934_v32 = vld [vmem:[#allocation6 + $0xa0] sm:$0xff]   ;;  %v8941_v33 = vld [vmem:[#allocation6 + $0xe8] sm:$0xff]  }
  0xdb   : > { %7630 = vmatprep.subr.bf16.mxu1 %v8888_v6  ;;  %v8908_v30 = vld [vmem:[%s9731_s12 + $0x40] ss:$16 sps:$4 sm:$0xff]   ;;  %v8911_v31 = vld [vmem:[%s9731_s12 + $0x64] ss:$16 sps:$4 sm:$0xff]   ;;  %v8942_v34 = vld [vmem:[#allocation6 + $0xa8] sm:$0xff]   ;;  %p9341_p2 = por %p9340_p3, %p9339_p1 }
  0xdc   : > { %v8949_v35 = vld [vmem:[#allocation6 + $0xf0] sm:$0xff]   ;;  %v8957_v39 = vld [vmem:[#allocation6 + $0xf8] sm:$0xff]  }
  0xdd   : > { %v8913_v36 = vld [vmem:[%s9731_s12 + $0x60] ss:$16 sps:$4 sm:$0xff]   ;;  %v8914_v37 = vld [vmem:[%s9731_s12 + $0x84] ss:$16 sps:$4 sm:$0xff]   ;;  %v8958_v40 = vld [vmem:[#allocation6 + $0xb8] sm:$0xff]   ;;  %p9342_p7 = pnand %p9341_p2, %p9335_p13 }
  0xde   : > { %7631 = vmatpush3.bf16.msra.mxu1 %v8889_v7  ;;  %v8950_v38 = vld [vmem:[#allocation6 + $0xb0] sm:$0xff]   ;;  %v8964_v0 = vld [vmem:[%s9731_s12 + $0xc] ss:$16 sps:$4 sm:$0xff]   ;;  %v8962_v1 = vld [vmem:[%s9731_s12 + $0x8] ss:$16 sps:$4 sm:$0xff]  }
  0xdf   : > { %7632 = vmatprep.subr.bf16.mxu1 %v8890_v8  ;;  %v8916_v41 = vld [vmem:[%s9731_s12 + $0x80] ss:$16 sps:$4 sm:$0xff]   ;;  %v8919_v42 = vld [vmem:[%s9731_s12 + $0xa4] ss:$16 sps:$4 sm:$0xff]   ;;  %v8965_v2 = vld [vmem:[%s9731_s12 + $0x2c] ss:$16 sps:$4 sm:$0xff]  }
  0xe0   : > { %v8921_v43 = vld [vmem:[%s9731_s12 + $0xa0] ss:$16 sps:$4 sm:$0xff]   ;;  %v8922_v44 = vld [vmem:[%s9731_s12 + $0xc4] ss:$16 sps:$4 sm:$0xff]   ;;  %v8967_v3 = vld [vmem:[%s9731_s12 + $0x28] ss:$16 sps:$4 sm:$0xff]  }
  0xe1   : > { %v8924_v45 = vld [vmem:[%s9731_s12 + $0xc0] ss:$16 sps:$4 sm:$0xff]   ;;  %v8927_v46 = vld [vmem:[%s9731_s12 + $0xe4] ss:$16 sps:$4 sm:$0xff]   ;;  %v8968_v4 = vld [vmem:[%s9731_s12 + $0x4c] ss:$16 sps:$4 sm:$0xff]  }
  0xe2   : > { %7633 = vmatpush3.bf16.msra.mxu1 %v8891_v9  ;;  %v8929_v47 = vld [vmem:[%s9731_s12 + $0xe0] ss:$16 sps:$4 sm:$0xff]   ;;  %v8930_v48 = vld [vmem:[%s9731_s12 + $0x104] ss:$16 sps:$4 sm:$0xff]   ;;  %v8970_v5 = vld [vmem:[%s9731_s12 + $0x48] ss:$16 sps:$4 sm:$0xff]  }
  0xe3   : > { %7634 = vmatprep.subr.bf16.mxu1 %v8892_v10  ;;  %v8932_v49 = vld [vmem:[%s9731_s12 + $0x100] ss:$16 sps:$4 sm:$0xff]   ;;  %v8935_v50 = vld [vmem:[%s9731_s12 + $0x124] ss:$16 sps:$4 sm:$0xff]   ;;  %v8971_v6 = vld [vmem:[%s9731_s12 + $0x6c] ss:$16 sps:$4 sm:$0xff]  }
  0xe4   : > { %v8937_v51 = vld [vmem:[%s9731_s12 + $0x120] ss:$16 sps:$4 sm:$0xff]   ;;  %v8938_v52 = vld [vmem:[%s9731_s12 + $0x144] ss:$16 sps:$4 sm:$0xff]   ;;  %v8973_v7 = vld [vmem:[%s9731_s12 + $0x68] ss:$16 sps:$4 sm:$0xff]  }
  0xe5   : > { %v8940_v53 = vld [vmem:[%s9731_s12 + $0x140] ss:$16 sps:$4 sm:$0xff]   ;;  %v8943_v54 = vld [vmem:[%s9731_s12 + $0x164] ss:$16 sps:$4 sm:$0xff]   ;;  %v8974_v8 = vld [vmem:[%s9731_s12 + $0x8c] ss:$16 sps:$4 sm:$0xff]  }
  0xe6   : > { %7635 = vmatpush3.bf16.msra.mxu1 %v8893_v12  ;;  %v8945_v55 = vld [vmem:[%s9731_s12 + $0x160] ss:$16 sps:$4 sm:$0xff]   ;;  %v8946_v56 = vld [vmem:[%s9731_s12 + $0x184] ss:$16 sps:$4 sm:$0xff]   ;;  %v8976_v9 = vld [vmem:[%s9731_s12 + $0x88] ss:$16 sps:$4 sm:$0xff]  }
  0xe7   : > { %7636 = vmatprep.subr.bf16.mxu1 %v8894_v13  ;;  %v8948_v57 = vld [vmem:[%s9731_s12 + $0x180] ss:$16 sps:$4 sm:$0xff]   ;;  %v8951_v58 = vld [vmem:[%s9731_s12 + $0x1a4] ss:$16 sps:$4 sm:$0xff]   ;;  %v8977_v10 = vld [vmem:[%s9731_s12 + $0xac] ss:$16 sps:$4 sm:$0xff]  }
  0xe8   : > { %v8953_v59 = vld [vmem:[%s9731_s12 + $0x1a0] ss:$16 sps:$4 sm:$0xff]   ;;  %v8954_v60 = vld [vmem:[%s9731_s12 + $0x1c4] ss:$16 sps:$4 sm:$0xff]   ;;  %v8979_v11 = vld [vmem:[%s9731_s12 + $0xa8] ss:$16 sps:$4 sm:$0xff]  }
  0xe9   : > { %v8956_v61 = vld [vmem:[%s9731_s12 + $0x1c0] ss:$16 sps:$4 sm:$0xff]   ;;  %v8959_v62 = vld [vmem:[%s9731_s12 + $0x1e4] ss:$16 sps:$4 sm:$0xff]   ;;  %v8980_v12 = vld [vmem:[%s9731_s12 + $0xcc] ss:$16 sps:$4 sm:$0xff]  }
  0xea   : > { %7637 = vmatpush3.bf16.msra.mxu1 %v8895_v14  ;;  %v8961_v63 = vld [vmem:[%s9731_s12 + $0x1e0] ss:$16 sps:$4 sm:$0xff]   ;;  %v8982_v13 = vld [vmem:[%s9731_s12 + $0xc8] ss:$16 sps:$4 sm:$0xff]   ;;  %v8983_v14 = vld [vmem:[%s9731_s12 + $0xec] ss:$16 sps:$4 sm:$0xff]  }
  0xeb   : > { %7638 = vmatprep.subr.bf16.mxu1 %v8896_v15  ;;  %v8985_v15 = vld [vmem:[%s9731_s12 + $0xe8] ss:$16 sps:$4 sm:$0xff]  }
  0xee   : > { %7639 = vmatpush3.bf16.msra.mxu1 %v8897_v16  ;;  %v8986_v16 = vld [vmem:[%s9731_s12 + $0x10c] ss:$16 sps:$4 sm:$0xff]  }
  0xef   : > { %7736 = vmatprep.subr.bf16.mxu1 %v8901_v17  ;;  %v8988_v17 = vld [vmem:[%s9731_s12 + $0x108] ss:$16 sps:$4 sm:$0xff]  }
  0xf1   : > { %1059 = vmatmul.mubr.bf16.vlgmr.msra.gmra.mrb[0].mxu1 %v8898_v18  ;;  %v8989_v18 = vld [vmem:[%s9731_s12 + $0x12c] ss:$16 sps:$4 sm:$0xff]  }
  0xf2   : > { %7737 = vmatpush3.bf16.msra.mxu1 %v8902_v19  ;;  %1066 = vmatprep.mubr.bf16.mxu1 %v8903_v20  ;;  %v8991_v19 = vld [vmem:[%s9731_s12 + $0x128] ss:$16 sps:$4 sm:$0xff]   ;;  %v8992_v20 = vld [vmem:[%s9731_s12 + $0x14c] ss:$16 sps:$4 sm:$0xff]  }
  0xf3   : > { %7738 = vmatprep.subr.bf16.mxu1 %v8909_v21  ;;  %v9010_v21 = vld [vmem:[#allocation9 + $0x40] sm:$0xff]  }
  0xf4   : > { %8064 = vmatprep.subr.bf16.mxu0 %v9010_v21 }
  0xf5   : > { %8065 = vmatpush3.bf16.msra.mxu0 %v9010_v21 }
  0xf6   : > { %7739 = vmatpush3.bf16.msra.mxu1 %v8910_v22  ;;  %v8994_v22 = vld [vmem:[%s9731_s12 + $0x148] ss:$16 sps:$4 sm:$0xff]  }
  0xf7   : > { %7740 = vmatprep.subr.bf16.mxu1 %v8917_v23  ;;  %v8995_v23 = vld [vmem:[%s9731_s12 + $0x16c] ss:$16 sps:$4 sm:$0xff]  }
  0xf9   : > { %1067 = vmatmul.mubr.bf16.gmra.mrb[4].mxu1 %v8905_v24  ;;  %v9011_v24 = vld [vmem:[#allocation9 + $0x48] sm:$0xff]  }
  0xfa   : > { %1074 = vmatprep.mubr.bf16.mxu1 %v8906_v25  ;;  %7741 = vmatpush3.bf16.msra.mxu1 %v8918_v26  ;;  %v9012_v25 = vld [vmem:[#allocation9 + $0x50] sm:$0xff]  }
  0xfb   : > { %7742 = vmatprep.subr.bf16.mxu1 %v8925_v27  ;;  %8066 = vmatprep.subr.bf16.mxu0 %v9011_v24 }
  0xfc   : > { %8067 = vmatpush3.bf16.msra.mxu0 %v9011_v24 }
  0xfd   : > { %8068 = vmatprep.subr.bf16.mxu0 %v9012_v25 }
  0xfe   : > { %7743 = vmatpush3.bf16.msra.mxu1 %v8926_v28  ;;  %v8997_v28 = vld [vmem:[%s9731_s12 + $0x168] ss:$16 sps:$4 sm:$0xff]  }
  0xff   : > { %7744 = vmatprep.subr.bf16.mxu1 %v8933_v29 }
 0x100   : > { %8069 = vmatpush3.bf16.msra.mxu0 %v9012_v25 }
 0x101   : > { %1075 = vmatmul.mubr.bf16.gmra.mrb[8].mxu1 %v8908_v30 }
 0x102   : > { %1082 = vmatprep.mubr.bf16.mxu1 %v8911_v31  ;;  %7745 = vmatpush3.bf16.msra.mxu1 %v8934_v32  ;;  %v8998_v31 = vld [vmem:[%s9731_s12 + $0x18c] ss:$16 sps:$4 sm:$0xff]  }
 0x103   : > { %7746 = vmatprep.subr.bf16.mxu1 %v8941_v33  ;;  %v9013_v33 = vld [vmem:[#allocation9 + $0x58] sm:$0xff]  }
 0x104   : > { %8070 = vmatprep.subr.bf16.mxu0 %v9013_v33 }
 0x105   : > { %8071 = vmatpush3.bf16.msra.mxu0 %v9013_v33 }
 0x106   : > { %7747 = vmatpush3.bf16.msra.mxu1 %v8942_v34 }
 0x107   : > { %7748 = vmatprep.subr.bf16.mxu1 %v8949_v35  ;;  %v9014_v35 = vld [vmem:[#allocation9 + $0x60] sm:$0xff]  }
 0x108   : > { %8072 = vmatprep.subr.bf16.mxu0 %v9014_v35 }
 0x109   : > { %1083 = vmatmul.mubr.bf16.gmra.mrb[12].mxu1 %v8913_v36  ;;  %8073 = vmatpush3.bf16.msra.mxu0 %v9014_v35 }
 0x10a   : > { %1090 = vmatprep.mubr.bf16.mxu1 %v8914_v37  ;;  %7749 = vmatpush3.bf16.msra.mxu1 %v8950_v38  ;;  %v9000_v38 = vld [vmem:[%s9731_s12 + $0x188] ss:$16 sps:$4 sm:$0xff]  }
 0x10b   : > { %7750 = vmatprep.subr.bf16.mxu1 %v8957_v39 }
 0x10e   : > { %7751 = vmatpush3.bf16.msra.mxu1 %v8958_v40 }
 0x10f   : > { %8496 = vmatprep.subr.bf16.mxu1 %v9010_v21 }
 0x111   : > { %1091 = vmatmul.mubr.bf16.gmra.mrb[16].mxu1 %v8916_v41  ;;  %v9001_v41 = vld [vmem:[%s9731_s12 + $0x1ac] ss:$16 sps:$4 sm:$0xff]  }
 0x112   : > { %1098 = vmatprep.mubr.bf16.mxu1 %v8919_v42 }
 0x119   : > { %1099 = vmatmul.mubr.bf16.gmra.mrb[20].mxu1 %v8921_v43  ;;  %v9015_v43 = vld [vmem:[#allocation9 + $0x68] sm:$0xff]  }
 0x11a   : > { %1106 = vmatprep.mubr.bf16.mxu1 %v8922_v44  ;;  %8074 = vmatprep.subr.bf16.mxu0 %v9015_v43 }
 0x11b   : > { %8075 = vmatpush3.bf16.msra.mxu0 %v9015_v43 }
 0x121   : > { %1107 = vmatmul.mubr.bf16.gmra.mrb[24].mxu1 %v8924_v45  ;;  %v9423_v45 = vmov 0  }
 0x122   : > { %1114 = vmatprep.mubr.bf16.mxu1 %v8927_v46  ;;  %1416 = vst [vmem:[#allocation2] sm:$0xf0] %v9423_v45  ;;  %1417 = vst [vmem:[#allocation2 + $0x8] sm:$0xf] %v9423_v45  ;;  %v9016_v46 = vld [vmem:[#allocation9 + $0x70] sm:$0xff]  }
 0x123   : > { %1380 = vst [vmem:[#allocation2] sm:$0xf] %v9423_v45  ;;  %1381 = vst [vmem:[#allocation2 + $0x10] sm:$0xf] %v9423_v45  ;;  %8076 = vmatprep.subr.bf16.mxu0 %v9016_v46 }
 0x124   : > { %1382 = vst [vmem:[#allocation2 + $0x20] sm:$0xf] %v9423_v45  ;;  %1383 = vst [vmem:[#allocation2 + $0x30] sm:$0xf] %v9423_v45  ;;  %8077 = vmatpush3.bf16.msra.mxu0 %v9016_v46 }
 0x125   : > { %1384 = vst [vmem:[#allocation2 + $0x40] sm:$0xf] %v9423_v45  ;;  %1385 = vst [vmem:[#allocation2 + $0x50] sm:$0xf] %v9423_v45 }
 0x126   : > { %1386 = vst [vmem:[#allocation2 + $0x60] sm:$0xf] %v9423_v45  ;;  %1387 = vst [vmem:[#allocation2 + $0x70] sm:$0xf] %v9423_v45 }
 0x127   : > { %1388 = vst [vmem:[#allocation2 + $0x80] sm:$0xf] %v9423_v45  ;;  %1389 = vst [vmem:[#allocation2 + $0x90] sm:$0xf] %v9423_v45 }
 0x128   : > { %1390 = vst [vmem:[#allocation2 + $0xa0] sm:$0xf] %v9423_v45  ;;  %1391 = vst [vmem:[#allocation2 + $0xb0] sm:$0xf] %v9423_v45 }
 0x129   : > { %1115 = vmatmul.mubr.bf16.gmra.mrb[28].mxu1 %v8929_v47  ;;  %1392 = vst [vmem:[#allocation2 + $0xc0] sm:$0xf] %v9423_v45  ;;  %1393 = vst [vmem:[#allocation2 + $0xd0] sm:$0xf] %v9423_v45 }
 0x12a   : > { %1122 = vmatprep.mubr.bf16.mxu1 %v8930_v48  ;;  %1394 = vst [vmem:[#allocation2 + $0xe0] sm:$0xf] %v9423_v45  ;;  %1395 = vst [vmem:[#allocation2 + $0xf0] sm:$0xf] %v9423_v45 }
 0x12b   : > { %1396 = vst [vmem:[#allocation2 + $0x100] sm:$0xf] %v9423_v45  ;;  %1397 = vst [vmem:[#allocation2 + $0x110] sm:$0xf] %v9423_v45 }
 0x12c   : > { %1398 = vst [vmem:[#allocation2 + $0x8] sm:$0xf0] %v9423_v45  ;;  %1399 = vst [vmem:[#allocation2 + $0x18] sm:$0xf0] %v9423_v45 }
 0x12d   : > { %1400 = vst [vmem:[#allocation2 + $0x28] sm:$0xf0] %v9423_v45  ;;  %1401 = vst [vmem:[#allocation2 + $0x38] sm:$0xf0] %v9423_v45 }
 0x12e   : > { %1402 = vst [vmem:[#allocation2 + $0x48] sm:$0xf0] %v9423_v45  ;;  %1403 = vst [vmem:[#allocation2 + $0x58] sm:$0xf0] %v9423_v45 }
 0x12f   : > { %1404 = vst [vmem:[#allocation2 + $0x68] sm:$0xf0] %v9423_v45  ;;  %1405 = vst [vmem:[#allocation2 + $0x78] sm:$0xf0] %v9423_v45 }
 0x130   : > { %1406 = vst [vmem:[#allocation2 + $0x88] sm:$0xf0] %v9423_v45  ;;  %1407 = vst [vmem:[#allocation2 + $0x98] sm:$0xf0] %v9423_v45 }
 0x131   : > { %1123 = vmatmul.mubr.bf16.gmra.mrb[32].mxu1 %v8932_v49  ;;  %1408 = vst [vmem:[#allocation2 + $0xa8] sm:$0xf0] %v9423_v45  ;;  %1409 = vst [vmem:[#allocation2 + $0xb8] sm:$0xf0] %v9423_v45  ;;  %v9003_v49 = vld [vmem:[%s9731_s12 + $0x1a8] ss:$16 sps:$4 sm:$0xff]  }
 0x132   : > { %1130 = vmatprep.mubr.bf16.mxu1 %v8935_v50  ;;  %1410 = vst [vmem:[#allocation2 + $0xc8] sm:$0xf0] %v9423_v45  ;;  %1411 = vst [vmem:[#allocation2 + $0xd8] sm:$0xf0] %v9423_v45 }
 0x133   : > { %1412 = vst [vmem:[#allocation2 + $0xe8] sm:$0xf0] %v9423_v45  ;;  %1413 = vst [vmem:[#allocation2 + $0xf8] sm:$0xf0] %v9423_v45 }
 0x134   : > { %1414 = vst [vmem:[#allocation2 + $0x108] sm:$0xf0] %v9423_v45  ;;  %1415 = vst [vmem:[#allocation2 + $0x118] sm:$0xf0] %v9423_v45 }
 0x135   : > { %1419 = vst [vmem:[#allocation2 + $0x110] sm:$0xf0] %v9423_v45  ;;  %1420 = vst [vmem:[#allocation2 + $0x118] sm:$0xf] %v9423_v45 }
 0x139   : > { %1131 = vmatmul.mubr.bf16.gmra.mrb[36].mxu1 %v8937_v51 }
 0x13a   : > { %1138 = vmatprep.mubr.bf16.mxu1 %v8938_v52  ;;  %v9004_v52 = vld [vmem:[%s9731_s12 + $0x1cc] ss:$16 sps:$4 sm:$0xff]  }
 0x141   : > { %1139 = vmatmul.mubr.bf16.gmra.mrb[40].mxu1 %v8940_v53 }
 0x142   : > { %1146 = vmatprep.mubr.bf16.mxu1 %v8943_v54  ;;  %v9017_v54 = vld [vmem:[#allocation9 + $0x78] sm:$0xff]  }
 0x143   : > { %8078 = vmatprep.subr.bf16.mxu0 %v9017_v54 }
 0x144   : > { %8079 = vmatpush3.bf16.msra.mxu0 %v9017_v54 }
 0x149   : > { %1147 = vmatmul.mubr.bf16.gmra.mrb[44].mxu1 %v8945_v55 }
 0x14a   : > { %1154 = vmatprep.mubr.bf16.mxu1 %v8946_v56  ;;  %v9862_v56 = vld [vmem:[#allocation2 + $0x8] sm:$0xf] }
 0x151   : > { %1155 = vmatmul.mubr.bf16.gmra.mrb[48].mxu1 %v8948_v57  ;;  %v1855_v57 = vld [vmem:[#allocation2] sm:$0xf0] }
 0x152   : > { %1162 = vmatprep.mubr.bf16.mxu1 %v8951_v58  ;;  %v1904_v58 = vrot.slane %v1855_v57, 4 }
 0x159   : > { %1163 = vmatmul.mubr.bf16.gmra.mrb[52].mxu1 %v8953_v59  ;;  %v1905_v59 = vrot.slane %v9862_v56, 4 }
 0x15a   : > { %1170 = vmatprep.mubr.bf16.mxu1 %v8954_v60 }
 0x15b   : > { %v1906_v60 = vsel %vm1903_vm0, %v1904_v58, %v1905_v59 }
 0x15c   : > { %8080 = vmatprep.mubr.bf16.mxu0 %v1906_v60 }
 0x161   : > { %1171 = vmatmul.mubr.bf16.gmra.mrb[56].mxu1 %v8956_v61 }
 0x162   : > { %1178 = vmatprep.mubr.bf16.mxu1 %v8959_v62 }
 0x169   : > { %1179 = vmatmul.mubr.bf16.gmra.mrb[60].mxu1 %v8961_v63  ;;  %v9006_v63 = vld [vmem:[%s9731_s12 + $0x1c8] ss:$16 sps:$4 sm:$0xff]  }
 0x16a   : > { %1219 = vmatprep.mubr.bf16.mxu1 %v8964_v0 }
 0x171   : > { %1220 = vmatmul.mubr.bf16.vlgmr.msra.gmra.mrb[64].mxu1 %v8962_v1 }
 0x172   : > { %1227 = vmatprep.mubr.bf16.mxu1 %v8965_v2  ;;  %8504 = vmatpush3.bf16.msra.mxu1 %v9010_v21  ;;  %v9007_v2 = vld [vmem:[%s9731_s12 + $0x1ec] ss:$16 sps:$4 sm:$0xff]  }
 0x173   : > { %8497 = vmatprep.subr.bf16.mxu1 %v9011_v24 }
 0x176   : > { %8505 = vmatpush3.bf16.msra.mxu1 %v9011_v24 }
 0x177   : > { %8498 = vmatprep.subr.bf16.mxu1 %v9012_v25 }
 0x179   : > { %1228 = vmatmul.mubr.bf16.gmra.mrb[68].mxu1 %v8967_v3 }
 0x17a   : > { %1235 = vmatprep.mubr.bf16.mxu1 %v8968_v4  ;;  %8506 = vmatpush3.bf16.msra.mxu1 %v9012_v25 }
 0x17b   : > { %8499 = vmatprep.subr.bf16.mxu1 %v9013_v33 }
 0x17e   : > { %8507 = vmatpush3.bf16.msra.mxu1 %v9013_v33 }
 0x17f   : > { %8500 = vmatprep.subr.bf16.mxu1 %v9014_v35 }
 0x181   : > { %1236 = vmatmul.mubr.bf16.gmra.mrb[72].mxu1 %v8970_v5 }
 0x182   : > { %1243 = vmatprep.mubr.bf16.mxu1 %v8971_v6  ;;  %8508 = vmatpush3.bf16.msra.mxu1 %v9014_v35 }
 0x183   : > { %8501 = vmatprep.subr.bf16.mxu1 %v9015_v43 }
 0x186   : > { %8509 = vmatpush3.bf16.msra.mxu1 %v9015_v43 }
 0x187   : > { %8502 = vmatprep.subr.bf16.mxu1 %v9016_v46 }
 0x189   : > { %1244 = vmatmul.mubr.bf16.gmra.mrb[76].mxu1 %v8973_v7  ;;  %v9009_v7 = vld [vmem:[%s9731_s12 + $0x1e8] ss:$16 sps:$4 sm:$0xff]  }
 0x18a   : > { %1251 = vmatprep.mubr.bf16.mxu1 %v8974_v8  ;;  %8510 = vmatpush3.bf16.msra.mxu1 %v9016_v46 }
 0x18b   : > { %8503 = vmatprep.subr.bf16.mxu1 %v9017_v54 }
 0x18e   : > { %8511 = vmatpush3.bf16.msra.mxu1 %v9017_v54 }
 0x191   : > { %1252 = vmatmul.mubr.bf16.gmra.mrb[80].mxu1 %v8976_v9 }
 0x192   : > { %1259 = vmatprep.mubr.bf16.mxu1 %v8977_v10 }
 0x199   : > { %1260 = vmatmul.mubr.bf16.gmra.mrb[84].mxu1 %v8979_v11 }
 0x19a   : > { %1267 = vmatprep.mubr.bf16.mxu1 %v8980_v12 }
 0x1a1   : > { %1268 = vmatmul.mubr.bf16.gmra.mrb[88].mxu1 %v8982_v13 }
 0x1a2   : > { %1275 = vmatprep.mubr.bf16.mxu1 %v8983_v14 }
 0x1a9   : > { %1276 = vmatmul.mubr.bf16.gmra.mrb[92].mxu1 %v8985_v15 }
 0x1aa   : > { %1283 = vmatprep.mubr.bf16.mxu1 %v8986_v16 }
 0x1b1   : > { %1284 = vmatmul.mubr.bf16.gmra.mrb[96].mxu1 %v8988_v17 }
 0x1b2   : > { %1291 = vmatprep.mubr.bf16.mxu1 %v8989_v18 }
 0x1b9   : > { %1292 = vmatmul.mubr.bf16.gmra.mrb[100].mxu1 %v8991_v19  ;;  %v9881_v19 = vld [vmem:[#allocation9] sm:$0xff]  }
 0x1ba   : > { %1299 = vmatprep.mubr.bf16.mxu1 %v8992_v20  ;;  %8112 = vmatprep.subr.bf16.mxu0 %v9881_v19 }
 0x1c1   : > { %1300 = vmatmul.mubr.bf16.gmra.mrb[104].mxu1 %v8994_v22 }
 0x1c2   : > { %1307 = vmatprep.mubr.bf16.mxu1 %v8995_v23 }
 0x1c4   : > { %v7640_v26 = vpop.f32.mrb[0].mxu1 }
 0x1c5   : > { %v7641_v27 = vpop.f32.mrb[1].mxu1 }
 0x1c6   : > { %v9805_v29 = vadd.f32 %v7641_v27, %v7640_v26  ;;  %v7643_v30 = vpop.f32.mrb[2].mxu1 }
 0x1c7   : > { %v7644_v32 = vpop.f32.mrb[3].mxu1 }
 0x1c8   : > { %v9808_v34 = vadd.f32 %v7644_v32, %v7643_v30 }
 0x1c9   : > { %1308 = vmatmul.mubr.bf16.gmra.mrb[108].mxu1 %v8997_v28 }
 0x1ca   : > { %1315 = vmatprep.mubr.bf16.mxu1 %v8998_v31 }
 0x1cc   : > { %v7646_v36 = vpop.f32.mrb[4].mxu1 }
 0x1cd   : > { %v7647_v37 = vpop.f32.mrb[5].mxu1 }
 0x1ce   : > { %v9811_v39 = vadd.f32 %v7647_v37, %v7646_v36  ;;  %v7649_v40 = vpop.f32.mrb[6].mxu1 }
 0x1cf   : > { %v7650_v42 = vpop.f32.mrb[7].mxu1 }
 0x1d0   : > { %v9814_v44 = vadd.f32 %v7650_v42, %v7649_v40 }
 0x1d1   : > { %1316 = vmatmul.mubr.bf16.gmra.mrb[112].mxu1 %v9000_v38 }
 0x1d2   : > { %1323 = vmatprep.mubr.bf16.mxu1 %v9001_v41 }
 0x1d4   : > { %v7652_v47 = vpop.f32.mrb[8].mxu1 }
 0x1d5   : > { %v7653_v48 = vpop.f32.mrb[9].mxu1 }
 0x1d6   : > { %v9857_v50 = vadd.f32 %v7653_v48, %v7652_v47  ;;  %v7655_v51 = vpop.f32.mrb[10].mxu1 }
 0x1d7   : > { %v7656_v53 = vpop.f32.mrb[11].mxu1 }
 0x1d8   : > { %v9860_v55 = vadd.f32 %v7656_v53, %v7655_v51 }
 0x1d9   : > { %1324 = vmatmul.mubr.bf16.gmra.mrb[116].mxu1 %v9003_v49 }
 0x1da   : > { %1331 = vmatprep.mubr.bf16.mxu1 %v9004_v52 }
 0x1dc   : > { %v7658_v61 = vpop.f32.mrb[12].mxu1 }
 0x1dd   : > { %v7659_v62 = vpop.f32.mrb[13].mxu1 }
 0x1de   : > { %v9867_v0 = vadd.f32 %v7659_v62, %v7658_v61  ;;  %v7661_v1 = vpop.f32.mrb[14].mxu1 }
 0x1df   : > { %v7662_v3 = vpop.f32.mrb[15].mxu1 }
 0x1e0   : > { %v9870_v4 = vadd.f32 %v7662_v3, %v7661_v1 }
 0x1e1   : > { %1332 = vmatmul.mubr.bf16.gmra.mrb[120].mxu1 %v9006_v63 }
 0x1e2   : > { %1339 = vmatprep.mubr.bf16.mxu1 %v9007_v2 }
 0x1e4   : > { %v7664_v5 = vpop.f32.mrb[16].mxu1 }
 0x1e5   : > { %v7665_v6 = vpop.f32.mrb[17].mxu1 }
 0x1e6   : > { %v9873_v8 = vadd.f32 %v7665_v6, %v7664_v5  ;;  %v7667_v9 = vpop.f32.mrb[18].mxu1 }
 0x1e7   : > { %v7668_v10 = vpop.f32.mrb[19].mxu1 }
 0x1e8   : > { %v9875_v11 = vadd.f32 %v7668_v10, %v7667_v9 }
 0x1e9   : > { %1340 = vmatmul.mubr.bf16.gmra.mrb[124].mxu1 %v9009_v7 }
 0x1ec   : > { %v7670_v12 = vpop.f32.mrb[20].mxu1 }
 0x1ed   : > { %v7671_v13 = vpop.f32.mrb[21].mxu1 }
 0x1ee   : > { %v9877_v14 = vadd.f32 %v7671_v13, %v7670_v12  ;;  %v7673_v15 = vpop.f32.mrb[22].mxu1 }
 0x1ef   : > { %v7674_v16 = vpop.f32.mrb[23].mxu1 }
 0x1f0   : > { %v9879_v17 = vadd.f32 %v7674_v16, %v7673_v15 }
 0x1f4   : > { %v7676_v18 = vpop.f32.mrb[24].mxu1 }
 0x1f5   : > { %v7677_v20 = vpop.f32.mrb[25].mxu1 }
 0x1f6   : > { %v9883_v21 = vadd.f32 %v7677_v20, %v7676_v18  ;;  %v7679_v22 = vpop.f32.mrb[26].mxu1 }
 0x1f7   : > { %v7680_v23 = vpop.f32.mrb[27].mxu1 }
 0x1f8   : > { %v9886_v24 = vadd.f32 %v7680_v23, %v7679_v22 }
 0x1fc   : > { %v7682_v25 = vpop.f32.mrb[28].mxu1 }
 0x1fd   : > { %v7683_v26 = vpop.f32.mrb[29].mxu1 }
 0x1fe   : > { %v9888_v27 = vadd.f32 %v7683_v26, %v7682_v25  ;;  %v7685_v28 = vpop.f32.mrb[30].mxu1 }
 0x1ff   : > { %v7686_v30 = vpop.f32.mrb[31].mxu1 }
 0x200   : > { %v9890_v31 = vadd.f32 %v7686_v30, %v7685_v28 }
 0x204   : > { %v7688_v32 = vpop.f32.mrb[32].mxu1 }
 0x205   : > { %v7689_v33 = vpop.f32.mrb[33].mxu1 }
 0x206   : > { %v9892_v35 = vadd.f32 %v7689_v33, %v7688_v32  ;;  %v7691_v36 = vpop.f32.mrb[34].mxu1 }
 0x207   : > { %v7692_v37 = vpop.f32.mrb[35].mxu1 }
 0x208   : > { %v9894_v38 = vadd.f32 %v7692_v37, %v7691_v36  ;;  %v9924_v37 = vld [vmem:[#allocation8] ss:$0 sm:$0xff] }
 0x20c   : > { %v7694_v40 = vpop.f32.mrb[36].mxu1 }
 0x20d   : > { %v7695_v41 = vpop.f32.mrb[37].mxu1 }
 0x20e   : > { %v9896_v42 = vadd.f32 %v7695_v41, %v7694_v40  ;;  %v7697_v43 = vpop.f32.mrb[38].mxu1 }
 0x20f   : > { %v7698_v46 = vpop.f32.mrb[39].mxu1 }
 0x210   : > { %v9898_v47 = vadd.f32 %v7698_v46, %v7697_v43  ;;  %v1061_v43 = vadd.f32 %v9805_v29, %v9924_v37 }
 0x214   : > { %v7700_v48 = vpop.f32.mrb[40].mxu1 }
 0x215   : > { %v7701_v49 = vpop.f32.mrb[41].mxu1 }
 0x216   : > { %v9900_v51 = vadd.f32 %v7701_v49, %v7700_v48  ;;  %v7703_v52 = vpop.f32.mrb[42].mxu1 }
 0x217   : > { %v7704_v53 = vpop.f32.mrb[43].mxu1 }
 0x218   : > { %v9902_v54 = vadd.f32 %v7704_v53, %v7703_v52  ;;  %v1064_v53 = vadd.f32 %v9808_v34, %v9924_v37 }
 0x21c   : > { %v7706_v57 = vpop.f32.mrb[44].mxu1 }
 0x21d   : > { %v7707_v58 = vpop.f32.mrb[45].mxu1 }
 0x21e   : > { %v9904_v59 = vadd.f32 %v7707_v58, %v7706_v57  ;;  %v7709_v60 = vpop.f32.mrb[46].mxu1 }
 0x21f   : > { %v7710_v61 = vpop.f32.mrb[47].mxu1 }
 0x220   : > { %v9906_v62 = vadd.f32 %v7710_v61, %v7709_v60 }
 0x224   : > { %v7712_v63 = vpop.f32.mrb[48].mxu1 }
 0x225   : > { %v7713_v1 = vpop.f32.mrb[49].mxu1 }
 0x226   : > { %v9908_v2 = vadd.f32 %v7713_v1, %v7712_v63  ;;  %v7715_v3 = vpop.f32.mrb[50].mxu1 }
 0x227   : > { %v7716_v5 = vpop.f32.mrb[51].mxu1 }
 0x228   : > { %v9910_v6 = vadd.f32 %v7716_v5, %v7715_v3  ;;  %v1069_v5 = vadd.f32 %v9811_v39, %v9924_v37 }
 0x22c   : > { %v7718_v7 = vpop.f32.mrb[52].mxu1 }
 0x22d   : > { %v7719_v9 = vpop.f32.mrb[53].mxu1 }
 0x22e   : > { %v9912_v10 = vadd.f32 %v7719_v9, %v7718_v7  ;;  %v7721_v12 = vpop.f32.mrb[54].mxu1 }
 0x22f   : > { %v7722_v13 = vpop.f32.mrb[55].mxu1 }
 0x230   : > { %v9914_v15 = vadd.f32 %v7722_v13, %v7721_v12 }
 0x234   : > { %v7724_v16 = vpop.f32.mrb[56].mxu1 }
 0x235   : > { %v7725_v18 = vpop.f32.mrb[57].mxu1 }
 0x236   : > { %v9916_v20 = vadd.f32 %v7725_v18, %v7724_v16  ;;  %v7727_v22 = vpop.f32.mrb[58].mxu1  ;;  %v1072_v16 = vadd.f32 %v9814_v44, %v9924_v37 }
 0x237   : > { %v7728_v23 = vpop.f32.mrb[59].mxu1 }
 0x238   : > { %v9918_v25 = vadd.f32 %v7728_v23, %v7727_v22 }
 0x23c   : > { %v7730_v26 = vpop.f32.mrb[60].mxu1 }
 0x23d   : > { %v7731_v28 = vpop.f32.mrb[61].mxu1 }
 0x23e   : > { %v9920_v30 = vadd.f32 %v7731_v28, %v7730_v26  ;;  %v7733_v32 = vpop.f32.mrb[62].mxu1 }
 0x23f   : > { %v7734_v33 = vpop.f32.mrb[63].mxu1 }
 0x240   : > { %v9922_v36 = vadd.f32 %v7734_v33, %v7733_v32  ;;  %v1077_v33 = vadd.f32 %v9857_v50, %v9924_v37 }
 0x244   : > { %v7752_v40 = vpop.f32.mrb[64].mxu1 }
 0x245   : > { %v7753_v41 = vpop.f32.mrb[65].mxu1 }
 0x246   : > { %v7754_v46 = vadd.f32 %v7753_v41, %v7752_v40  ;;  %v7755_v48 = vpop.f32.mrb[66].mxu1 }
 0x247   : > { %v7756_v49 = vpop.f32.mrb[67].mxu1 }
 0x248   : > { %v1222_v52 = vadd.f32 %v7754_v46, %v1061_v43  ;;  %v7757_v57 = vadd.f32 %v7756_v49, %v7755_v48  ;;  %v1080_v48 = vadd.f32 %v9860_v55, %v9924_v37  ;;  %v1085_v55 = vadd.f32 %v9867_v0, %v9924_v37 }
 0x24a   : > { %v1225_v58 = vadd.f32 %v7757_v57, %v1064_v53  ;;  %v1348_v60 = vmax.f32 %v1222_v52, 0.0 }
 0x24c   : > { %v1349_v61 = vmax.f32 %v1225_v58, 0.0  ;;  %v7758_v63 = vpop.f32.mrb[68].mxu1 }
 0x24d   : > { %v7759_v1 = vpop.f32.mrb[69].mxu1 }
 0x24e   : > { %v1421_v3 = vpack.c.bf16 %v1349_v61, %v1348_v60  ;;  %v7760_v7 = vadd.f32 %v7759_v1, %v7758_v63  ;;  %v7761_v9 = vpop.f32.mrb[70].mxu1  ;;  %v9019_v63 = vld [vmem:[#allocation9 + $0x8] sm:$0xff]  }
 0x24f   : > { %v7762_v29 = vpop.f32.mrb[71].mxu1 }
 0x250   : > { %v1453_v12 = vrot.slane %v1421_v3, 4  ;;  %v1230_v13 = vadd.f32 %v7760_v7, %v1069_v5  ;;  %v7763_v18 = vadd.f32 %v7762_v29, %v7761_v9 }
 0x252   : > { %1486 = vst [vmem:[#allocation2 + $0x18] ss:$-4 sps:$4 sm:$0xff] %v1453_v12   ;;  %v1233_v34 = vadd.f32 %v7763_v18, %v1072_v16  ;;  %v1350_v22 = vmax.f32 %v1230_v13, 0.0  ;;  %v1088_v16 = vadd.f32 %v9870_v4, %v9924_v37 }
 0x254   : > { %v1351_v23 = vmax.f32 %v1233_v34, 0.0  ;;  %v7764_v26 = vpop.f32.mrb[72].mxu1  ;;  %v9020_v34 = vld [vmem:[#allocation9 + $0x10] sm:$0xff]  }
 0x255   : > { %v7765_v28 = vpop.f32.mrb[73].mxu1 }
 0x256   : > { %v1422_v32 = vpack.c.bf16 %v1351_v23, %v1350_v22  ;;  %v7766_v39 = vadd.f32 %v7765_v28, %v7764_v26  ;;  %v7767_v40 = vpop.f32.mrb[74].mxu1 }
 0x257   : > { %v7768_v41 = vpop.f32.mrb[75].mxu1 }
 0x258   : > { %v1454_v43 = vrot.slane %v1422_v32, 4  ;;  %v1238_v46 = vadd.f32 %v7766_v39, %v1077_v33  ;;  %v7769_v44 = vadd.f32 %v7768_v41, %v7767_v40  ;;  %v9021_v40 = vld [vmem:[#allocation9 + $0x18] sm:$0xff]   ;;  %v1093_v41 = vadd.f32 %v9873_v8, %v9924_v37 }
 0x259   : > { %v9938_v49 = vld [vmem:[#allocation2 + $0x18] sm:$0xf]  ;;  %v1856_v52 = vld [vmem:[#allocation2 + $0x10] sm:$0xf0] }
 0x25a   : > { %1488 = vst [vmem:[#allocation2 + $0x28] ss:$-4 sps:$4 sm:$0xff] %v1454_v43   ;;  %v1241_v53 = vadd.f32 %v7769_v44, %v1080_v48  ;;  %v1907_v57 = vrot.slane %v1856_v52, 4  ;;  %v1908_v58 = vrot.slane %v9938_v49, 4  ;;  %v1352_v60 = vmax.f32 %v1238_v46, 0.0 }
 0x25b   : > { %v1096_v52 = vadd.f32 %v9875_v11, %v9924_v37  ;;  %v9023_v11 = vld [vmem:[#allocation9 + $0x28] sm:$0xff]  }
 0x25c   : > { %v1353_v61 = vmax.f32 %v1241_v53, 0.0  ;;  %v7770_v50 = vpop.f32.mrb[76].mxu1  ;;  %v1909_v3 = vsel %vm1903_vm0, %v1907_v57, %v1908_v58 }
 0x25d   : > { %v7771_v1 = vpop.f32.mrb[77].mxu1  ;;  %8081 = vmatmul.mubr.bf16.vlgmr.msra.gmra.mrb[0].mxu0 %v1909_v3 }
 0x25e   : > { %v1423_v5 = vpack.c.bf16 %v1353_v61, %v1352_v60  ;;  %v7772_v7 = vadd.f32 %v7771_v1, %v7770_v50  ;;  %v7773_v9 = vpop.f32.mrb[78].mxu1  ;;  %8113 = vmatpush3.bf16.msra.mxu0 %v9881_v19  ;;  %v9022_v60 = vld [vmem:[#allocation9 + $0x20] sm:$0xff]  }
 0x25f   : > { %v7774_v29 = vpop.f32.mrb[79].mxu1  ;;  %8114 = vmatprep.subr.bf16.mxu0 %v9019_v63 }
 0x260   : > { %v1455_v12 = vrot.slane %v1423_v5, 4  ;;  %v1246_v13 = vadd.f32 %v7772_v7, %v1085_v55  ;;  %v7775_v18 = vadd.f32 %v7774_v29, %v7773_v9  ;;  %v1101_v29 = vadd.f32 %v9877_v14, %v9924_v37 }
 0x261   : > { %v9947_v22 = vld [vmem:[#allocation2 + $0x28] sm:$0xf]  ;;  %v1857_v23 = vld [vmem:[#allocation2 + $0x20] sm:$0xf0] }
 0x262   : > { %1490 = vst [vmem:[#allocation2 + $0x38] ss:$-4 sps:$4 sm:$0xff] %v1455_v12   ;;  %v1249_v26 = vadd.f32 %v7775_v18, %v1088_v16  ;;  %v1910_v0 = vrot.slane %v1857_v23, 4  ;;  %v1911_v28 = vrot.slane %v9947_v22, 4  ;;  %8115 = vmatpush3.bf16.msra.mxu0 %v9019_v63  ;;  %v1354_v32 = vmax.f32 %v1246_v13, 0.0 }
 0x263   : > { %8116 = vmatprep.subr.bf16.mxu0 %v9020_v34 }
 0x264   : > { %v1355_v33 = vmax.f32 %v1249_v26, 0.0  ;;  %v7776_v19 = vpop.f32.mrb[80].mxu1  ;;  %v1912_v39 = vsel %vm1903_vm0, %v1910_v0, %v1911_v28  ;;  %v9024_v28 = vld [vmem:[#allocation9 + $0x30] sm:$0xff]  }
 0x265   : > { %v7777_v4 = vpop.f32.mrb[81].mxu1  ;;  %8084 = vmatprep.mubr.bf16.mxu0 %v1912_v39 }
 0x266   : > { %v1424_v43 = vpack.c.bf16 %v1355_v33, %v1354_v32  ;;  %v7778_v46 = vadd.f32 %v7777_v4, %v7776_v19  ;;  %v7779_v48 = vpop.f32.mrb[82].mxu1  ;;  %8117 = vmatpush3.bf16.msra.mxu0 %v9020_v34  ;;  %v1104_v34 = vadd.f32 %v9879_v17, %v9924_v37 }
 0x267   : > { %v7780_v44 = vpop.f32.mrb[83].mxu1  ;;  %8118 = vmatprep.subr.bf16.mxu0 %v9021_v40 }
 0x268   : > { %v1456_v53 = vrot.slane %v1424_v43, 4  ;;  %v1254_v57 = vadd.f32 %v7778_v46, %v1093_v41  ;;  %v7781_v58 = vadd.f32 %v7780_v44, %v7779_v48  ;;  %v9025_v43 = vld [vmem:[#allocation9 + $0x38] sm:$0xff]   ;;  %v1518_v46 = vld [vmem:[#allocation2] sm:$0xf8]  ;;  %v1109_v44 = vadd.f32 %v9883_v21, %v9924_v37 }
 0x269   : > { %v9955_v61 = vld [vmem:[#allocation2 + $0x38] sm:$0xf]  ;;  %v1858_v50 = vld [vmem:[#allocation2 + $0x30] sm:$0xf0] }
 0x26a   : > { %1492 = vst [vmem:[#allocation2 + $0x48] ss:$-4 sps:$4 sm:$0xff] %v1456_v53   ;;  %v1257_v63 = vadd.f32 %v7781_v58, %v1096_v52  ;;  %v1913_v1 = vrot.slane %v1858_v50, 4  ;;  %v1914_v8 = vrot.slane %v9955_v61, 4  ;;  %8119 = vmatpush3.bf16.msra.mxu0 %v9021_v40  ;;  %v1356_v3 = vmax.f32 %v1254_v57, 0.0 }
 0x26b   : > { %8120 = vmatprep.subr.bf16.mxu0 %v9022_v60  ;;  %v1555_v50 = vshll.u32 %v1518_v46, 16 }
 0x26c   : > { %v1357_v5 = vmax.f32 %v1257_v63, 0.0  ;;  %v7782_v55 = vpop.f32.mrb[84].mxu1  ;;  %v1915_v7 = vsel %vm1903_vm0, %v1913_v1, %v1914_v8  ;;  %v1560_v63 = vshrl.u32 %v9862_v56, 16  ;;  %v1563_v1 = vshll.u32 %v9862_v56, 16 }
 0x26d   : > { %v7783_v9 = vpop.f32.mrb[85].mxu1  ;;  %8085 = vmatmul.mubr.bf16.gmra.mrb[4].mxu0 %v1915_v7  ;;  %v1112_v8 = vadd.f32 %v9886_v24, %v9924_v37  ;;  %v9976_v7 = vld [vmem:[#allocation9 + $0x80] sm:$0xff]  }
 0x26e   : > { %v1425_v12 = vpack.c.bf16 %v1357_v5, %v1356_v3  ;;  %v7784_v13 = vadd.f32 %v7783_v9, %v7782_v55  ;;  %v7785_v16 = vpop.f32.mrb[86].mxu1  ;;  %8121 = vmatpush3.bf16.msra.mxu0 %v9022_v60  ;;  %v1552_v60 = vshrl.u32 %v1518_v46, 16  ;;  %v1562_v24 = vrot.slane %v1560_v63, 3 }
 0x26f   : > { %v7786_v18 = vpop.f32.mrb[87].mxu1  ;;  %8122 = vmatprep.subr.bf16.mxu0 %v9023_v11  ;;  %v1580_v46 = vshll.u32 %v9938_v49, 16 }
 0x270   : > { %v1457_v23 = vrot.slane %v1425_v12, 4  ;;  %v1262_v26 = vadd.f32 %v7784_v13, %v1101_v29  ;;  %v7787_v0 = vadd.f32 %v7786_v18, %v7785_v16  ;;  %v1554_v56 = vrot.slane %v1552_v60, 3 }
 0x271   : > { %v9963_v32 = vld [vmem:[#allocation2 + $0x48] sm:$0xf]  ;;  %v9965_v33 = vld [vmem:[#allocation2 + $0x40] sm:$0xf0]  ;;  %v1557_v13 = vrot.slane %v1555_v50, 4  ;;  %v1565_v16 = vrot.slane %v1563_v1, 4 }
 0x272   : > { %1494 = vst [vmem:[#allocation2 + $0x58] ss:$-4 sps:$4 sm:$0xff] %v1457_v23   ;;  %v1265_v19 = vadd.f32 %v7787_v0, %v1104_v34  ;;  %v1916_v14 = vrot.slane %v9965_v33, 4  ;;  %v1917_v39 = vrot.slane %v9963_v32, 4  ;;  %8123 = vmatpush3.bf16.msra.mxu0 %v9023_v11  ;;  %v1358_v40 = vmax.f32 %v1262_v26, 0.0 }
 0x273   : > { %8124 = vmatprep.subr.bf16.mxu0 %v9024_v28  ;;  %v1117_v0 = vadd.f32 %v9888_v27, %v9924_v37  ;;  %v1577_v27 = vshrl.u32 %v9938_v49, 16 }
 0x274   : > { %v1359_v4 = vmax.f32 %v1265_v19, 0.0  ;;  %v7788_v41 = vpop.f32.mrb[88].mxu1  ;;  %v1918_v17 = vsel %vm1903_vm0, %v1916_v14, %v1917_v39  ;;  %v1520_v14 = vld [vmem:[#allocation2 + $0x10] sm:$0xf8]  ;;  %v1125_v39 = vadd.f32 %v9892_v35, %v9924_v37  ;;  %v10000_v35 = vadd.f32 %v9896_v42, %v9924_v37 }
 0x275   : > { %v7789_v48 = vpop.f32.mrb[89].mxu1  ;;  %8088 = vmatprep.mubr.bf16.mxu0 %v1918_v17  ;;  %v1572_v49 = vshll.u32 %v1520_v14, 16  ;;  %v10014_v42 = vadd.f32 %v9900_v51, %v9924_v37 }
 0x276   : > { %v1426_v52 = vpack.c.bf16 %v1359_v4, %v1358_v40  ;;  %v7790_v53 = vadd.f32 %v7789_v48, %v7788_v41  ;;  %v7791_v57 = vpop.f32.mrb[90].mxu1  ;;  %8125 = vmatpush3.bf16.msra.mxu0 %v9024_v28  ;;  %v1120_v28 = vadd.f32 %v9890_v31, %v9924_v37  ;;  %v9994_v40 = vadd.f32 %v9894_v38, %v9924_v37 }
 0x277   : > { %v7792_v58 = vpop.f32.mrb[91].mxu1  ;;  %8126 = vmatprep.subr.bf16.mxu0 %v9025_v43  ;;  %v1558_v48 = vor.u32 %v1557_v13, %v1554_v56  ;;  %v10004_v38 = vadd.f32 %v9898_v47, %v9924_v37 }
 0x278   : > { %v1458_v3 = vrot.slane %v1426_v52, 4  ;;  %v1270_v5 = vadd.f32 %v7790_v53, %v1109_v44  ;;  %v7793_v55 = vadd.f32 %v7792_v58, %v7791_v57  ;;  %v1566_v44 = vor.u32 %v1565_v16, %v1562_v24  ;;  %v1524_v16 = vld [vmem:[#allocation2 + $0x30] sm:$0xf8] }
 0x279   : > { %v9978_v21 = vld [vmem:[#allocation2 + $0x58] sm:$0xf]  ;;  %v9980_v11 = vld [vmem:[#allocation2 + $0x50] sm:$0xf0]  ;;  %v1569_v58 = vshrl.u32 %v1520_v14, 16 }
 0x27a   : > { %1496 = vst [vmem:[#allocation2 + $0x68] ss:$-4 sps:$4 sm:$0xff] %v1458_v3   ;;  %v1273_v9 = vadd.f32 %v7793_v55, %v1112_v8  ;;  %v1919_v29 = vrot.slane %v9980_v11, 4  ;;  %v1920_v12 = vrot.slane %v9978_v21, 4  ;;  %8127 = vmatpush3.bf16.msra.mxu0 %v9025_v43  ;;  %v1360_v18 = vmax.f32 %v1270_v5, 0.0 }
 0x27b   : > { %8160 = vmatprep.subr.bf16.mxu0 %v9976_v7  ;;  %v1522_v43 = vld [vmem:[#allocation2 + $0x20] sm:$0xf8]  ;;  %v1567_v47 = vsel %vm1550_vm1, %v1558_v48, %v1566_v44  ;;  %v1594_v55 = vshrl.u32 %v9947_v22, 16  ;;  %v1606_v48 = vshll.u32 %v1524_v16, 16 }
 0x27c   : > { %v1361_v34 = vmax.f32 %v1273_v9, 0.0  ;;  %v7794_v23 = vpop.f32.mrb[92].mxu1  ;;  %v1921_v26 = vsel %vm1903_vm0, %v1919_v29, %v1920_v12  ;;  %v1586_v63 = vshrl.u32 %v1522_v43, 16  ;;  %v1589_v5 = vshll.u32 %v1522_v43, 16  ;;  %v1526_v44 = vld [vmem:[#allocation2 + $0x40] sm:$0xf8] }
 0x27d   : > { %v7795_v19 = vpop.f32.mrb[93].mxu1  ;;  %8089 = vmatmul.mubr.bf16.gmra.mrb[8].mxu0 %v1921_v26  ;;  %v1597_v9 = vshll.u32 %v9947_v22, 16  ;;  %v10021_v29 = vadd.f32 %v9902_v54, %v9924_v37  ;;  %v1574_v26 = vrot.slane %v1572_v49, 4  ;;  %v10026_v54 = vadd.f32 %v9904_v59, %v9924_v37 }
 0x27e   : > { %v1427_v4 = vpack.c.bf16 %v1361_v34, %v1360_v18  ;;  %v7796_v41 = vadd.f32 %v7795_v19, %v7794_v23  ;;  %v7797_v17 = vpop.f32.mrb[94].mxu1  ;;  %v1579_v18 = vrot.slane %v1577_v27, 3  ;;  %v1582_v34 = vrot.slane %v1580_v46, 4 }
 0x27f   : > { %v7798_v31 = vpop.f32.mrb[95].mxu1  ;;  %v1571_v23 = vrot.slane %v1569_v58, 3  ;;  %v1588_v22 = vrot.slane %v1586_v63, 3  ;;  %v1591_v14 = vrot.slane %v1589_v5, 4  ;;  %v1603_v43 = vshrl.u32 %v1524_v16, 16 }
 0x280   : > { %v1459_v52 = vrot.slane %v1427_v4, 4  ;;  %v1278_v53 = vadd.f32 %v7796_v41, %v1117_v0  ;;  %v7799_v57 = vadd.f32 %v7798_v31, %v7797_v17  ;;  %v1596_v41 = vrot.slane %v1594_v55, 3 }
 0x281   : > { %v10006_v60 = vld [vmem:[#allocation2 + $0x68] sm:$0xf]  ;;  %v10008_v50 = vld [vmem:[#allocation2 + $0x60] sm:$0xf0]  ;;  %v1599_v17 = vrot.slane %v1597_v9, 4  ;;  %v1583_v58 = vor.u32 %v1582_v34, %v1579_v18  ;;  %v1611_v49 = vshrl.u32 %v9955_v61, 16 }
 0x282   : > { %1498 = vst [vmem:[#allocation2 + $0x78] ss:$-4 sps:$4 sm:$0xff] %v1459_v52   ;;  %v1281_v1 = vadd.f32 %v7799_v57, %v1120_v28  ;;  %v1922_v8 = vrot.slane %v10008_v50, 4  ;;  %v1923_v3 = vrot.slane %v10006_v60, 4  ;;  %v1362_v12 = vmax.f32 %v1278_v53, 0.0 }
 0x283   : > { %v1575_v57 = vor.u32 %v1574_v26, %v1571_v23  ;;  %v1614_v59 = vshll.u32 %v9955_v61, 16  ;;  %v1620_v5 = vshrl.u32 %v1526_v44, 16  ;;  %v1623_v55 = vshll.u32 %v1526_v44, 16 }
 0x284   : > { %v1363_v56 = vmax.f32 %v1281_v1, 0.0  ;;  %v7800_v13 = vpop.f32.mrb[96].mxu1  ;;  %v1924_v24 = vsel %vm1903_vm0, %v1922_v8, %v1923_v3  ;;  %v1592_v8 = vor.u32 %v1591_v14, %v1588_v22  ;;  %v1600_v3 = vor.u32 %v1599_v17, %v1596_v41  ;;  %v1528_v22 = vld [vmem:[#allocation2 + $0x50] sm:$0xf8] }
 0x285   : > { %v7801_v51 = vpop.f32.mrb[97].mxu1  ;;  %8092 = vmatprep.mubr.bf16.mxu0 %v1924_v24  ;;  %v1628_v9 = vshrl.u32 %v9963_v32, 16  ;;  %v1631_v61 = vshll.u32 %v9963_v32, 16  ;;  %v1608_v18 = vrot.slane %v1606_v48, 4  ;;  %v1613_v34 = vrot.slane %v1611_v49, 3 }
 0x286   : > { %v1428_v0 = vpack.c.bf16 %v1363_v56, %v1362_v12  ;;  %v7802_v28 = vadd.f32 %v7801_v51, %v7800_v13  ;;  %v7803_v19 = vpop.f32.mrb[98].mxu1  ;;  %v1616_v51 = vrot.slane %v1614_v59, 4  ;;  %v10042_v23 = vadd.f32 %v9906_v62, %v9924_v37  ;;  %v1530_v62 = vld [vmem:[#allocation2 + $0x60] sm:$0xf8] }
 0x287   : > { %v7804_v4 = vpop.f32.mrb[99].mxu1  ;;  %v1601_v32 = vsel %vm1550_vm1, %v1592_v8, %v1600_v3  ;;  %v1625_v41 = vrot.slane %v1623_v55, 4  ;;  %v1630_v17 = vrot.slane %v1628_v9, 3  ;;  %v1648_v8 = vshll.u32 %v9978_v21, 16 }
 0x288   : > { %v1460_v31 = vrot.slane %v1428_v0, 4  ;;  %v1286_v27 = vadd.f32 %v7802_v28, %v1125_v39  ;;  %v7805_v46 = vadd.f32 %v7804_v4, %v7803_v19  ;;  %v1584_v19 = vsel %vm1550_vm1, %v1575_v57, %v1583_v58 }
 0x289   : > { %v10028_v52 = vld [vmem:[#allocation2 + $0x78] sm:$0xf]  ;;  %v10030_v53 = vld [vmem:[#allocation2 + $0x70] sm:$0xf0]  ;;  %v1622_v4 = vrot.slane %v1620_v5, 3  ;;  %v1617_v49 = vor.u32 %v1616_v51, %v1613_v34  ;;  %v1637_v57 = vshrl.u32 %v1528_v22, 16 }
 0x28a   : > { %1500 = vst [vmem:[#allocation2 + $0x88] ss:$-4 sps:$4 sm:$0xff] %v1460_v31   ;;  %v1289_v63 = vadd.f32 %v7805_v46, %v9994_v40  ;;  %v1925_v1 = vrot.slane %v10030_v53, 4  ;;  %v1926_v39 = vrot.slane %v10028_v52, 4  ;;  %v1364_v12 = vmax.f32 %v1286_v27, 0.0 }
 0x28b   : > { %v1605_v40 = vrot.slane %v1603_v43, 3  ;;  %v1633_v46 = vrot.slane %v1631_v61, 4  ;;  %v1640_v58 = vshll.u32 %v1528_v22, 16  ;;  %v1654_v3 = vshrl.u32 %v1530_v62, 16 }
 0x28c   : > { %v1365_v56 = vmax.f32 %v1289_v63, 0.0  ;;  %v7806_v13 = vpop.f32.mrb[100].mxu1  ;;  %v1927_v24 = vsel %vm1903_vm0, %v1925_v1, %v1926_v39  ;;  %v9027_v39 = vld [vmem:[#allocation9 + $0x88] sm:$0xff]   ;;  %v1657_v5 = vshll.u32 %v1530_v62, 16  ;;  %v1662_v55 = vshrl.u32 %v10006_v60, 16 }
 0x28d   : > { %v7807_v16 = vpop.f32.mrb[101].mxu1  ;;  %8093 = vmatmul.mubr.bf16.gmra.mrb[12].mxu0 %v1927_v24  ;;  %v1626_v61 = vor.u32 %v1625_v41, %v1622_v4  ;;  %v10069_v22 = vrot.slane %v1654_v3, 3  ;;  %v9028_v41 = vld [vmem:[#allocation9 + $0x90] sm:$0xff]  }
 0x28e   : > { %v1429_v26 = vpack.c.bf16 %v1365_v56, %v1364_v12  ;;  %v7808_v0 = vadd.f32 %v7807_v16, %v7806_v13  ;;  %v7809_v28 = vpop.f32.mrb[102].mxu1  ;;  %8128 = vmatprep.mubr.bf16.mxu0 %v1567_v47  ;;  %v1609_v47 = vor.u32 %v1608_v18, %v1605_v40  ;;  %v1634_v16 = vor.u32 %v1633_v46, %v1630_v17 }
 0x28f   : > { %v7810_v14 = vpop.f32.mrb[103].mxu1  ;;  %v10059_v40 = vrot.slane %v1637_v57, 3  ;;  %v10061_v18 = vrot.slane %v1640_v58, 4  ;;  %v10073_v4 = vrot.slane %v1662_v55, 3 }
 0x290   : > { %v1461_v43 = vrot.slane %v1429_v26, 4  ;;  %v1294_v31 = vadd.f32 %v7808_v0, %v10000_v35  ;;  %v7811_v27 = vadd.f32 %v7810_v14, %v7809_v28  ;;  %v1645_v35 = vshrl.u32 %v9978_v21, 16 }
 0x291   : > { %v10047_v48 = vld [vmem:[#allocation2 + $0x88] sm:$0xf]  ;;  %v10049_v44 = vld [vmem:[#allocation2 + $0x80] sm:$0xf0]  ;;  %v1618_v26 = vsel %vm1550_vm1, %v1609_v47, %v1617_v49  ;;  %v10071_v14 = vrot.slane %v1657_v5, 4  ;;  %v1635_v62 = vsel %vm1550_vm1, %v1626_v61, %v1634_v16  ;;  %v1643_v47 = vor.u32 %v10061_v18, %v10059_v40  ;;  %v9029_v5 = vld [vmem:[#allocation9 + $0x98] sm:$0xff]  }
 0x292   : > { %1502 = vst [vmem:[#allocation2 + $0x98] ss:$-4 sps:$4 sm:$0xff] %v1461_v43   ;;  %v1297_v59 = vadd.f32 %v7811_v27, %v10004_v38  ;;  %v1928_v63 = vrot.slane %v10049_v44, 4  ;;  %v1929_v1 = vrot.slane %v10047_v48, 4  ;;  %v1366_v9 = vmax.f32 %v1294_v31, 0.0 }
 0x293   : > { %v1665_v38 = vshll.u32 %v10006_v60, 16  ;;  %v10065_v0 = vrot.slane %v1645_v35, 3  ;;  %v1532_v60 = vld [vmem:[#allocation2 + $0x70] sm:$0xf8]  ;;  %v1534_v31 = vld [vmem:[#allocation2 + $0x80] sm:$0xf8] }
 0x294   : > { %v1367_v12 = vmax.f32 %v1297_v59, 0.0  ;;  %v7812_v56 = vpop.f32.mrb[104].mxu1  ;;  %v1930_v13 = vsel %vm1903_vm0, %v1928_v63, %v1929_v1  ;;  %v1671_v49 = vshrl.u32 %v1532_v60, 16  ;;  %v1674_v57 = vshll.u32 %v1532_v60, 16 }
 0x295   : > { %v7813_v24 = vpop.f32.mrb[105].mxu1  ;;  %8096 = vmatprep.mubr.bf16.mxu1 %v1930_v13  ;;  %8129 = vmatmul.mubr.bf16.vlgmr.msra.gmra.mrb[0].mxu0 %v1584_v19  ;;  %v10067_v19 = vrot.slane %v1648_v8, 4  ;;  %v10076_v43 = vrot.slane %v1665_v38, 4  ;;  %v1679_v63 = vshrl.u32 %v10028_v52, 16  ;;  %v1682_v1 = vshll.u32 %v10028_v52, 16 }
 0x296   : > { %v1430_v21 = vpack.c.bf16 %v1367_v12, %v1366_v9  ;;  %v7814_v34 = vadd.f32 %v7813_v24, %v7812_v56  ;;  %v7815_v51 = vpop.f32.mrb[106].mxu1  ;;  %8132 = vmatprep.mubr.bf16.mxu0 %v1601_v32  ;;  %8161 = vmatpush3.bf16.msra.mxu0 %v9976_v7  ;;  %v1688_v35 = vshrl.u32 %v1534_v31, 16  ;;  %v1691_v8 = vshll.u32 %v1534_v31, 16 }
 0x297   : > { %v7816_v28 = vpop.f32.mrb[107].mxu1  ;;  %8162 = vmatprep.subr.bf16.mxu0 %v9027_v39  ;;  %v1696_v3 = vshrl.u32 %v10047_v48, 16  ;;  %v1699_v56 = vshll.u32 %v10047_v48, 16  ;;  %v1660_v52 = vor.u32 %v10071_v14, %v10069_v22  ;;  %v1668_v38 = vor.u32 %v10076_v43, %v10073_v4 }
 0x298   : > { %v1462_v17 = vrot.slane %v1430_v21, 4  ;;  %v1302_v32 = vadd.f32 %v7814_v34, %v10014_v42  ;;  %v7817_v7 = vadd.f32 %v7816_v28, %v7815_v51  ;;  %v10099_v24 = vrot.slane %v1671_v49, 3  ;;  %v9030_v28 = vld [vmem:[#allocation9 + $0xa0] sm:$0xff]  }
 0x299   : > { %v10078_v27 = vld [vmem:[#allocation2 + $0x98] sm:$0xf]  ;;  %v10080_v46 = vld [vmem:[#allocation2 + $0x90] sm:$0xf0]  ;;  %v10101_v48 = vrot.slane %v1674_v57, 4  ;;  %v10103_v18 = vrot.slane %v1679_v63, 3  ;;  %v1160_v57 = vadd.f32 %v9910_v6, %v9924_v37 }
 0x29a   : > { %1504 = vst [vmem:[#allocation2 + $0xa8] ss:$-4 sps:$4 sm:$0xff] %v1462_v17   ;;  %v1305_v58 = vadd.f32 %v7817_v7, %v10021_v29  ;;  %v1931_v42 = vrot.slane %v10080_v46, 4  ;;  %v1932_v59 = vrot.slane %v10078_v27, 4  ;;  %8163 = vmatpush3.bf16.msra.mxu0 %v9027_v39  ;;  %v1368_v55 = vmax.f32 %v1302_v32, 0.0 }
 0x29b   : > { %8164 = vmatprep.subr.bf16.mxu0 %v9028_v41  ;;  %v1651_v39 = vor.u32 %v10067_v19, %v10065_v0  ;;  %v1536_v21 = vld [vmem:[#allocation2 + $0x90] sm:$0xf8]  ;;  %v10105_v51 = vrot.slane %v1682_v1, 4  ;;  %v10109_v0 = vrot.slane %v1691_v8, 4  ;;  %v10111_v60 = vrot.slane %v1696_v3, 3 }
 0x29c   : > { %v1369_v9 = vmax.f32 %v1305_v58, 0.0  ;;  %v7818_v12 = vpop.f32.mrb[108].mxu1  ;;  %v1933_v29 = vsel %vm1903_vm0, %v1931_v42, %v1932_v59  ;;  %v1701_v4 = vrot.slane %v1699_v56, 4  ;;  %v1705_v7 = vshrl.u32 %v1536_v21, 16  ;;  %v9031_v59 = vld [vmem:[#allocation9 + $0xa8] sm:$0xff]  }
 0x29d   : > { %v7819_v13 = vpop.f32.mrb[109].mxu1  ;;  %8097 = vmatmul.mubr.bf16.vlgmr.msra.gmra.mrb[128].mxu1 %v1933_v29  ;;  %8133 = vmatmul.mubr.bf16.gmra.mrb[4].mxu0 %v1618_v26  ;;  %v10107_v26 = vrot.slane %v1688_v35, 3  ;;  %v1708_v43 = vshll.u32 %v1536_v21, 16  ;;  %v1669_v58 = vsel %vm1550_vm1, %v1660_v52, %v1668_v38  ;;  %v1716_v42 = vshll.u32 %v10078_v27, 16 }
 0x29e   : > { %v1431_v61 = vpack.c.bf16 %v1369_v9, %v1368_v55  ;;  %v7820_v16 = vadd.f32 %v7819_v13, %v7818_v12  ;;  %v7821_v40 = vpop.f32.mrb[110].mxu1  ;;  %8136 = vmatprep.mubr.bf16.mxu0 %v1635_v62  ;;  %8165 = vmatpush3.bf16.msra.mxu0 %v9028_v41  ;;  %v1157_v41 = vadd.f32 %v9908_v2, %v9924_v37  ;;  %v10137_v55 = vrot.slane %v1705_v7, 3 }
 0x29f   : > { %v7822_v34 = vpop.f32.mrb[111].mxu1  ;;  %8166 = vmatprep.subr.bf16.mxu0 %v9029_v5  ;;  %v1652_v2 = vsel %vm1550_vm1, %v1643_v47, %v1651_v39  ;;  %v1677_v8 = vor.u32 %v10101_v48, %v10099_v24  ;;  %v1685_v6 = vor.u32 %v10105_v51, %v10103_v18  ;;  %v1702_v47 = vor.u32 %v1701_v4, %v10111_v60 }
 0x2a0   : > { %v1463_v19 = vrot.slane %v1431_v61, 4  ;;  %v1310_v22 = vadd.f32 %v7820_v16, %v10026_v54  ;;  %v7823_v14 = vadd.f32 %v7822_v34, %v7821_v40  ;;  %v1713_v54 = vshrl.u32 %v10078_v27, 16  ;;  %v9032_v16 = vld [vmem:[#allocation9 + $0xb0] sm:$0xff]  }
 0x2a1   : > { %v10116_v17 = vld [vmem:[#allocation2 + $0xa8] sm:$0xf]  ;;  %v10118_v32 = vld [vmem:[#allocation2 + $0xa0] sm:$0xf0]  ;;  %v1694_v27 = vor.u32 %v10109_v0, %v10107_v26  ;;  %v1710_v56 = vrot.slane %v1708_v43, 4  ;;  %v1718_v52 = vrot.slane %v1716_v42, 4 }
 0x2a2   : > { %1506 = vst [vmem:[#allocation2 + $0xb8] ss:$-4 sps:$4 sm:$0xff] %v1463_v19   ;;  %v1313_v31 = vadd.f32 %v7823_v14, %v10042_v23  ;;  %v1934_v62 = vrot.slane %v10118_v32, 4  ;;  %v1935_v49 = vrot.slane %v10116_v17, 4  ;;  %8167 = vmatpush3.bf16.msra.mxu0 %v9029_v5  ;;  %v1370_v63 = vmax.f32 %v1310_v22, 0.0 }
 0x2a3   : > { %8168 = vmatprep.subr.bf16.mxu0 %v9030_v28  ;;  %v1538_v3 = vld [vmem:[#allocation2 + $0xa0] sm:$0xf8]  ;;  %v1715_v13 = vrot.slane %v1713_v54, 3  ;;  %v1730_v61 = vshrl.u32 %v10116_v17, 16  ;;  %v1733_v21 = vshll.u32 %v10116_v17, 16  ;;  %v1686_v19 = vsel %vm1550_vm1, %v1677_v8, %v1685_v6  ;;  %v9033_v17 = vld [vmem:[#allocation9 + $0xb8] sm:$0xff]  }
 0x2a4   : > { %v1371_v23 = vmax.f32 %v1313_v31, 0.0  ;;  %v7824_v1 = vpop.f32.mrb[112].mxu1  ;;  %v1936_v35 = vsel %vm1903_vm0, %v1934_v62, %v1935_v49  ;;  %v1722_v38 = vshrl.u32 %v1538_v3, 16  ;;  %v1725_v24 = vshll.u32 %v1538_v3, 16 }
 0x2a5   : > { %v7825_v5 = vpop.f32.mrb[113].mxu1  ;;  %8100 = vmatprep.mubr.bf16.mxu1 %v1936_v35  ;;  %8137 = vmatmul.mubr.bf16.gmra.mrb[8].mxu0 %v1652_v2  ;;  %v1703_v22 = vsel %vm1550_vm1, %v1694_v27, %v1702_v47  ;;  %v1711_v14 = vor.u32 %v1710_v56, %v10137_v55  ;;  %v1719_v4 = vor.u32 %v1718_v52, %v1715_v13  ;;  %v1735_v42 = vrot.slane %v1733_v21, 4  ;;  %v10154_v27 = vld [vmem:[#allocation9 + $0xc0] sm:$0xff]  }
 0x2a6   : > { %v1432_v9 = vpack.c.bf16 %v1371_v23, %v1370_v63  ;;  %v7826_v12 = vadd.f32 %v7825_v5, %v7824_v1  ;;  %v7827_v29 = vpop.f32.mrb[114].mxu1  ;;  %8140 = vmatprep.mubr.bf16.mxu0 %v1669_v58  ;;  %8169 = vmatpush3.bf16.msra.mxu0 %v9030_v28  ;;  %v1727_v2 = vrot.slane %v1725_v24, 4  ;;  %v1732_v58 = vrot.slane %v1730_v61, 3 }
 0x2a7   : > { %v7828_v39 = vpop.f32.mrb[115].mxu1  ;;  %8170 = vmatprep.subr.bf16.mxu0 %v9031_v59  ;;  %v1168_v8 = vadd.f32 %v9914_v15, %v9924_v37  ;;  %v1720_v56 = vsel %vm1550_vm1, %v1711_v14, %v1719_v4 }
 0x2a8   : > { %v1464_v40 = vrot.slane %v1432_v9, 4  ;;  %v1318_v48 = vadd.f32 %v7826_v12, %v1157_v41  ;;  %v7829_v18 = vadd.f32 %v7828_v39, %v7827_v29  ;;  %v1736_v39 = vor.u32 %v1735_v42, %v1732_v58 }
 0x2a9   : > { %v1541_v34 = vld [vmem:[#allocation2 + $0xb8] sm:$0xf]  ;;  %v10141_v51 = vld [vmem:[#allocation2 + $0xb0] sm:$0xf0] }
 0x2aa   : > { %v1540_v26 = vld [vmem:[#allocation2 + $0xb0] sm:$0xf8]  ;;  %1508 = vst [vmem:[#allocation2 + $0xc8] ss:$-4 sps:$4 sm:$0xff] %v1464_v40   ;;  %v1321_v0 = vadd.f32 %v7829_v18, %v1160_v57  ;;  %v1937_v60 = vrot.slane %v10141_v51, 4  ;;  %v1938_v28 = vrot.slane %v1541_v34, 4  ;;  %8171 = vmatpush3.bf16.msra.mxu0 %v9031_v59  ;;  %v1165_v59 = vadd.f32 %v9912_v10, %v9924_v37 }
 0x2ab   : > { %v1739_v41 = vshrl.u32 %v1540_v26, 16  ;;  %8172 = vmatprep.subr.bf16.mxu0 %v9032_v16  ;;  %v1372_v7 = vmax.f32 %v1318_v48, 0.0  ;;  %v1742_v49 = vshll.u32 %v1540_v26, 16  ;;  %v1724_v57 = vrot.slane %v1722_v38, 3 }
 0x2ac   : > { %v1373_v43 = vmax.f32 %v1321_v0, 0.0  ;;  %v7830_v31 = vpop.f32.mrb[116].mxu1  ;;  %v1939_v62 = vsel %vm1903_vm0, %v1937_v60, %v1938_v28  ;;  %v1747_v35 = vshrl.u32 %v1541_v34, 16  ;;  %v1750_v6 = vshll.u32 %v1541_v34, 16 }
 0x2ad   : > { %v7831_v54 = vpop.f32.mrb[117].mxu1  ;;  %8101 = vmatmul.mubr.bf16.gmra.mrb[132].mxu1 %v1939_v62  ;;  %8141 = vmatmul.mubr.bf16.gmra.mrb[12].mxu0 %v1686_v19  ;;  %v10152_v5 = vrot.slane %v1739_v41, 3  ;;  %v1744_v10 = vrot.slane %v1742_v49, 4  ;;  %v1728_v13 = vor.u32 %v1727_v2, %v1724_v57  ;;  %v1173_v41 = vadd.f32 %v9916_v20, %v9924_v37 }
 0x2ae   : > { %v1433_v63 = vpack.c.bf16 %v1373_v43, %v1372_v7  ;;  %v7832_v23 = vadd.f32 %v7831_v54, %v7830_v31  ;;  %v7833_v1 = vpop.f32.mrb[118].mxu1  ;;  %8144 = vmatprep.mubr.bf16.mxu0 %v1703_v22  ;;  %8173 = vmatpush3.bf16.msra.mxu0 %v9032_v16  ;;  %v1749_v61 = vrot.slane %v1747_v35, 3  ;;  %v1752_v16 = vrot.slane %v1750_v6, 4 }
 0x2af   : > { %v7834_v3 = vpop.f32.mrb[119].mxu1  ;;  %8174 = vmatprep.subr.bf16.mxu0 %v9033_v17  ;;  %v1737_v19 = vsel %vm1550_vm1, %v1728_v13, %v1736_v39  ;;  %v1745_v49 = vor.u32 %v1744_v10, %v10152_v5  ;;  %v1176_v57 = vadd.f32 %v9918_v25, %v9924_v37  ;;  %v2403_v39 = vld [vmem:[#allocation2 + $0x8] sm:$0x1f] }
 0x2b0   : > { %v1465_v47 = vrot.slane %v1433_v63, 4  ;;  %v1326_v55 = vadd.f32 %v7832_v23, %v1165_v59  ;;  %v7835_v9 = vadd.f32 %v7834_v3, %v7833_v1  ;;  %v1753_v54 = vor.u32 %v1752_v16, %v1749_v61 }
 0x2b1   : > { %v1543_v12 = vld [vmem:[#allocation2 + $0xc8] sm:$0xf]  ;;  %v10156_v29 = vld [vmem:[#allocation2 + $0xc0] sm:$0xf0]  ;;  %v1181_v59 = vadd.f32 %v9920_v30, %v9924_v37 }
 0x2b2   : > { %v1542_v52 = vld [vmem:[#allocation2 + $0xc0] sm:$0xf8]  ;;  %1510 = vst [vmem:[#allocation2 + $0xd8] ss:$-4 sps:$4 sm:$0xff] %v1465_v47   ;;  %v1329_v15 = vadd.f32 %v7835_v9, %v1168_v8  ;;  %v1940_v38 = vrot.slane %v10156_v29, 4  ;;  %v1941_v24 = vrot.slane %v1543_v12, 4  ;;  %8175 = vmatpush3.bf16.msra.mxu0 %v9033_v17  ;;  %v1184_v8 = vadd.f32 %v9922_v36, %v9924_v37 }
 0x2b3   : > { %v1756_v40 = vshrl.u32 %v1542_v52, 16  ;;  %v1759_v48 = vshll.u32 %v1542_v52, 16  ;;  %v1764_v18 = vshrl.u32 %v1543_v12, 16  ;;  %8208 = vmatprep.subr.bf16.mxu0 %v10154_v27  ;;  %v1374_v21 = vmax.f32 %v1326_v55, 0.0 }
 0x2b4   : > { %v1375_v34 = vmax.f32 %v1329_v15, 0.0  ;;  %v7836_v26 = vpop.f32.mrb[120].mxu1  ;;  %v1942_v0 = vsel %vm1903_vm0, %v1940_v38, %v1941_v24  ;;  %v1767_v60 = vshll.u32 %v1543_v12, 16  ;;  %v1754_v6 = vsel %vm1550_vm1, %v1745_v49, %v1753_v54 }
 0x2b5   : > { %v7837_v28 = vpop.f32.mrb[121].mxu1  ;;  %8104 = vmatprep.mubr.bf16.mxu1 %v1942_v0  ;;  %8145 = vmatmul.mubr.bf16.gmra.mrb[16].mxu0 %v1720_v56  ;;  %v1758_v22 = vrot.slane %v1756_v40, 3  ;;  %v1761_v14 = vrot.slane %v1759_v48, 4  ;;  %v1766_v4 = vrot.slane %v1764_v18, 3  ;;  %v9130_v48 = vld [vmem:[#allocation2] sm:$0xf0] }
 0x2b6   : > { %v1434_v17 = vpack.c.bf16 %v1375_v34, %v1374_v21  ;;  %v7838_v7 = vadd.f32 %v7837_v28, %v7836_v26  ;;  %v7839_v43 = vpop.f32.mrb[122].mxu1  ;;  %8148 = vmatprep.mubr.bf16.mxu0 %v1737_v19  ;;  %v1769_v31 = vrot.slane %v1767_v60, 4  ;;  %v2421_v18 = vshrl.u32 %v9130_v48, 16 }
 0x2b7   : > { %v7840_v62 = vpop.f32.mrb[123].mxu1  ;;  %v1762_v23 = vor.u32 %v1761_v14, %v1758_v22  ;;  %v2424_v26 = vshll.u32 %v9130_v48, 16  ;;  %v2429_v0 = vshrl.u32 %v2403_v39, 16  ;;  %v2432_v60 = vshll.u32 %v2403_v39, 16 }
 0x2b8   : > { %v1466_v2 = vrot.slane %v1434_v17, 4  ;;  %v1334_v58 = vadd.f32 %v7838_v7, %v1173_v41  ;;  %v7841_v42 = vadd.f32 %v7840_v62, %v7839_v43  ;;  %v1770_v1 = vor.u32 %v1769_v31, %v1766_v4 }
 0x2b9   : > { %v1545_v63 = vld [vmem:[#allocation2 + $0xd8] sm:$0xf]  ;;  %v10170_v20 = vld [vmem:[#allocation2 + $0xd0] sm:$0xf0]  ;;  %v10181_v62 = vrot.slane %v2421_v18, 4 }
 0x2ba   : > { %v1544_v35 = vld [vmem:[#allocation2 + $0xd0] sm:$0xf8]  ;;  %1512 = vst [vmem:[#allocation2 + $0xe8] ss:$-4 sps:$4 sm:$0xff] %v1466_v2   ;;  %v1337_v3 = vadd.f32 %v7841_v42, %v1176_v57  ;;  %v1943_v5 = vrot.slane %v10170_v20, 4  ;;  %v1944_v25 = vrot.slane %v1545_v63, 4  ;;  %v1771_v36 = vsel %vm1550_vm1, %v1762_v23, %v1770_v1 }
 0x2bb   : > { %v1773_v47 = vshrl.u32 %v1544_v35, 16  ;;  %v1776_v55 = vshll.u32 %v1544_v35, 16  ;;  %v1781_v9 = vshrl.u32 %v1545_v63, 16  ;;  %v1376_v30 = vmax.f32 %v1334_v58, 0.0 }
 0x2bc   : > { %v1377_v10 = vmax.f32 %v1337_v3, 0.0  ;;  %v7842_v12 = vpop.f32.mrb[124].mxu1  ;;  %v1945_v56 = vsel %vm1903_vm0, %v1943_v5, %v1944_v25  ;;  %v1784_v13 = vshll.u32 %v1545_v63, 16  ;;  %v2404_v3 = vld [vmem:[#allocation2 + $0x18] sm:$0x1f] }
 0x2bd   : > { %v7843_v52 = vpop.f32.mrb[125].mxu1  ;;  %8105 = vmatmul.mubr.bf16.gmra.mrb[136].mxu1 %v1945_v56  ;;  %8149 = vmatmul.mubr.bf16.gmra.mrb[20].mxu0 %v1754_v6  ;;  %v1775_v37 = vrot.slane %v1773_v47, 3  ;;  %v1778_v15 = vrot.slane %v1776_v55, 4  ;;  %v1783_v38 = vrot.slane %v1781_v9, 3  ;;  %v9131_v6 = vld [vmem:[#allocation2 + $0x10] sm:$0xf0] }
 0x2be   : > { %v1435_v24 = vpack.c.bf16 %v1377_v10, %v1376_v30  ;;  %v7844_v61 = vadd.f32 %v7843_v52, %v7842_v12  ;;  %v7845_v16 = vpop.f32.mrb[126].mxu1  ;;  %8152 = vmatprep.mubr.bf16.mxu0 %v1771_v36  ;;  %v1786_v40 = vrot.slane %v1784_v13, 4  ;;  %v2438_v47 = vshrl.u32 %v9131_v6, 16 }
 0x2bf   : > { %v7846_v21 = vpop.f32.mrb[127].mxu1  ;;  %v1779_v34 = vor.u32 %v1778_v15, %v1775_v37  ;;  %v2431_v9 = vrot.slane %v2429_v0, 4  ;;  %v2434_v30 = vrot.slane %v2432_v60, 5  ;;  %v2441_v10 = vshll.u32 %v9131_v6, 16 }
 0x2c0   : > { %v1467_v28 = vrot.slane %v1435_v24, 4  ;;  %v1342_v19 = vadd.f32 %v7844_v61, %v1181_v59  ;;  %v7847_v22 = vadd.f32 %v7846_v21, %v7845_v16  ;;  %v1787_v14 = vor.u32 %v1786_v40, %v1783_v38  ;;  %v2405_v21 = vld [vmem:[#allocation2 + $0x28] sm:$0x1f] }
 0x2c1   : > { %v1547_v4 = vld [vmem:[#allocation2 + $0xe8] sm:$0xf]  ;;  %v10178_v41 = vld [vmem:[#allocation2 + $0xe0] sm:$0xf0]  ;;  %v2446_v13 = vshrl.u32 %v2404_v3, 16  ;;  %v2449_v18 = vshll.u32 %v2404_v3, 16  ;;  %v2435_v60 = vor.u32 %v2434_v30, %v2431_v9 }
 0x2c2   : > { %v1546_v17 = vld [vmem:[#allocation2 + $0xe0] sm:$0xf8]  ;;  %1514 = vst [vmem:[#allocation2 + $0xf8] ss:$-4 sps:$4 sm:$0xff] %v1467_v28   ;;  %v1345_v7 = vadd.f32 %v7847_v22, %v1184_v8  ;;  %v1946_v43 = vrot.slane %v10178_v41, 4  ;;  %v1947_v31 = vrot.slane %v1547_v4, 4  ;;  %v1788_v59 = vsel %vm1550_vm1, %v1779_v34, %v1787_v14 }
 0x2c3   : > { %v1378_v49 = vmax.f32 %v1342_v19, 0.0  ;;  %v1790_v54 = vshrl.u32 %v1546_v17, 16  ;;  %v1793_v57 = vshll.u32 %v1546_v17, 16  ;;  %v1798_v2 = vshrl.u32 %v1547_v4, 16 }
 0x2c4   : > { %v1379_v58 = vmax.f32 %v1345_v7, 0.0  ;;  %v1948_v42 = vsel %vm1903_vm0, %v1946_v43, %v1947_v31  ;;  %v1801_v63 = vshll.u32 %v1547_v4, 16  ;;  %v2426_v8 = vrot.slane %v2424_v26, 5  ;;  %v9132_v4 = vld [vmem:[#allocation2 + $0x20] sm:$0xf0] }
 0x2c5   : > { %8108 = vmatprep.mubr.bf16.mxu1 %v1948_v42  ;;  %8153 = vmatmul.mubr.bf16.gmra.mrb[24].mxu0 %v1788_v59  ;;  %v1792_v23 = vrot.slane %v1790_v54, 3  ;;  %v1795_v1 = vrot.slane %v1793_v57, 4  ;;  %v1800_v35 = vrot.slane %v1798_v2, 3  ;;  %v2440_v34 = vrot.slane %v2438_v47, 4  ;;  %v2406_v42 = vld [vmem:[#allocation2 + $0x38] sm:$0x1f] }
 0x2c6   : > { %v1436_v5 = vpack.c.bf16 %v1379_v58, %v1378_v49  ;;  %v1803_v25 = vrot.slane %v1801_v63, 4  ;;  %v2427_v37 = vor.u32 %v2426_v8, %v10181_v62  ;;  %v2443_v28 = vrot.slane %v2441_v10, 5 }
 0x2c7   : > { %v1796_v55 = vor.u32 %v1795_v1, %v1792_v23  ;;  %v2455_v17 = vshrl.u32 %v9132_v4, 16  ;;  %v2458_v7 = vshll.u32 %v9132_v4, 16  ;;  %v2463_v43 = vshrl.u32 %v2405_v21, 16 }
 0x2c8   : > { %v1468_v12 = vrot.slane %v1436_v5, 4  ;;  %v1804_v56 = vor.u32 %v1803_v25, %v1800_v35  ;;  %v2466_v31 = vshll.u32 %v2405_v21, 16  ;;  %v2448_v54 = vrot.slane %v2446_v13, 4  ;;  %v2407_v35 = vld [vmem:[#allocation2 + $0x48] sm:$0x1f] }
 0x2c9   : > { %v1549_v39 = vld [vmem:[#allocation2 + $0xf8] sm:$0xf]  ;;  %v10185_v52 = vld [vmem:[#allocation2 + $0xf0] sm:$0xf0]  ;;  %v2451_v57 = vrot.slane %v2449_v18, 5  ;;  %v2436_v2 = vsel %vm2419_vm2, %v2427_v37, %v2435_v60  ;;  %v2457_v59 = vrot.slane %v2455_v17, 4  ;;  %v2444_v8 = vor.u32 %v2443_v28, %v2440_v34 }
 0x2ca   : > { %v1548_v36 = vld [vmem:[#allocation2 + $0xf0] sm:$0xf8]  ;;  %1516 = vst [vmem:[#allocation2 + $0x108] ss:$-4 sps:$4 sm:$0xff] %v1468_v12   ;;  %v1805_v15 = vsel %vm1550_vm1, %v1796_v55, %v1804_v56  ;;  %v1949_v38 = vrot.slane %v10185_v52, 4  ;;  %v1950_v24 = vrot.slane %v1549_v39, 4 }
 0x2cb   : > { %v1807_v61 = vshrl.u32 %v1548_v36, 16  ;;  %8156 = vmatprep.mubr.bf16.mxu0 %v1805_v15  ;;  %v1810_v16 = vshll.u32 %v1548_v36, 16  ;;  %v1815_v40 = vshrl.u32 %v1549_v39, 16  ;;  %v1818_v48 = vshll.u32 %v1549_v39, 16  ;;  %v9133_v5 = vld [vmem:[#allocation2 + $0x30] sm:$0xf0] }
 0x2cc   : > { %v1951_v26 = vsel %vm1903_vm0, %v1949_v38, %v1950_v24  ;;  %v2460_v63 = vrot.slane %v2458_v7, 5  ;;  %v2465_v23 = vrot.slane %v2463_v43, 4  ;;  %v2468_v1 = vrot.slane %v2466_v31, 5  ;;  %v9035_v36 = vld [vmem:[#allocation9 + $0xc8] sm:$0xff]   ;;  %v9036_v28 = vld [vmem:[#allocation9 + $0xd0] sm:$0xff]  }
 0x2cd   : > { %v1809_v0 = vrot.slane %v1807_v61, 3  ;;  %8109 = vmatmul.mubr.bf16.gmra.mrb[140].mxu1 %v1951_v26  ;;  %v1812_v19 = vrot.slane %v1810_v16, 4  ;;  %v1817_v22 = vrot.slane %v1815_v40, 3  ;;  %v1820_v14 = vrot.slane %v1818_v48, 4  ;;  %v2408_v61 = vld [vmem:[#allocation2 + $0x58] sm:$0x1f] }
 0x2ce   : > { %6512 = vmatprep.mubr.bf16.mxu1 %v9423_v45  ;;  %v2452_v3 = vor.u32 %v2451_v57, %v2448_v54  ;;  %v2472_v25 = vshrl.u32 %v9133_v5, 16  ;;  %v2475_v6 = vshll.u32 %v9133_v5, 16  ;;  %v2480_v47 = vshrl.u32 %v2406_v42, 16  ;;  %v2409_v60 = vld [vmem:[#allocation2 + $0x68] sm:$0x1f]  ;;  %v9037_v54 = vld [vmem:[#allocation9 + $0xd8] sm:$0xff]  }
 0x2cf   : > { %v1813_v62 = vor.u32 %v1812_v19, %v1809_v0  ;;  %v1821_v49 = vor.u32 %v1820_v14, %v1817_v22  ;;  %v2483_v55 = vshll.u32 %v2406_v42, 16  ;;  %v2489_v9 = vshrl.u32 %v9965_v33, 16 }
 0x2d0   : > { %v2492_v30 = vshll.u32 %v9965_v33, 16  ;;  %v2497_v10 = vshrl.u32 %v2407_v35, 16  ;;  %v2500_v12 = vshll.u32 %v2407_v35, 16  ;;  %v2461_v56 = vor.u32 %v2460_v63, %v2457_v59 }
 0x2d1   : > { %v1822_v58 = vsel %vm1550_vm1, %v1813_v62, %v1821_v49  ;;  %v2469_v13 = vor.u32 %v2468_v1, %v2465_v23  ;;  %v2453_v39 = vsel %vm2419_vm2, %v2444_v8, %v2452_v3  ;;  %v2474_v37 = vrot.slane %v2472_v25, 4 }
 0x2d2   : > { %8157 = vmatmul.mubr.bf16.gmra.mrb[28].mxu0 %v1822_v58  ;;  %v2477_v15 = vrot.slane %v2475_v6, 5  ;;  %v2482_v38 = vrot.slane %v2480_v47, 4  ;;  %v2485_v24 = vrot.slane %v2483_v55, 5  ;;  %v2491_v16 = vrot.slane %v2489_v9, 4  ;;  %v2410_v58 = vld [vmem:[#allocation2 + $0x78] sm:$0x1f] }
 0x2d3   : > { %8176 = vmatprep.mubr.bf16.mxu0 %v2436_v2  ;;  %v2494_v40 = vrot.slane %v2492_v30, 5  ;;  %v2499_v48 = vrot.slane %v2497_v10, 4  ;;  %v2502_v18 = vrot.slane %v2500_v12, 5  ;;  %v2470_v21 = vsel %vm2419_vm2, %v2461_v56, %v2469_v13  ;;  %v9038_v6 = vld [vmem:[#allocation9 + $0xe0] sm:$0xff]  }
 0x2d4   : > { %v2506_v33 = vshrl.u32 %v9980_v11, 16  ;;  %v2509_v34 = vshll.u32 %v9980_v11, 16  ;;  %v2514_v26 = vshrl.u32 %v2408_v61, 16  ;;  %v2517_v0 = vshll.u32 %v2408_v61, 16 }
 0x2d5   : > { %v2478_v19 = vor.u32 %v2477_v15, %v2474_v37  ;;  %v2486_v22 = vor.u32 %v2485_v24, %v2482_v38  ;;  %v2495_v14 = vor.u32 %v2494_v40, %v2491_v16  ;;  %v2503_v4 = vor.u32 %v2502_v18, %v2499_v48  ;;  %v2412_v16 = vld [vmem:[#allocation2 + $0x98] sm:$0x1f]  ;;  %v2413_v40 = vld [vmem:[#allocation2 + $0xa8] sm:$0x1f] }
 0x2d6   : > { %v2523_v17 = vshrl.u32 %v10008_v50, 16  ;;  %v2526_v7 = vshll.u32 %v10008_v50, 16  ;;  %v2531_v43 = vshrl.u32 %v2409_v60, 16  ;;  %v2534_v31 = vshll.u32 %v2409_v60, 16  ;;  %v2411_v50 = vld [vmem:[#allocation2 + $0x88] sm:$0x1f] }
 0x2d7   : > { %v2511_v62 = vrot.slane %v2509_v34, 5  ;;  %v2516_v49 = vrot.slane %v2514_v26, 4  ;;  %v2519_v11 = vrot.slane %v2517_v0, 5  ;;  %v2487_v57 = vsel %vm2419_vm2, %v2478_v19, %v2486_v22  ;;  %v9040_v34 = vld [vmem:[#allocation9 + $0xf0] sm:$0xff]  }
 0x2d8   : > { %v2504_v2 = vsel %vm2419_vm2, %v2495_v14, %v2503_v4  ;;  %v2525_v42 = vrot.slane %v2523_v17, 4  ;;  %v2528_v59 = vrot.slane %v2526_v7, 5  ;;  %v2533_v63 = vrot.slane %v2531_v43, 4 }
 0x2d9   : > { %v2536_v23 = vrot.slane %v2534_v31, 5  ;;  %v2520_v35 = vor.u32 %v2519_v11, %v2516_v49  ;;  %v2540_v8 = vshrl.u32 %v10030_v53, 16  ;;  %v2543_v3 = vshll.u32 %v10030_v53, 16  ;;  %v9039_v53 = vld [vmem:[#allocation9 + $0xe8] sm:$0xff]  }
 0x2da   : > { %8177 = vmatmul.mubr.bf16.vlgmr.msra.gmra.mrb[0].mxu0 %v2453_v39  ;;  %v2548_v5 = vshrl.u32 %v2410_v58, 16  ;;  %v2551_v25 = vshll.u32 %v2410_v58, 16  ;;  %v2557_v47 = vshrl.u32 %v10049_v44, 16  ;;  %v2560_v55 = vshll.u32 %v10049_v44, 16 }
 0x2db   : > { %8180 = vmatprep.mubr.bf16.mxu0 %v2470_v21  ;;  %8209 = vmatpush3.bf16.msra.mxu0 %v10154_v27  ;;  %v2508_v27 = vrot.slane %v2506_v33, 4  ;;  %v2565_v9 = vshrl.u32 %v2411_v50, 16  ;;  %v2568_v30 = vshll.u32 %v2411_v50, 16  ;;  %v2529_v10 = vor.u32 %v2528_v59, %v2525_v42 }
 0x2dc   : > { %8210 = vmatprep.subr.bf16.mxu0 %v9035_v36  ;;  %v2537_v12 = vor.u32 %v2536_v23, %v2533_v63  ;;  %v2542_v13 = vrot.slane %v2540_v8, 4  ;;  %v2545_v39 = vrot.slane %v2543_v3, 5  ;;  %v2553_v37 = vrot.slane %v2551_v25, 5  ;;  %v10219_v23 = vld [vmem:[#allocation9 + $0x100] sm:$0xff]  }
 0x2dd   : > { %v2512_v1 = vor.u32 %v2511_v62, %v2508_v27  ;;  %v2559_v15 = vrot.slane %v2557_v47, 4  ;;  %v2562_v38 = vrot.slane %v2560_v55, 5  ;;  %v2567_v24 = vrot.slane %v2565_v9, 4 }
 0x2de   : > { %v2570_v61 = vrot.slane %v2568_v30, 5  ;;  %v2538_v44 = vsel %vm2419_vm2, %v2529_v10, %v2537_v12  ;;  %v2574_v48 = vshrl.u32 %v10080_v46, 16  ;;  %v2577_v18 = vshll.u32 %v10080_v46, 16  ;;  %v9041_v46 = vld [vmem:[#allocation9 + $0xf8] sm:$0xff]  }
 0x2df   : > { %8211 = vmatpush3.bf16.msra.mxu0 %v9035_v36  ;;  %v2521_v56 = vsel %vm2419_vm2, %v2512_v1, %v2520_v35  ;;  %v2550_v36 = vrot.slane %v2548_v5, 4  ;;  %v2582_v21 = vshrl.u32 %v2412_v16, 16  ;;  %v2585_v33 = vshll.u32 %v2412_v16, 16 }
 0x2e0   : > { %8212 = vmatprep.subr.bf16.mxu0 %v9036_v28  ;;  %v2546_v26 = vor.u32 %v2545_v39, %v2542_v13  ;;  %v2563_v60 = vor.u32 %v2562_v38, %v2559_v15  ;;  %v2591_v19 = vshrl.u32 %v10118_v32, 16  ;;  %v2594_v22 = vshll.u32 %v10118_v32, 16  ;;  %v2415_v32 = vld [vmem:[#allocation2 + $0xc8] sm:$0x1f] }
 0x2e1   : > { %v2554_v0 = vor.u32 %v2553_v37, %v2550_v36  ;;  %v2599_v14 = vshrl.u32 %v2413_v40, 16  ;;  %v2602_v4 = vshll.u32 %v2413_v40, 16  ;;  %v2576_v17 = vrot.slane %v2574_v48, 4  ;;  %v2417_v36 = vld [vmem:[#allocation2 + $0xe8] sm:$0x1f] }
 0x2e2   : > { %8181 = vmatmul.mubr.bf16.gmra.mrb[4].mxu0 %v2487_v57  ;;  %v2579_v7 = vrot.slane %v2577_v18, 5  ;;  %v2584_v43 = vrot.slane %v2582_v21, 4  ;;  %v2587_v31 = vrot.slane %v2585_v33, 5  ;;  %v2593_v49 = vrot.slane %v2591_v19, 4  ;;  %v2418_v19 = vld [vmem:[#allocation2 + $0xf8] sm:$0x1f] }
 0x2e3   : > { %8184 = vmatprep.mubr.bf16.mxu0 %v2504_v2  ;;  %8213 = vmatpush3.bf16.msra.mxu0 %v9036_v28  ;;  %v2571_v28 = vor.u32 %v2570_v61, %v2567_v24  ;;  %v2555_v27 = vsel %vm2419_vm2, %v2546_v26, %v2554_v0  ;;  %v2596_v11 = vrot.slane %v2594_v22, 5  ;;  %v2604_v57 = vrot.slane %v2602_v4, 5  ;;  %v2414_v2 = vld [vmem:[#allocation2 + $0xb8] sm:$0x1f] }
 0x2e4   : > { %8214 = vmatprep.subr.bf16.mxu0 %v9037_v54  ;;  %v2580_v58 = vor.u32 %v2579_v7, %v2576_v17  ;;  %v2588_v42 = vor.u32 %v2587_v31, %v2584_v43  ;;  %v2608_v59 = vshrl.u32 %v10141_v51, 16  ;;  %v2611_v63 = vshll.u32 %v10141_v51, 16  ;;  %v10232_v7 = vld [vmem:[#allocation2 + $0x18] sm:$0xf] }
 0x2e5   : > { %v2572_v62 = vsel %vm2419_vm2, %v2563_v60, %v2571_v28  ;;  %v2616_v50 = vshrl.u32 %v2414_v2, 16  ;;  %v2619_v1 = vshll.u32 %v2414_v2, 16  ;;  %v2625_v35 = vshrl.u32 %v10156_v29, 16  ;;  %v2966_v60 = vld [vmem:[#allocation2 + $0x10] sm:$0xf8] }
 0x2e6   : > { %v2628_v8 = vshll.u32 %v10156_v29, 16  ;;  %v2597_v3 = vor.u32 %v2596_v11, %v2593_v49  ;;  %v2633_v25 = vshrl.u32 %v2415_v32, 16  ;;  %v2589_v47 = vsel %vm2419_vm2, %v2580_v58, %v2588_v42 }
 0x2e7   : > { %8215 = vmatpush3.bf16.msra.mxu0 %v9037_v54  ;;  %v2601_v54 = vrot.slane %v2599_v14, 4  ;;  %v2610_v55 = vrot.slane %v2608_v59, 4  ;;  %v2613_v9 = vrot.slane %v2611_v63, 5  ;;  %v2618_v51 = vrot.slane %v2616_v50, 4 }
 0x2e8   : > { %8216 = vmatprep.subr.bf16.mxu0 %v9038_v6  ;;  %v2621_v30 = vrot.slane %v2619_v1, 5  ;;  %v2627_v10 = vrot.slane %v2625_v35, 4  ;;  %v2630_v12 = vrot.slane %v2628_v8, 5  ;;  %v2635_v29 = vrot.slane %v2633_v25, 4  ;;  %v2968_v1 = vld [vmem:[#allocation2 + $0x20] sm:$0xf8] }
 0x2e9   : > { %v2605_v5 = vor.u32 %v2604_v57, %v2601_v54  ;;  %v2642_v37 = vshrl.u32 %v10170_v20, 16  ;;  %v2614_v24 = vor.u32 %v2613_v9, %v2610_v55  ;;  %v2662_v48 = vshll.u32 %v10178_v41, 16 }
 0x2ea   : > { %8185 = vmatmul.mubr.bf16.gmra.mrb[8].mxu0 %v2521_v56  ;;  %v2416_v56 = vld [vmem:[#allocation2 + $0xd8] sm:$0x1f]  ;;  %v2622_v61 = vor.u32 %v2621_v30, %v2618_v51  ;;  %v2631_v16 = vor.u32 %v2630_v12, %v2627_v10  ;;  %v2667_v18 = vshrl.u32 %v2417_v36, 16  ;;  %v2670_v21 = vshll.u32 %v2417_v36, 16 }
 0x2eb   : > { %8188 = vmatprep.mubr.bf16.mxu0 %v2538_v44  ;;  %8217 = vmatpush3.bf16.msra.mxu0 %v9038_v6  ;;  %v2636_v6 = vshll.u32 %v2415_v32, 16  ;;  %v2606_v13 = vsel %vm2419_vm2, %v2597_v3, %v2605_v5  ;;  %v2650_v15 = vshrl.u32 %v2416_v56, 16  ;;  %v2653_v38 = vshll.u32 %v2416_v56, 16  ;;  %v10239_v5 = vld [vmem:[#allocation2 + $0x28] sm:$0xf] }
 0x2ec   : > { %8218 = vmatprep.subr.bf16.mxu0 %v9039_v53  ;;  %v2659_v44 = vshrl.u32 %v10178_v41, 16  ;;  %v2644_v33 = vrot.slane %v2642_v37, 4  ;;  %v2623_v28 = vsel %vm2419_vm2, %v2614_v24, %v2622_v61  ;;  %v2664_v14 = vrot.slane %v2662_v48, 5 }
 0x2ed   : > { %v2638_v39 = vrot.slane %v2636_v6, 5  ;;  %v2652_v26 = vrot.slane %v2650_v15, 4  ;;  %v2655_v0 = vrot.slane %v2653_v38, 5  ;;  %v2669_v4 = vrot.slane %v2667_v18, 4  ;;  %v2970_v6 = vld [vmem:[#allocation2 + $0x30] sm:$0xf8] }
 0x2ee   : > { %v2672_v17 = vrot.slane %v2670_v21, 5  ;;  %v2676_v41 = vshrl.u32 %v10185_v52, 16  ;;  %v2999_v43 = vshrl.u32 %v2966_v60, 16  ;;  %v2687_v49 = vshll.u32 %v2418_v19, 16 }
 0x2ef   : > { %8219 = vmatpush3.bf16.msra.mxu0 %v9039_v53  ;;  %v2645_v53 = vshll.u32 %v10170_v20, 16  ;;  %v2639_v40 = vor.u32 %v2638_v39, %v2635_v29  ;;  %v2661_v20 = vrot.slane %v2659_v44, 4  ;;  %v3002_v11 = vshll.u32 %v2966_v60, 16  ;;  %v2972_v44 = vld [vmem:[#allocation2 + $0x40] sm:$0xf8] }
 0x2f0   : > { %8220 = vmatprep.subr.bf16.mxu0 %v9040_v34  ;;  %v3007_v54 = vshrl.u32 %v10232_v7, 16  ;;  %v3010_v57 = vshll.u32 %v10232_v7, 16  ;;  %v2673_v32 = vor.u32 %v2672_v17, %v2669_v4  ;;  %v2678_v58 = vrot.slane %v2676_v41, 4 }
 0x2f1   : > { %v2640_v22 = vsel %vm2419_vm2, %v2631_v16, %v2639_v40  ;;  %v2665_v2 = vor.u32 %v2664_v14, %v2661_v20  ;;  %v3001_v50 = vrot.slane %v2999_v43, 3  ;;  %v2689_v35 = vrot.slane %v2687_v49, 5  ;;  %v10250_v40 = vld [vmem:[#allocation2 + $0x48] sm:$0xf] }
 0x2f2   : > { %8189 = vmatmul.mubr.bf16.gmra.mrb[12].mxu0 %v2555_v27  ;;  %v2679_v27 = vshll.u32 %v10185_v52, 16  ;;  %v3004_v8 = vrot.slane %v3002_v11, 4  ;;  %v3009_v3 = vrot.slane %v3007_v54, 3  ;;  %v3012_v52 = vrot.slane %v3010_v57, 4  ;;  %v9043_v49 = vld [vmem:[#allocation9 + $0x108] sm:$0xff]  }
 0x2f3   : > { %8192 = vmatprep.mubr.bf16.mxu0 %v2572_v62  ;;  %8221 = vmatpush3.bf16.msra.mxu0 %v9040_v34  ;;  %v2647_v34 = vrot.slane %v2645_v53, 5  ;;  %v2684_v62 = vshrl.u32 %v2418_v19, 16  ;;  %v2674_v25 = vsel %vm2419_vm2, %v2665_v2, %v2673_v32  ;;  %v3016_v55 = vshrl.u32 %v2968_v1, 16  ;;  %v2976_v11 = vld [vmem:[#allocation2 + $0x60] sm:$0xf8] }
 0x2f4   : > { %8222 = vmatprep.subr.bf16.mxu0 %v9041_v46  ;;  %v2681_v59 = vrot.slane %v2679_v27, 5  ;;  %v3019_v9 = vshll.u32 %v2968_v1, 16  ;;  %v3024_v51 = vshrl.u32 %v10239_v5, 16  ;;  %v3027_v30 = vshll.u32 %v10239_v5, 16  ;;  %v10263_v1 = vld [vmem:[#allocation2 + $0x78] sm:$0xf] }
 0x2f5   : > { %v2648_v31 = vor.u32 %v2647_v34, %v2644_v33  ;;  %v2686_v63 = vrot.slane %v2684_v62, 4  ;;  %v3005_v56 = vor.u32 %v3004_v8, %v3001_v50  ;;  %v3033_v29 = vshrl.u32 %v2970_v6, 16  ;;  %v2974_v34 = vld [vmem:[#allocation2 + $0x50] sm:$0xf8] }
 0x2f6   : > { %v2682_v10 = vor.u32 %v2681_v59, %v2678_v58  ;;  %v3036_v39 = vshll.u32 %v2970_v6, 16  ;;  %v3018_v53 = vrot.slane %v3016_v55, 3  ;;  %v3021_v15 = vrot.slane %v3019_v9, 4  ;;  %v10259_v58 = vld [vmem:[#allocation2 + $0x68] sm:$0xf] }
 0x2f7   : > { %8223 = vmatpush3.bf16.msra.mxu0 %v9041_v46  ;;  %v2656_v46 = vor.u32 %v2655_v0, %v2652_v26  ;;  %v2690_v12 = vor.u32 %v2689_v35, %v2686_v63  ;;  %v3026_v38 = vrot.slane %v3024_v51, 3  ;;  %v3029_v24 = vrot.slane %v3027_v30, 4  ;;  %v10252_v26 = vld [vmem:[#allocation2 + $0x58] sm:$0xf]  ;;  %v2978_v50 = vld [vmem:[#allocation2 + $0x70] sm:$0xf8] }
 0x2f8   : > { %8256 = vmatprep.subr.bf16.mxu0 %v10219_v23  ;;  %v3035_v48 = vrot.slane %v3033_v29, 3  ;;  %v3038_v18 = vrot.slane %v3036_v39, 4  ;;  %v3022_v0 = vor.u32 %v3021_v15, %v3018_v53  ;;  %v3053_v20 = vshll.u32 %v2972_v44, 16  ;;  %v2980_v15 = vld [vmem:[#allocation2 + $0x80] sm:$0xf8] }
 0x2f9   : > { %v2657_v42 = vsel %vm2419_vm2, %v2648_v31, %v2656_v46  ;;  %v2691_v61 = vsel %vm2419_vm2, %v2682_v10, %v2690_v12  ;;  %v3030_v60 = vor.u32 %v3029_v24, %v3026_v38  ;;  %v3058_v19 = vshrl.u32 %v10250_v40, 16  ;;  %v10270_v38 = vld [vmem:[#allocation2 + $0x88] sm:$0xf] }
 0x2fa   : > { %8193 = vmatmul.mubr.bf16.gmra.mrb[16].mxu0 %v2589_v47  ;;  %v10242_v47 = vld [vmem:[#allocation2 + $0x38] sm:$0xf]  ;;  %v3067_v14 = vshrl.u32 %v2974_v34, 16  ;;  %v3070_v4 = vshll.u32 %v2974_v34, 16  ;;  %v3039_v17 = vor.u32 %v3038_v18, %v3035_v48  ;;  %v3075_v43 = vshrl.u32 %v10252_v26, 16 }
 0x2fb   : > { %8196 = vmatprep.mubr.bf16.mxu0 %v2606_v13  ;;  %v3013_v13 = vor.u32 %v3012_v52, %v3009_v3  ;;  %v3041_v36 = vshrl.u32 %v10242_v47, 16  ;;  %v3044_v37 = vshll.u32 %v10242_v47, 16  ;;  %v3078_v31 = vshll.u32 %v10252_v26, 16  ;;  %v2982_v48 = vld [vmem:[#allocation2 + $0x90] sm:$0xf8] }
 0x2fc   : > { %v3031_v46 = vsel %vm1550_vm1, %v3022_v0, %v3030_v60  ;;  %v3055_v62 = vrot.slane %v3053_v20, 4  ;;  %v3060_v54 = vrot.slane %v3058_v19, 3  ;;  %v3069_v2 = vrot.slane %v3067_v14, 3  ;;  %v10273_v18 = vld [vmem:[#allocation2 + $0x98] sm:$0xf]  ;;  %v9046_v60 = vld [vmem:[#allocation9 + $0x120] sm:$0xff]  }
 0x2fd   : > { %v3014_v16 = vsel %vm1550_vm1, %v3005_v56, %v3013_v13  ;;  %v3043_v21 = vrot.slane %v3041_v36, 3  ;;  %v3046_v33 = vrot.slane %v3044_v37, 4  ;;  %v3072_v32 = vrot.slane %v3070_v4, 4  ;;  %v9045_v36 = vld [vmem:[#allocation9 + $0x118] sm:$0xff]  }
 0x2fe   : > { %v3077_v59 = vrot.slane %v3075_v43, 3  ;;  %v3080_v63 = vrot.slane %v3078_v31, 4  ;;  %v3084_v35 = vshrl.u32 %v2976_v11, 16  ;;  %v3087_v8 = vshll.u32 %v2976_v11, 16 }
 0x2ff   : > { %v3047_v41 = vor.u32 %v3046_v33, %v3043_v21  ;;  %v3092_v3 = vshrl.u32 %v10259_v58, 16  ;;  %v3095_v52 = vshll.u32 %v10259_v58, 16  ;;  %v3073_v9 = vor.u32 %v3072_v32, %v3069_v2  ;;  %v10280_v2 = vld [vmem:[#allocation2 + $0xa8] sm:$0xf] }
 0x300   : > { %v3101_v51 = vshrl.u32 %v2978_v50, 16  ;;  %v3081_v30 = vor.u32 %v3080_v63, %v3077_v59  ;;  %v3104_v10 = vshll.u32 %v2978_v50, 16  ;;  %v3109_v12 = vshrl.u32 %v10263_v1, 16  ;;  %v2986_v63 = vld [vmem:[#allocation2 + $0xb0] sm:$0xf8] }
 0x301   : > { %v3086_v56 = vrot.slane %v3084_v35, 3  ;;  %v3089_v13 = vrot.slane %v3087_v8, 4  ;;  %v3094_v29 = vrot.slane %v3092_v3, 3  ;;  %v3097_v39 = vrot.slane %v3095_v52, 4  ;;  %v10283_v50 = vld [vmem:[#allocation2 + $0xb8] sm:$0xf] }
 0x302   : > { %8197 = vmatmul.mubr.bf16.gmra.mrb[20].mxu0 %v2623_v28  ;;  %v3050_v28 = vshrl.u32 %v2972_v44, 16  ;;  %v3103_v53 = vrot.slane %v3101_v51, 3  ;;  %v3082_v24 = vsel %vm1550_vm1, %v3073_v9, %v3081_v30  ;;  %v3118_v34 = vshrl.u32 %v2980_v15, 16 }
 0x303   : > { %8200 = vmatprep.mubr.bf16.mxu0 %v2640_v22  ;;  %v3061_v22 = vshll.u32 %v10250_v40, 16  ;;  %v3090_v21 = vor.u32 %v3089_v13, %v3086_v56  ;;  %v3098_v33 = vor.u32 %v3097_v39, %v3094_v29  ;;  %v3121_v0 = vshll.u32 %v2980_v15, 16  ;;  %v2988_v15 = vld [vmem:[#allocation2 + $0xc0] sm:$0xf8] }
 0x304   : > { %v3052_v27 = vrot.slane %v3050_v28, 3  ;;  %v3126_v28 = vshrl.u32 %v10270_v38, 16  ;;  %v3129_v20 = vshll.u32 %v10270_v38, 16  ;;  %v3135_v19 = vshrl.u32 %v2982_v48, 16 }
 0x305   : > { %v3063_v57 = vrot.slane %v3061_v22, 4  ;;  %v3138_v22 = vshll.u32 %v2982_v48, 16  ;;  %v3099_v43 = vsel %vm1550_vm1, %v3090_v21, %v3098_v33  ;;  %v3120_v31 = vrot.slane %v3118_v34, 3  ;;  %v2990_v21 = vld [vmem:[#allocation2 + $0xd0] sm:$0xf8] }
 0x306   : > { %v3056_v6 = vor.u32 %v3055_v62, %v3052_v27  ;;  %v2984_v27 = vld [vmem:[#allocation2 + $0xa0] sm:$0xf8]  ;;  %v9047_v62 = vld [vmem:[#allocation9 + $0x128] sm:$0xff]   ;;  %v3131_v11 = vrot.slane %v3129_v20, 4  ;;  %v3160_v3 = vshrl.u32 %v10280_v2, 16  ;;  %v3163_v52 = vshll.u32 %v10280_v2, 16 }
 0x307   : > { %v3064_v55 = vor.u32 %v3063_v57, %v3060_v54  ;;  %v3137_v54 = vrot.slane %v3135_v19, 3  ;;  %v3140_v57 = vrot.slane %v3138_v22, 4  ;;  %v3152_v35 = vshrl.u32 %v2984_v27, 16  ;;  %v10293_v33 = vld [vmem:[#allocation2 + $0xd8] sm:$0xf]  ;;  %v10295_v20 = vld [vmem:[#allocation9 + $0x140] sm:$0xff]  }
 0x308   : > { %v3155_v8 = vshll.u32 %v2984_v27, 16  ;;  %v3169_v51 = vshrl.u32 %v2986_v63, 16  ;;  %v3162_v29 = vrot.slane %v3160_v3, 3  ;;  %v3165_v39 = vrot.slane %v3163_v52, 4  ;;  %v10306_v3 = vld [vmem:[#allocation2 + $0xf8] sm:$0xf] }
 0x309   : > { %v3065_v37 = vsel %vm1550_vm1, %v3056_v6, %v3064_v55  ;;  %v3141_v9 = vor.u32 %v3140_v57, %v3137_v54  ;;  %v3154_v56 = vrot.slane %v3152_v35, 3 }
 0x30a   : > { %8201 = vmatmul.mubr.bf16.gmra.mrb[24].mxu0 %v2657_v42  ;;  %v3048_v42 = vsel %vm1550_vm1, %v3039_v17, %v3047_v41  ;;  %v3143_v17 = vshrl.u32 %v10273_v18, 16  ;;  %v3146_v41 = vshll.u32 %v10273_v18, 16  ;;  %v3157_v13 = vrot.slane %v3155_v8, 4  ;;  %v2994_v8 = vld [vmem:[#allocation2 + $0xf0] sm:$0xf8] }
 0x30b   : > { %8204 = vmatprep.mubr.bf16.mxu0 %v2674_v25  ;;  %v9044_v25 = vld [vmem:[#allocation9 + $0x110] sm:$0xff]  }
 0x30c   : > { %v3148_v59 = vrot.slane %v3146_v41, 4  ;;  %v3158_v34 = vor.u32 %v3157_v13, %v3154_v56  ;;  %v3245_v56 = vshrl.u32 %v10306_v3, 16  ;;  %v3248_v13 = vshll.u32 %v10306_v3, 16 }
 0x312   : > { %8205 = vmatmul.mubr.bf16.gmra.mrb[28].mxu0 %v2691_v61  ;;  %v3106_v61 = vrot.slane %v3104_v10, 4  ;;  %v3172_v10 = vshll.u32 %v2986_v63, 16 }
 0x313   : > { %8224 = vmatprep.mubr.bf16.mxu0 %v3014_v16  ;;  %v3111_v16 = vrot.slane %v3109_v12, 3  ;;  %v3177_v12 = vshrl.u32 %v10283_v50, 16 }
 0x314   : > { %v3107_v14 = vor.u32 %v3106_v61, %v3103_v53  ;;  %v3171_v53 = vrot.slane %v3169_v51, 3 }
 0x31a   : > { %8225 = vmatmul.mubr.bf16.vlgmr.msra.gmra.mrb[0].mxu0 %v3031_v46  ;;  %v3123_v46 = vrot.slane %v3121_v0, 4  ;;  %v3166_v0 = vor.u32 %v3165_v39, %v3162_v29 }
 0x31b   : > { %8228 = vmatprep.mubr.bf16.mxu0 %v3048_v42  ;;  %8257 = vmatpush3.bf16.msra.mxu0 %v10219_v23  ;;  %v3112_v23 = vshll.u32 %v10263_v1, 16  ;;  %v3145_v42 = vrot.slane %v3143_v17, 3 }
 0x31c   : > { %8258 = vmatprep.subr.bf16.mxu0 %v9043_v49  ;;  %v3124_v6 = vor.u32 %v3123_v46, %v3120_v31  ;;  %v3214_v31 = vshll.u32 %v10293_v33, 16  ;;  %v3167_v46 = vsel %vm1550_vm1, %v3158_v34, %v3166_v0  ;;  %v10314_v34 = vld [vmem:[#allocation2 + $0x108] sm:$0xf] }
 0x31d   : > { %v3114_v44 = vrot.slane %v3112_v23, 4  ;;  %v3149_v30 = vor.u32 %v3148_v59, %v3145_v42  ;;  %v3180_v23 = vshll.u32 %v10283_v50, 16  ;;  %v10303_v42 = vld [vmem:[#allocation2 + $0xe8] sm:$0xf] }
 0x31e   : > { %v3216_v35 = vrot.slane %v3214_v31, 4 }
 0x31f   : > { %8259 = vmatpush3.bf16.msra.mxu0 %v9043_v49  ;;  %v3115_v4 = vor.u32 %v3114_v44, %v3111_v16  ;;  %v3128_v49 = vrot.slane %v3126_v28, 3  ;;  %v3150_v61 = vsel %vm1550_vm1, %v3141_v9, %v3149_v30  ;;  %v3174_v16 = vrot.slane %v3172_v10, 4 }
 0x320   : > { %8260 = vmatprep.subr.bf16.mxu0 %v9044_v25  ;;  %v3179_v44 = vrot.slane %v3177_v12, 3  ;;  %v3182_v48 = vrot.slane %v3180_v23, 4  ;;  %v3189_v28 = vshll.u32 %v2988_v15, 16  ;;  %v3237_v10 = vshrl.u32 %v2994_v8, 16 }
 0x321   : > { %v3116_v32 = vsel %vm1550_vm1, %v3107_v14, %v3115_v4  ;;  %v3132_v55 = vor.u32 %v3131_v11, %v3128_v49  ;;  %v3203_v14 = vshrl.u32 %v2990_v21, 16  ;;  %v3206_v4 = vshll.u32 %v2990_v21, 16  ;;  %v2992_v49 = vld [vmem:[#allocation2 + $0xe0] sm:$0xf8] }
 0x322   : > { %8229 = vmatmul.mubr.bf16.gmra.mrb[4].mxu0 %v3065_v37  ;;  %v3175_v17 = vor.u32 %v3174_v16, %v3171_v53  ;;  %v3183_v41 = vor.u32 %v3182_v48, %v3179_v44  ;;  %v3220_v52 = vshrl.u32 %v2992_v49, 16  ;;  %v3240_v23 = vshll.u32 %v2994_v8, 16  ;;  %v10328_v8 = vld [vmem:[#allocation2 + $0x30] sm:$0xf0] }
 0x323   : > { %8232 = vmatprep.mubr.bf16.mxu0 %v3082_v24  ;;  %8261 = vmatpush3.bf16.msra.mxu0 %v9044_v25  ;;  %v9048_v25 = vld [vmem:[#allocation9 + $0x130] sm:$0xff]   ;;  %v3133_v37 = vsel %vm1550_vm1, %v3124_v6, %v3132_v55  ;;  %v10290_v24 = vld [vmem:[#allocation2 + $0xc8] sm:$0xf]  ;;  %v3205_v57 = vrot.slane %v3203_v14, 3  ;;  %v3228_v6 = vshrl.u32 %v10303_v42, 16  ;;  %v3231_v55 = vshll.u32 %v10303_v42, 16 }
 0x324   : > { %8262 = vmatprep.subr.bf16.mxu0 %v9045_v36  ;;  %v3194_v19 = vshrl.u32 %v10290_v24, 16  ;;  %v3197_v22 = vshll.u32 %v10290_v24, 16  ;;  %v3184_v59 = vsel %vm1550_vm1, %v3175_v17, %v3183_v41  ;;  %v3222_v29 = vrot.slane %v3220_v52, 3 }
 0x325   : > { %v3242_v44 = vrot.slane %v3240_v23, 4  ;;  %v3247_v48 = vrot.slane %v3245_v56, 3  ;;  %v3250_v21 = vrot.slane %v3248_v13, 4  ;;  %v3265_v14 = vshll.u32 %v10314_v34, 16  ;;  %v9053_v13 = vld [vmem:[#allocation9 + $0x158] sm:$0xff]  }
 0x326   : > { %v3196_v11 = vrot.slane %v3194_v19, 3  ;;  %v3199_v54 = vrot.slane %v3197_v22, 4  ;;  %v3262_v22 = vshrl.u32 %v10314_v34, 16  ;;  %v3602_v23 = vrot.slane %v10250_v40, 4  ;;  %v9054_v40 = vld [vmem:[#allocation9 + $0x160] sm:$0xff]  }
 0x327   : > { %8263 = vmatpush3.bf16.msra.mxu0 %v9045_v36  ;;  %v9049_v36 = vld [vmem:[#allocation9 + $0x138] sm:$0xff]   ;;  %v3251_v17 = vor.u32 %v3250_v21, %v3247_v48  ;;  %v3605_v56 = vrot.slane %v10252_v26, 4  ;;  %v3608_v26 = vrot.slane %v10259_v58, 4  ;;  %v10357_v48 = vld [vmem:[#allocation2 + $0x80] sm:$0xf0]  ;;  %v9056_v58 = vld [vmem:[#allocation9 + $0x170] sm:$0xff]  }
 0x328   : > { %8264 = vmatprep.subr.bf16.mxu0 %v9046_v60  ;;  %v3200_v51 = vor.u32 %v3199_v54, %v3196_v11  ;;  %v10359_v21 = vld [vmem:[#allocation2 + $0x90] sm:$0xf0] }
 0x32a   : > { %8233 = vmatmul.mubr.bf16.gmra.mrb[8].mxu0 %v3099_v43  ;;  %v3211_v43 = vshrl.u32 %v10293_v33, 16 }
 0x32b   : > { %8236 = vmatprep.mubr.bf16.mxu0 %v3116_v32  ;;  %8265 = vmatpush3.bf16.msra.mxu0 %v9046_v60  ;;  %v3186_v60 = vshrl.u32 %v2988_v15, 16  ;;  %v3208_v32 = vrot.slane %v3206_v4, 4  ;;  %v3239_v15 = vrot.slane %v3237_v10, 3  ;;  %v10339_v10 = vld [vmem:[#allocation2 + $0x50] sm:$0xf0] }
 0x32c   : > { %8266 = vmatprep.subr.bf16.mxu0 %v9047_v62  ;;  %v3213_v63 = vrot.slane %v3211_v43, 3 }
 0x32d   : > { %v3188_v27 = vrot.slane %v3186_v60, 3  ;;  %v3209_v30 = vor.u32 %v3208_v32, %v3205_v57  ;;  %v3243_v4 = vor.u32 %v3242_v44, %v3239_v15  ;;  %v3593_v32 = vrot.slane %v10232_v7, 4 }
 0x32e   : > { %v3217_v12 = vor.u32 %v3216_v35, %v3213_v63  ;;  %v10326_v35 = vld [vmem:[#allocation2 + $0x20] sm:$0xf0]  ;;  %v3611_v15 = vrot.slane %v10263_v1, 4  ;;  %v3614_v1 = vrot.slane %v10270_v38, 4 }
 0x32f   : > { %8267 = vmatpush3.bf16.msra.mxu0 %v9047_v62  ;;  %v3191_v62 = vrot.slane %v3189_v28, 4  ;;  %v3595_v52 = vrot.slane %v10326_v35, 4 }
 0x330   : > { %8268 = vmatprep.subr.bf16.mxu0 %v9048_v25  ;;  %v3218_v16 = vsel %vm1550_vm1, %v3209_v30, %v3217_v12  ;;  %v10336_v30 = vld [vmem:[#allocation2 + $0x40] sm:$0xf0]  ;;  %v9052_v12 = vld [vmem:[#allocation9 + $0x150] sm:$0xff]  }
 0x331   : > { %v3192_v9 = vor.u32 %v3191_v62, %v3188_v27  ;;  %v3267_v27 = vrot.slane %v3265_v14, 4  ;;  %v3252_v62 = vsel %vm1550_vm1, %v3243_v4, %v3251_v17 }
 0x332   : > { %8237 = vmatmul.mubr.bf16.gmra.mrb[12].mxu0 %v3133_v37  ;;  %v3233_v37 = vrot.slane %v3231_v55, 4  ;;  %v3599_v55 = vrot.slane %v10242_v47, 4  ;;  %v3604_v47 = vrot.slane %v10339_v10, 4 }
 0x333   : > { %8240 = vmatprep.mubr.bf16.mxu0 %v3150_v61  ;;  %8269 = vmatpush3.bf16.msra.mxu0 %v9048_v25  ;;  %v3223_v25 = vshll.u32 %v2992_v49, 16  ;;  %v3201_v53 = vsel %vm1550_vm1, %v3192_v9, %v3200_v51  ;;  %v2996_v61 = vld [vmem:[#allocation2 + $0x100] sm:$0xf8]  ;;  %v10320_v49 = vld [vmem:[#allocation2 + $0x10] sm:$0xf0]  ;;  %v9051_v9 = vld [vmem:[#allocation9 + $0x148] sm:$0xff]  }
 0x334   : > { %8270 = vmatprep.subr.bf16.mxu0 %v9049_v36  ;;  %v3254_v28 = vshrl.u32 %v2996_v61, 16  ;;  %v3257_v19 = vshll.u32 %v2996_v61, 16  ;;  %v3592_v57 = vrot.slane %v10320_v49, 4  ;;  %v9055_v61 = vld [vmem:[#allocation9 + $0x168] sm:$0xff]  }
 0x335   : > { %v3225_v39 = vrot.slane %v3223_v25, 4  ;;  %v3596_v25 = vrot.slane %v10239_v5, 4  ;;  %v3601_v5 = vrot.slane %v10336_v30, 4 }
 0x336   : > { %v3256_v43 = vrot.slane %v3254_v28, 3  ;;  %v3259_v31 = vrot.slane %v3257_v19, 4  ;;  %v3594_v63 = vsel %vm1903_vm0, %v3592_v57, %v3593_v32  ;;  %v3617_v28 = vrot.slane %v10273_v18, 4  ;;  %v10377_v18 = vld [vmem:[#allocation2 + $0xb0] sm:$0xf0] }
 0x337   : > { %8271 = vmatpush3.bf16.msra.mxu0 %v9049_v36  ;;  %v3230_v36 = vrot.slane %v3228_v6, 3  ;;  %v3226_v0 = vor.u32 %v3225_v39, %v3222_v29  ;;  %v3598_v6 = vrot.slane %v10328_v8, 4  ;;  %v3597_v7 = vsel %vm1903_vm0, %v3595_v52, %v3596_v25  ;;  %v10347_v39 = vld [vmem:[#allocation2 + $0x60] sm:$0xf0] }
 0x338   : > { %8304 = vmatprep.subr.bf16.mxu0 %v10295_v20  ;;  %v3260_v11 = vor.u32 %v3259_v31, %v3256_v43  ;;  %v3603_v29 = vsel %vm1903_vm0, %v3601_v5, %v3602_v23  ;;  %v10373_v43 = vld [vmem:[#allocation2 + $0xa0] sm:$0xf0]  ;;  %v3914_v5 = vld [vmem:[#allocation2 + $0x18] sm:$0x1f]  ;;  %v3632_v23 = vrot.slane %v10303_v42, 4 }
 0x339   : > { %v3234_v60 = vor.u32 %v3233_v37, %v3230_v36  ;;  %v3600_v51 = vsel %vm1903_vm0, %v3598_v6, %v3599_v55  ;;  %v10349_v36 = vld [vmem:[#allocation2 + $0x70] sm:$0xf0]  ;;  %v3607_v37 = vrot.slane %v10347_v39, 4  ;;  %v10379_v31 = vld [vmem:[#allocation9 + $0x180] sm:$0xff]  }
 0x33a   : > { %8241 = vmatmul.mubr.bf16.gmra.mrb[16].mxu0 %v3167_v46  ;;  %v3264_v46 = vrot.slane %v3262_v22, 3  ;;  %v9057_v22 = vld [vmem:[#allocation9 + $0x178] sm:$0xff]   ;;  %v10388_v32 = vld [vmem:[#allocation2 + $0xc0] sm:$0xf0] }
 0x33b   : > { %8244 = vmatprep.mubr.bf16.mxu0 %v3184_v59  ;;  %v3235_v41 = vsel %vm1550_vm1, %v3226_v0, %v3234_v60  ;;  %v3613_v0 = vrot.slane %v10357_v48, 4  ;;  %v3616_v60 = vrot.slane %v10359_v21, 4 }
 0x33c   : > { %v3268_v54 = vor.u32 %v3267_v27, %v3264_v46  ;;  %v3619_v46 = vrot.slane %v10373_v43, 4  ;;  %v3620_v27 = vrot.slane %v10280_v2, 4  ;;  %v3626_v2 = vrot.slane %v10290_v24, 4  ;;  %v10408_v24 = vld [vmem:[#allocation2 + $0xf0] sm:$0xf0] }
 0x33d   : > { %v3615_v4 = vsel %vm1903_vm0, %v3613_v0, %v3614_v1  ;;  %v3948_v0 = vshrl.u32 %v10326_v35, 16  ;;  %v3951_v1 = vshll.u32 %v10326_v35, 16 }
 0x33e   : > { %v3269_v59 = vsel %vm1550_vm1, %v3260_v11, %v3268_v54  ;;  %v3623_v11 = vrot.slane %v10283_v50, 4  ;;  %v3621_v54 = vsel %vm1903_vm0, %v3619_v46, %v3620_v27  ;;  %v3629_v50 = vrot.slane %v10293_v33, 4 }
 0x33f   : > { %v3968_v46 = vshll.u32 %v10328_v8, 16 }
 0x342   : > { %8245 = vmatmul.mubr.bf16.gmra.mrb[20].mxu0 %v3201_v53  ;;  %v3610_v53 = vrot.slane %v10349_v36, 4 }
 0x343   : > { %8248 = vmatprep.mubr.bf16.mxu0 %v3218_v16  ;;  %v3609_v16 = vsel %vm1903_vm0, %v3607_v37, %v3608_v26  ;;  %v10417_v26 = vld [vmem:[#allocation2 + $0x100] sm:$0xf0] }
 0x344   : > { %v3612_v44 = vsel %vm1903_vm0, %v3610_v53, %v3611_v15 }
 0x34a   : > { %8249 = vmatmul.mubr.bf16.gmra.mrb[24].mxu0 %v3235_v41  ;;  %v3618_v41 = vsel %vm1903_vm0, %v3616_v60, %v3617_v28 }
 0x34b   : > { %8252 = vmatprep.mubr.bf16.mxu0 %v3252_v62  ;;  %v3622_v62 = vrot.slane %v10377_v18, 4 }
 0x34d   : > { %v3624_v57 = vsel %vm1903_vm0, %v3622_v62, %v3623_v11 }
 0x352   : > { %8253 = vmatmul.mubr.bf16.gmra.mrb[28].mxu0 %v3269_v59  ;;  %v10390_v59 = vld [vmem:[#allocation2 + $0xd0] sm:$0xf0] }
 0x353   : > { %8272 = vmatprep.mubr.bf16.mxu0 %v3594_v63  ;;  %v3625_v63 = vrot.slane %v10388_v32, 4  ;;  %v3628_v52 = vrot.slane %v10390_v59, 4 }
 0x355   : > { %v3627_v55 = vsel %vm1903_vm0, %v3625_v63, %v3626_v2  ;;  %v3953_v2 = vrot.slane %v3951_v1, 5  ;;  %v9059_v1 = vld [vmem:[#allocation9 + $0x188] sm:$0xff]  }
 0x35a   : > { %8273 = vmatmul.mubr.bf16.vlgmr.msra.gmra.mrb[0].mxu0 %v3597_v7  ;;  %v3630_v7 = vsel %vm1903_vm0, %v3628_v52, %v3629_v50 }
 0x35b   : > { %8276 = vmatprep.mubr.bf16.mxu0 %v3600_v51  ;;  %8305 = vmatpush3.bf16.msra.mxu0 %v10295_v20  ;;  %v3606_v20 = vsel %vm1903_vm0, %v3604_v47, %v3605_v56  ;;  %v10404_v51 = vld [vmem:[#allocation2 + $0xe0] sm:$0xf0]  ;;  %v3931_v47 = vshrl.u32 %v10320_v49, 16  ;;  %v3934_v56 = vshll.u32 %v10320_v49, 16  ;;  %v3916_v49 = vld [vmem:[#allocation2 + $0x38] sm:$0x1f] }
 0x35c   : > { %8306 = vmatprep.subr.bf16.mxu0 %v9051_v9  ;;  %v3631_v33 = vrot.slane %v10404_v51, 4  ;;  %v3973_v27 = vshrl.u32 %v3916_v49, 16  ;;  %v3976_v62 = vshll.u32 %v3916_v49, 16 }
 0x35d   : > { %v3933_v53 = vrot.slane %v3931_v47, 4  ;;  %v3936_v15 = vrot.slane %v3934_v56, 5  ;;  %v3918_v47 = vld [vmem:[#allocation2 + $0x58] sm:$0x1f]  ;;  %v3982_v56 = vshrl.u32 %v10336_v30, 16 }
 0x35e   : > { %v3633_v37 = vsel %vm1903_vm0, %v3631_v33, %v3632_v23  ;;  %v3978_v33 = vrot.slane %v3976_v62, 5 }
 0x35f   : > { %8307 = vmatpush3.bf16.msra.mxu0 %v9051_v9  ;;  %v3937_v60 = vor.u32 %v3936_v15, %v3933_v53  ;;  %v3999_v53 = vshrl.u32 %v10339_v10, 16  ;;  %v4002_v15 = vshll.u32 %v10339_v10, 16  ;;  %v3984_v49 = vrot.slane %v3982_v56, 4  ;;  %v3920_v10 = vld [vmem:[#allocation2 + $0x78] sm:$0x1f] }
 0x360   : > { %8308 = vmatprep.subr.bf16.mxu0 %v9052_v12 }
 0x362   : > { %8277 = vmatmul.mubr.bf16.gmra.mrb[4].mxu0 %v3603_v29  ;;  %v3635_v29 = vrot.slane %v10306_v3, 4  ;;  %v3638_v3 = vrot.slane %v10314_v34, 4  ;;  %v3917_v34 = vld [vmem:[#allocation2 + $0x48] sm:$0x1f] }
 0x363   : > { %8280 = vmatprep.mubr.bf16.mxu0 %v3606_v20  ;;  %8309 = vmatpush3.bf16.msra.mxu0 %v9052_v12  ;;  %v3939_v20 = vshrl.u32 %v3914_v5, 16 }
 0x364   : > { %8310 = vmatprep.subr.bf16.mxu0 %v9053_v13 }
 0x365   : > { %v3941_v42 = vrot.slane %v3939_v20, 4  ;;  %v3993_v20 = vshll.u32 %v3917_v34, 16 }
 0x367   : > { %8311 = vmatpush3.bf16.msra.mxu0 %v9053_v13  ;;  %v3634_v13 = vrot.slane %v10408_v24, 4 }
 0x368   : > { %8312 = vmatprep.subr.bf16.mxu0 %v9054_v40 }
 0x36a   : > { %8281 = vmatmul.mubr.bf16.gmra.mrb[8].mxu0 %v3609_v16 }
 0x36b   : > { %8284 = vmatprep.mubr.bf16.mxu0 %v3612_v44  ;;  %8313 = vmatpush3.bf16.msra.mxu0 %v9054_v40  ;;  %v3942_v40 = vshll.u32 %v3914_v5, 16  ;;  %v3915_v44 = vld [vmem:[#allocation2 + $0x28] sm:$0x1f]  ;;  %v3975_v5 = vrot.slane %v3973_v27, 4 }
 0x36c   : > { %8314 = vmatprep.subr.bf16.mxu0 %v9055_v61  ;;  %v3956_v28 = vshrl.u32 %v3915_v44, 16 }
 0x36d   : > { %v3944_v16 = vrot.slane %v3942_v40, 5 }
 0x36e   : > { %v3958_v35 = vrot.slane %v3956_v28, 4  ;;  %v4004_v28 = vrot.slane %v4002_v15, 5 }
 0x36f   : > { %8315 = vmatpush3.bf16.msra.mxu0 %v9055_v61  ;;  %v3636_v61 = vsel %vm1903_vm0, %v3634_v13, %v3635_v29  ;;  %v3985_v13 = vshll.u32 %v10336_v30, 16  ;;  %v3990_v29 = vshrl.u32 %v3917_v34, 16  ;;  %v4001_v30 = vrot.slane %v3999_v53, 4  ;;  %v9060_v34 = vld [vmem:[#allocation9 + $0x190] sm:$0xff]  }
 0x370   : > { %v10365_v19 = vpop.f32.mrb[128].mxu1  ;;  %8316 = vmatprep.subr.bf16.mxu0 %v9056_v58 }
 0x371   : > { %v10367_v14 = vpop.f32.mrb[129].mxu1 }
 0x372   : > { %8285 = vmatmul.mubr.bf16.gmra.mrb[12].mxu0 %v3615_v4  ;;  %v10370_v17 = vpop.f32.mrb[130].mxu1  ;;  %v3965_v4 = vshrl.u32 %v10328_v8, 16  ;;  %v3970_v8 = vrot.slane %v3968_v46, 5  ;;  %v3919_v46 = vld [vmem:[#allocation2 + $0x68] sm:$0x1f] }
 0x373   : > { %8288 = vmatprep.mubr.bf16.mxu0 %v3618_v41  ;;  %v10375_v38 = vpop.f32.mrb[131].mxu1  ;;  %8317 = vmatpush3.bf16.msra.mxu0 %v9056_v58  ;;  %v3637_v58 = vrot.slane %v10417_v26, 4  ;;  %v3945_v41 = vor.u32 %v3944_v16, %v3941_v42  ;;  %v3979_v42 = vor.u32 %v3978_v33, %v3975_v5  ;;  %v4007_v16 = vshrl.u32 %v3918_v47, 16 }
 0x374   : > { %8318 = vmatprep.subr.bf16.mxu0 %v9057_v22  ;;  %v3967_v50 = vrot.slane %v3965_v4, 4  ;;  %v4041_v5 = vshrl.u32 %v3920_v10, 16  ;;  %v4044_v33 = vshll.u32 %v3920_v10, 16 }
 0x375   : > { %v4009_v4 = vrot.slane %v4007_v16, 4 }
 0x376   : > { %v4046_v16 = vrot.slane %v4044_v33, 5 }
 0x377   : > { %8319 = vmatpush3.bf16.msra.mxu0 %v9057_v22  ;;  %v3959_v22 = vshll.u32 %v3915_v44, 16  ;;  %v4010_v44 = vshll.u32 %v3918_v47, 16 }
 0x378   : > { %8352 = vmatprep.subr.bf16.mxu0 %v10379_v31 }
 0x379   : > { %v3961_v52 = vrot.slane %v3959_v22, 5 }
 0x37a   : > { %8289 = vmatmul.mubr.bf16.gmra.mrb[16].mxu0 %v3621_v54  ;;  %v3639_v54 = vsel %vm1903_vm0, %v3637_v58, %v3638_v3  ;;  %v3987_v58 = vrot.slane %v3985_v13, 5  ;;  %v3992_v3 = vrot.slane %v3990_v29, 4  ;;  %v3921_v13 = vld [vmem:[#allocation2 + $0x88] sm:$0x1f] }
 0x37b   : > { %8292 = vmatprep.mubr.bf16.mxu0 %v3624_v57  ;;  %v3950_v57 = vrot.slane %v3948_v0, 4  ;;  %v3995_v0 = vrot.slane %v3993_v20, 5 }
 0x37c   : > { %v3988_v27 = vor.u32 %v3987_v58, %v3984_v49  ;;  %v3922_v49 = vld [vmem:[#allocation2 + $0x98] sm:$0x1f]  ;;  %v4050_v58 = vshrl.u32 %v10357_v48, 16 }
 0x37d   : > { %v3954_v40 = vor.u32 %v3953_v2, %v3950_v57  ;;  %v3996_v62 = vor.u32 %v3995_v0, %v3992_v3  ;;  %v4019_v57 = vshll.u32 %v10347_v39, 16  ;;  %v4005_v2 = vor.u32 %v4004_v28, %v4001_v30 }
 0x37e   : > { %v4053_v3 = vshll.u32 %v10357_v48, 16  ;;  %v4058_v0 = vshrl.u32 %v3921_v13, 16  ;;  %v4075_v10 = vshrl.u32 %v3922_v49, 16  ;;  %v9063_v48 = vld [vmem:[#allocation9 + $0x1a8] sm:$0xff]  }
 0x37f   : > { %v3997_v47 = vsel %vm2419_vm2, %v3988_v27, %v3996_v62  ;;  %v4021_v20 = vrot.slane %v4019_v57, 5  ;;  %v4078_v27 = vshll.u32 %v3922_v49, 16  ;;  %v4052_v62 = vrot.slane %v4050_v58, 4 }
 0x380   : > { %v10396_v25 = vpop.f32.mrb[132].mxu1  ;;  %v4060_v57 = vrot.slane %v4058_v0, 4 }
 0x381   : > { %v10398_v6 = vpop.f32.mrb[133].mxu1 }
 0x382   : > { %8293 = vmatmul.mubr.bf16.gmra.mrb[20].mxu0 %v3627_v55  ;;  %v10401_v9 = vpop.f32.mrb[134].mxu1 }
 0x383   : > { %8296 = vmatprep.mubr.bf16.mxu0 %v3630_v7  ;;  %v10406_v12 = vpop.f32.mrb[135].mxu1  ;;  %v3946_v7 = vsel %vm2419_vm2, %v3937_v60, %v3945_v41  ;;  %v4012_v41 = vrot.slane %v4010_v44, 5 }
 0x38a   : > { %8297 = vmatmul.mubr.bf16.gmra.mrb[24].mxu0 %v3633_v37  ;;  %v3962_v37 = vor.u32 %v3961_v52, %v3958_v35  ;;  %v4024_v35 = vshrl.u32 %v3919_v46, 16  ;;  %v4027_v52 = vshll.u32 %v3919_v46, 16 }
 0x38b   : > { %8300 = vmatprep.mubr.bf16.mxu0 %v3636_v61  ;;  %v3971_v61 = vor.u32 %v3970_v8, %v3967_v50  ;;  %v4033_v50 = vshrl.u32 %v10349_v36, 16  ;;  %v4036_v8 = vshll.u32 %v10349_v36, 16 }
 0x38c   : > { %v3963_v60 = vsel %vm2419_vm2, %v3954_v40, %v3962_v37  ;;  %v4026_v40 = vrot.slane %v4024_v35, 4  ;;  %v4029_v37 = vrot.slane %v4027_v52, 5 }
 0x38d   : > { %v3980_v22 = vsel %vm2419_vm2, %v3971_v61, %v3979_v42  ;;  %v4035_v53 = vrot.slane %v4033_v50, 4  ;;  %v4038_v61 = vrot.slane %v4036_v8, 5  ;;  %v4043_v42 = vrot.slane %v4041_v5, 4  ;;  %v3923_v8 = vld [vmem:[#allocation2 + $0xa8] sm:$0x1f] }
 0x38e   : > { %v4030_v28 = vor.u32 %v4029_v37, %v4026_v40  ;;  %v3924_v5 = vld [vmem:[#allocation2 + $0xb8] sm:$0x1f]  ;;  %v4092_v40 = vshrl.u32 %v3923_v8, 16  ;;  %v4095_v37 = vshll.u32 %v3923_v8, 16 }
 0x38f   : > { %v4047_v46 = vor.u32 %v4046_v16, %v4043_v42  ;;  %v4109_v42 = vshrl.u32 %v3924_v5, 16  ;;  %v4112_v16 = vshll.u32 %v3924_v5, 16 }
 0x390   : > { %v10426_v11 = vpop.f32.mrb[136].mxu1 }
 0x391   : > { %v10429_v63 = vpop.f32.mrb[137].mxu1 }
 0x392   : > { %8301 = vmatmul.mubr.bf16.gmra.mrb[28].mxu0 %v3639_v54  ;;  %v10431_v55 = vpop.f32.mrb[138].mxu1  ;;  %v4016_v54 = vshrl.u32 %v10347_v39, 16  ;;  %v9061_v39 = vld [vmem:[#allocation9 + $0x198] sm:$0xff]  }
 0x393   : > { %8320 = vmatprep.mubr.bf16.mxu0 %v3946_v7  ;;  %v10434_v23 = vpop.f32.mrb[139].mxu1  ;;  %v4013_v7 = vor.u32 %v4012_v41, %v4009_v4  ;;  %v4070_v4 = vshll.u32 %v10359_v21, 16  ;;  %v4039_v41 = vor.u32 %v4038_v61, %v4035_v53  ;;  %v4101_v53 = vshrl.u32 %v10377_v18, 16 }
 0x394   : > { %v4018_v56 = vrot.slane %v4016_v54, 4  ;;  %v4055_v54 = vrot.slane %v4053_v3, 5  ;;  %v4104_v61 = vshll.u32 %v10377_v18, 16  ;;  %v9065_v3 = vld [vmem:[#allocation9 + $0x1b8] sm:$0xff]  }
 0x395   : > { %v4014_v36 = vsel %vm2419_vm2, %v4005_v2, %v4013_v7  ;;  %v4072_v52 = vrot.slane %v4070_v4, 5  ;;  %v4048_v50 = vsel %vm2419_vm2, %v4039_v41, %v4047_v46  ;;  %v4077_v7 = vrot.slane %v4075_v10, 4  ;;  %v3926_v18 = vld [vmem:[#allocation2 + $0xd8] sm:$0x1f] }
 0x396   : > { %v4022_v30 = vor.u32 %v4021_v20, %v4018_v56  ;;  %v4056_v33 = vor.u32 %v4055_v54, %v4052_v62  ;;  %v4084_v56 = vshrl.u32 %v10373_v43, 16  ;;  %v4111_v4 = vrot.slane %v4109_v42, 4  ;;  %v10471_v54 = vld [vmem:[#allocation9 + $0x1c0] sm:$0xff]  }
 0x397   : > { %v4114_v41 = vrot.slane %v4112_v16, 5  ;;  %v4118_v46 = vshrl.u32 %v10388_v32, 16  ;;  %v4121_v10 = vshll.u32 %v10388_v32, 16 }
 0x398   : > { %v4031_v2 = vsel %vm2419_vm2, %v4022_v30, %v4030_v28  ;;  %v4086_v58 = vrot.slane %v4084_v56, 4  ;;  %v3925_v30 = vld [vmem:[#allocation2 + $0xc8] sm:$0x1f] }
 0x399   : > { %v4129_v62 = vshll.u32 %v3925_v30, 16  ;;  %v4123_v8 = vrot.slane %v4121_v10, 5 }
 0x39a   : > { %8321 = vmatmul.mubr.bf16.vlgmr.msra.gmra.mrb[0].mxu0 %v3963_v60  ;;  %v9062_v60 = vld [vmem:[#allocation9 + $0x1a0] sm:$0xff]  }
 0x39b   : > { %8324 = vmatprep.mubr.bf16.mxu0 %v3980_v22  ;;  %8353 = vmatpush3.bf16.msra.mxu0 %v10379_v31  ;;  %v4067_v22 = vshrl.u32 %v10359_v21, 16  ;;  %v4080_v21 = vrot.slane %v4078_v27, 5  ;;  %v4126_v27 = vshrl.u32 %v3925_v30, 16  ;;  %v4131_v32 = vrot.slane %v4129_v62, 5  ;;  %v4477_v62 = vld [vmem:[#allocation2 + $0x20] sm:$0xf8] }
 0x39c   : > { %8354 = vmatprep.subr.bf16.mxu0 %v9059_v1 }
 0x39d   : > { %v4069_v35 = vrot.slane %v4067_v22, 4  ;;  %v4106_v22 = vrot.slane %v4104_v61, 5  ;;  %v4128_v5 = vrot.slane %v4126_v27, 4  ;;  %v4155_v61 = vshll.u32 %v10404_v51, 16 }
 0x39f   : > { %8355 = vmatpush3.bf16.msra.mxu0 %v9059_v1  ;;  %v4061_v1 = vshll.u32 %v3921_v13, 16  ;;  %v4087_v13 = vshll.u32 %v10373_v43, 16  ;;  %v4073_v20 = vor.u32 %v4072_v52, %v4069_v35  ;;  %v4094_v43 = vrot.slane %v4092_v40, 4  ;;  %v3928_v40 = vld [vmem:[#allocation2 + $0xf8] sm:$0x1f] }
 0x3a0   : > { %v10447_v31 = vpop.f32.mrb[140].mxu1  ;;  %8356 = vmatprep.subr.bf16.mxu0 %v9060_v34  ;;  %v4115_v52 = vor.u32 %v4114_v41, %v4111_v4 }
 0x3a1   : > { %v10450_v29 = vpop.f32.mrb[141].mxu1  ;;  %v4089_v0 = vrot.slane %v4087_v13, 5 }
 0x3a2   : > { %8325 = vmatmul.mubr.bf16.gmra.mrb[4].mxu0 %v3997_v47  ;;  %v10452_v15 = vpop.f32.mrb[142].mxu1 }
 0x3a3   : > { %8328 = vmatprep.mubr.bf16.mxu0 %v4014_v36  ;;  %v10455_v44 = vpop.f32.mrb[143].mxu1  ;;  %8357 = vmatpush3.bf16.msra.mxu0 %v9060_v34  ;;  %v4063_v34 = vrot.slane %v4061_v1, 5  ;;  %v4081_v36 = vor.u32 %v4080_v21, %v4077_v7  ;;  %v4097_v1 = vrot.slane %v4095_v37, 5  ;;  %v4146_v7 = vshll.u32 %v3926_v18, 16 }
 0x3a4   : > { %8358 = vmatprep.subr.bf16.mxu0 %v9061_v39  ;;  %v4120_v21 = vrot.slane %v4118_v46, 4 }
 0x3a5   : > { %v4064_v47 = vor.u32 %v4063_v34, %v4060_v57  ;;  %v4082_v28 = vsel %vm2419_vm2, %v4073_v20, %v4081_v36  ;;  %v4090_v57 = vor.u32 %v4089_v0, %v4086_v58  ;;  %v4098_v34 = vor.u32 %v4097_v1, %v4094_v43  ;;  %v3927_v20 = vld [vmem:[#allocation2 + $0xe8] sm:$0x1f] }
 0x3a6   : > { %v4124_v37 = vor.u32 %v4123_v8, %v4120_v21  ;;  %v4152_v36 = vshrl.u32 %v10404_v51, 16  ;;  %v4160_v16 = vshrl.u32 %v3927_v20, 16  ;;  %v4169_v58 = vshrl.u32 %v10408_v24, 16 }
 0x3a7   : > { %8359 = vmatpush3.bf16.msra.mxu0 %v9061_v39  ;;  %v9064_v39 = vld [vmem:[#allocation9 + $0x1b0] sm:$0xff]   ;;  %v4065_v49 = vsel %vm2419_vm2, %v4056_v33, %v4064_v47  ;;  %v4099_v33 = vsel %vm2419_vm2, %v4090_v57, %v4098_v34  ;;  %v4172_v0 = vshll.u32 %v10408_v24, 16  ;;  %v4177_v43 = vshrl.u32 %v3928_v40, 16  ;;  %v10484_v57 = vld [vmem:[#allocation2 + $0x28] sm:$0xf] }
 0x3a8   : > { %8360 = vmatprep.subr.bf16.mxu0 %v9062_v60  ;;  %v4180_v1 = vshll.u32 %v3928_v40, 16  ;;  %v4154_v30 = vrot.slane %v4152_v36, 4  ;;  %v4171_v41 = vrot.slane %v4169_v58, 4  ;;  %v4186_v24 = vshrl.u32 %v10417_v26, 16  ;;  %v10492_v36 = vld [vmem:[#allocation2 + $0x38] sm:$0xf] }
 0x3a9   : > { %v4174_v46 = vrot.slane %v4172_v0, 5  ;;  %v4179_v10 = vrot.slane %v4177_v43, 4  ;;  %v4189_v34 = vshll.u32 %v10417_v26, 16  ;;  %v4535_v43 = vshrl.u32 %v10492_v36, 16 }
 0x3aa   : > { %8329 = vmatmul.mubr.bf16.gmra.mrb[8].mxu0 %v4031_v2  ;;  %v4138_v2 = vshll.u32 %v10390_v59, 16  ;;  %v4182_v27 = vrot.slane %v4180_v1, 5  ;;  %v4538_v1 = vshll.u32 %v10492_v36, 16 }
 0x3ab   : > { %8332 = vmatprep.mubr.bf16.mxu0 %v4048_v50  ;;  %8361 = vmatpush3.bf16.msra.mxu0 %v9062_v60  ;;  %v4103_v60 = vrot.slane %v4101_v53, 4  ;;  %v4143_v50 = vshrl.u32 %v3926_v18, 16  ;;  %v4132_v53 = vor.u32 %v4131_v32, %v4128_v5  ;;  %v3929_v18 = vld [vmem:[#allocation2 + $0x108] sm:$0x1f]  ;;  %v4175_v21 = vor.u32 %v4174_v46, %v4171_v41 }
 0x3ac   : > { %8362 = vmatprep.subr.bf16.mxu0 %v9063_v48  ;;  %v4140_v56 = vrot.slane %v4138_v2, 5  ;;  %v4197_v2 = vshll.u32 %v3929_v18, 16  ;;  %v4183_v8 = vor.u32 %v4182_v27, %v4179_v10  ;;  %v4518_v5 = vshrl.u32 %v10484_v57, 16 }
 0x3ad   : > { %v4107_v35 = vor.u32 %v4106_v22, %v4103_v60  ;;  %v4133_v60 = vsel %vm2419_vm2, %v4124_v37, %v4132_v53  ;;  %v4162_v22 = vrot.slane %v4160_v16, 4  ;;  %v4521_v32 = vshll.u32 %v10484_v57, 16 }
 0x3ae   : > { %v4184_v40 = vsel %vm2419_vm2, %v4175_v21, %v4183_v8  ;;  %v4520_v37 = vrot.slane %v4518_v5, 3  ;;  %v4537_v10 = vrot.slane %v4535_v43, 3  ;;  %v4540_v27 = vrot.slane %v4538_v1, 4 }
 0x3af   : > { %8363 = vmatpush3.bf16.msra.mxu0 %v9063_v48  ;;  %v4135_v48 = vshrl.u32 %v10390_v59, 16  ;;  %v4116_v13 = vsel %vm2419_vm2, %v4107_v35, %v4115_v52  ;;  %v4148_v59 = vrot.slane %v4146_v7, 5  ;;  %v4513_v7 = vshll.u32 %v4477_v62, 16 }
 0x3b0   : > { %8364 = vmatprep.subr.bf16.mxu0 %v9064_v39  ;;  %v4523_v53 = vrot.slane %v4521_v32, 4 }
 0x3b1   : > { %v4137_v47 = vrot.slane %v4135_v48, 4  ;;  %v4194_v48 = vshrl.u32 %v3929_v18, 16  ;;  %v4515_v26 = vrot.slane %v4513_v7, 4 }
 0x3b2   : > { %8333 = vmatmul.mubr.bf16.gmra.mrb[12].mxu0 %v4065_v49  ;;  %v4163_v49 = vshll.u32 %v3927_v20, 16  ;;  %v4479_v20 = vld [vmem:[#allocation2 + $0x30] sm:$0xf8] }
 0x3b3   : > { %8336 = vmatprep.mubr.bf16.mxu0 %v4082_v28  ;;  %8365 = vmatpush3.bf16.msra.mxu0 %v9064_v39  ;;  %v4145_v39 = vrot.slane %v4143_v50, 4  ;;  %v4141_v42 = vor.u32 %v4140_v56, %v4137_v47  ;;  %v4157_v28 = vrot.slane %v4155_v61, 5  ;;  %v4510_v50 = vshrl.u32 %v4477_v62, 16  ;;  %v4481_v61 = vld [vmem:[#allocation2 + $0x40] sm:$0xf8] }
 0x3b4   : > { %8366 = vmatprep.subr.bf16.mxu0 %v9065_v3  ;;  %v4165_v4 = vrot.slane %v4163_v49, 5  ;;  %v4191_v47 = vrot.slane %v4189_v34, 5  ;;  %v4196_v56 = vrot.slane %v4194_v48, 4  ;;  %v4527_v58 = vshrl.u32 %v4479_v20, 16 }
 0x3b5   : > { %v4158_v35 = vor.u32 %v4157_v28, %v4154_v30  ;;  %v4524_v30 = vor.u32 %v4523_v53, %v4520_v37  ;;  %v4547_v28 = vshll.u32 %v4481_v61, 16 }
 0x3b6   : > { %v4166_v52 = vor.u32 %v4165_v4, %v4162_v22  ;;  %v4529_v18 = vrot.slane %v4527_v58, 3 }
 0x3b7   : > { %8367 = vmatpush3.bf16.msra.mxu0 %v9065_v3  ;;  %v4149_v3 = vor.u32 %v4148_v59, %v4145_v39  ;;  %v4512_v59 = vrot.slane %v4510_v50, 3  ;;  %v4549_v48 = vrot.slane %v4547_v28, 4  ;;  %v10504_v50 = vld [vmem:[#allocation2 + $0x68] sm:$0xf] }
 0x3b8   : > { %8400 = vmatprep.subr.bf16.mxu0 %v10471_v54  ;;  %v4167_v39 = vsel %vm2419_vm2, %v4158_v35, %v4166_v52  ;;  %v4485_v52 = vld [vmem:[#allocation2 + $0x60] sm:$0xf8]  ;;  %v10515_v28 = vld [vmem:[#allocation2 + $0x88] sm:$0xf] }
 0x3b9   : > { %v4150_v51 = vsel %vm2419_vm2, %v4141_v42, %v4149_v3  ;;  %v10494_v42 = vld [vmem:[#allocation2 + $0x48] sm:$0xf]  ;;  %v4530_v3 = vshll.u32 %v4479_v20, 16  ;;  %v4516_v0 = vor.u32 %v4515_v26, %v4512_v59  ;;  %v4586_v59 = vshrl.u32 %v10504_v50, 16 }
 0x3ba   : > { %8337 = vmatmul.mubr.bf16.gmra.mrb[16].mxu0 %v4099_v33  ;;  %v4188_v33 = vrot.slane %v4186_v24, 4  ;;  %v4552_v22 = vshrl.u32 %v10494_v42, 16  ;;  %v4555_v4 = vshll.u32 %v10494_v42, 16  ;;  %v10501_v24 = vld [vmem:[#allocation2 + $0x58] sm:$0xf]  ;;  %v4589_v26 = vshll.u32 %v10504_v50, 16 }
 0x3bb   : > { %8340 = vmatprep.mubr.bf16.mxu0 %v4116_v13  ;;  %v4199_v13 = vrot.slane %v4197_v2, 5  ;;  %v4532_v46 = vrot.slane %v4530_v3, 4  ;;  %v4525_v34 = vsel %vm1550_vm1, %v4516_v0, %v4524_v30  ;;  %v4569_v8 = vshrl.u32 %v10501_v24, 16  ;;  %v4487_v3 = vld [vmem:[#allocation2 + $0x70] sm:$0xf8] }
 0x3bc   : > { %v4192_v16 = vor.u32 %v4191_v47, %v4188_v33  ;;  %v4554_v2 = vrot.slane %v4552_v22, 3  ;;  %v4557_v35 = vrot.slane %v4555_v4, 4  ;;  %v4572_v5 = vshll.u32 %v10501_v24, 16  ;;  %v4489_v30 = vld [vmem:[#allocation2 + $0x80] sm:$0xf8] }
 0x3bd   : > { %v4200_v49 = vor.u32 %v4199_v13, %v4196_v56  ;;  %v4533_v32 = vor.u32 %v4532_v46, %v4529_v18  ;;  %v4541_v33 = vor.u32 %v4540_v27, %v4537_v10  ;;  %v4578_v47 = vshrl.u32 %v4485_v52, 16 }
 0x3be   : > { %v4581_v56 = vshll.u32 %v4485_v52, 16  ;;  %v4571_v37 = vrot.slane %v4569_v8, 3  ;;  %v4574_v53 = vrot.slane %v4572_v5, 4  ;;  %v4588_v43 = vrot.slane %v4586_v59, 3 }
 0x3bf   : > { %v4201_v41 = vsel %vm2419_vm2, %v4192_v16, %v4200_v49  ;;  %v4542_v16 = vsel %vm1550_vm1, %v4533_v32, %v4541_v33  ;;  %v4580_v49 = vrot.slane %v4578_v47, 3  ;;  %v4591_v1 = vrot.slane %v4589_v26, 4  ;;  %v10522_v47 = vld [vmem:[#allocation2 + $0x98] sm:$0xf]  ;;  %v4493_v26 = vld [vmem:[#allocation2 + $0xa0] sm:$0xf8] }
 0x3c0   : > { %v4583_v58 = vrot.slane %v4581_v56, 4  ;;  %v4575_v4 = vor.u32 %v4574_v53, %v4571_v37  ;;  %v4598_v18 = vshll.u32 %v4487_v3, 16  ;;  %v4637_v53 = vshrl.u32 %v10522_v47, 16 }
 0x3c2   : > { %8341 = vmatmul.mubr.bf16.gmra.mrb[20].mxu0 %v4133_v60  ;;  %v4544_v60 = vshrl.u32 %v4481_v61, 16  ;;  %v9067_v61 = vld [vmem:[#allocation9 + $0x1c8] sm:$0xff]   ;;  %v4584_v46 = vor.u32 %v4583_v58, %v4580_v49  ;;  %v4600_v8 = vrot.slane %v4598_v18, 4  ;;  %v4639_v18 = vrot.slane %v4637_v53, 3 }
 0x3c3   : > { %8344 = vmatprep.mubr.bf16.mxu0 %v4150_v51  ;;  %v4483_v51 = vld [vmem:[#allocation2 + $0x50] sm:$0xf8] }
 0x3c4   : > { %v4546_v62 = vrot.slane %v4544_v60, 3  ;;  %v4561_v7 = vshrl.u32 %v4483_v51, 16  ;;  %v4564_v21 = vshll.u32 %v4483_v51, 16  ;;  %v10512_v60 = vld [vmem:[#allocation2 + $0x78] sm:$0xf] }
 0x3c5   : > { %v9068_v51 = vld [vmem:[#allocation9 + $0x1d0] sm:$0xff]   ;;  %v4603_v10 = vshrl.u32 %v10512_v60, 16  ;;  %v4606_v27 = vshll.u32 %v10512_v60, 16 }
 0x3c6   : > { %v4550_v13 = vor.u32 %v4549_v48, %v4546_v62  ;;  %v4563_v20 = vrot.slane %v4561_v7, 3  ;;  %v4612_v62 = vshrl.u32 %v4489_v30, 16  ;;  %v4615_v48 = vshll.u32 %v4489_v30, 16  ;;  %v4491_v7 = vld [vmem:[#allocation2 + $0x90] sm:$0xf8] }
 0x3c7   : > { %v4605_v5 = vrot.slane %v4603_v10, 3  ;;  %v4608_v32 = vrot.slane %v4606_v27, 4  ;;  %v4632_v37 = vshll.u32 %v4491_v7, 16 }
 0x3c8   : > { %v4614_v33 = vrot.slane %v4612_v62, 3 }
 0x3c9   : > { %v4609_v58 = vor.u32 %v4608_v32, %v4605_v5 }
 0x3ca   : > { %8345 = vmatmul.mubr.bf16.gmra.mrb[24].mxu0 %v4167_v39  ;;  %v4558_v39 = vor.u32 %v4557_v35, %v4554_v2  ;;  %v4620_v2 = vshrl.u32 %v10515_v28, 16 }
 0x3cb   : > { %8348 = vmatprep.mubr.bf16.mxu0 %v4184_v40  ;;  %v4566_v40 = vrot.slane %v4564_v21, 4  ;;  %v9069_v21 = vld [vmem:[#allocation9 + $0x1d8] sm:$0xff]  }
 0x3cc   : > { %v4559_v0 = vsel %vm1550_vm1, %v4550_v13, %v4558_v39  ;;  %v4617_v13 = vrot.slane %v4615_v48, 4  ;;  %v4622_v39 = vrot.slane %v4620_v2, 3 }
 0x3cd   : > { %v4567_v22 = vor.u32 %v4566_v40, %v4563_v20  ;;  %v10525_v20 = vld [vmem:[#allocation2 + $0xa8] sm:$0xf]  ;;  %v4629_v40 = vshrl.u32 %v4491_v7, 16 }
 0x3ce   : > { %v4654_v30 = vshrl.u32 %v10525_v20, 16  ;;  %v10535_v7 = vld [vmem:[#allocation2 + $0xc8] sm:$0xf] }
 0x3cf   : > { %v4576_v35 = vsel %vm1550_vm1, %v4567_v22, %v4575_v4  ;;  %v4657_v22 = vshll.u32 %v10525_v20, 16  ;;  %v4631_v4 = vrot.slane %v4629_v40, 3  ;;  %v4691_v53 = vshll.u32 %v10535_v7, 16 }
 0x3d0   : > { %v4656_v2 = vrot.slane %v4654_v30, 3  ;;  %v10542_v30 = vld [vmem:[#allocation2 + $0xd8] sm:$0xf] }
 0x3d2   : > { %8349 = vmatmul.mubr.bf16.gmra.mrb[28].mxu0 %v4201_v41  ;;  %v4595_v41 = vshrl.u32 %v4487_v3, 16  ;;  %v4646_v3 = vshrl.u32 %v4493_v26, 16 }
 0x3d3   : > { %8368 = vmatprep.mubr.bf16.mxu0 %v4525_v34  ;;  %v4592_v34 = vor.u32 %v4591_v1, %v4588_v43  ;;  %v4618_v43 = vor.u32 %v4617_v13, %v4614_v33  ;;  %v9072_v33 = vld [vmem:[#allocation9 + $0x1f0] sm:$0xff]  }
 0x3d4   : > { %v4597_v52 = vrot.slane %v4595_v41, 3  ;;  %v4634_v41 = vrot.slane %v4632_v37, 4  ;;  %v4648_v27 = vrot.slane %v4646_v3, 3  ;;  %v4688_v37 = vshrl.u32 %v10535_v7, 16 }
 0x3d5   : > { %v4593_v56 = vsel %vm1550_vm1, %v4584_v46, %v4592_v34  ;;  %v9071_v46 = vld [vmem:[#allocation9 + $0x1e8] sm:$0xff]   ;;  %v4495_v34 = vld [vmem:[#allocation2 + $0xb0] sm:$0xf8] }
 0x3d6   : > { %v4601_v49 = vor.u32 %v4600_v8, %v4597_v52  ;;  %v4497_v52 = vld [vmem:[#allocation2 + $0xc0] sm:$0xf8]  ;;  %v4663_v5 = vshrl.u32 %v4495_v34, 16  ;;  %v4666_v32 = vshll.u32 %v4495_v34, 16  ;;  %v4708_v34 = vshll.u32 %v10542_v30, 16 }
 0x3d7   : > { %v4683_v40 = vshll.u32 %v4497_v52, 16 }
 0x3d8   : > { %v4610_v10 = vsel %vm1550_vm1, %v4601_v49, %v4609_v58  ;;  %v4499_v49 = vld [vmem:[#allocation2 + $0xd0] sm:$0xf8]  ;;  %v9073_v58 = vld [vmem:[#allocation9 + $0x1f8] sm:$0xff]   ;;  %v4668_v3 = vrot.slane %v4666_v32, 4 }
 0x3da   : > { %8369 = vmatmul.mubr.bf16.vlgmr.msra.gmra.mrb[0].mxu0 %v4542_v16  ;;  %v9070_v16 = vld [vmem:[#allocation9 + $0x1e0] sm:$0xff]  }
 0x3db   : > { %8372 = vmatprep.mubr.bf16.mxu0 %v4559_v0  ;;  %8401 = vmatpush3.bf16.msra.mxu0 %v10471_v54  ;;  %v4623_v54 = vshll.u32 %v10515_v28, 16  ;;  %v4649_v0 = vshll.u32 %v4493_v26, 16 }
 0x3dc   : > { %8402 = vmatprep.subr.bf16.mxu0 %v9067_v61 }
 0x3dd   : > { %v4625_v59 = vrot.slane %v4623_v54, 4  ;;  %v4651_v62 = vrot.slane %v4649_v0, 4  ;;  %v4659_v54 = vrot.slane %v4657_v22, 4 }
 0x3df   : > { %8403 = vmatpush3.bf16.msra.mxu0 %v9067_v61  ;;  %v4640_v61 = vshll.u32 %v10522_v47, 16  ;;  %v4626_v1 = vor.u32 %v4625_v59, %v4622_v39  ;;  %v4680_v59 = vshrl.u32 %v4497_v52, 16  ;;  %v4660_v26 = vor.u32 %v4659_v54, %v4656_v2 }
 0x3e0   : > { %8404 = vmatprep.subr.bf16.mxu0 %v9068_v51 }
 0x3e1   : > { %v4627_v48 = vsel %vm1550_vm1, %v4618_v43, %v4626_v1  ;;  %v4682_v1 = vrot.slane %v4680_v59, 3  ;;  %v4710_v59 = vrot.slane %v4708_v34, 4 }
 0x3e2   : > { %8373 = vmatmul.mubr.bf16.gmra.mrb[4].mxu0 %v4576_v35  ;;  %v10533_v35 = vld [vmem:[#allocation2 + $0xb8] sm:$0xf] }
 0x3e3   : > { %8376 = vmatprep.mubr.bf16.mxu0 %v4593_v56  ;;  %8405 = vmatpush3.bf16.msra.mxu0 %v9068_v51  ;;  %v4642_v51 = vrot.slane %v4640_v61, 4  ;;  %v4652_v56 = vor.u32 %v4651_v62, %v4648_v27  ;;  %v4671_v13 = vshrl.u32 %v10533_v35, 16  ;;  %v4674_v39 = vshll.u32 %v10533_v35, 16 }
 0x3e4   : > { %8406 = vmatprep.subr.bf16.mxu0 %v9069_v21  ;;  %v4700_v27 = vshll.u32 %v4499_v49, 16  ;;  %v4705_v62 = vshrl.u32 %v10542_v30, 16 }
 0x3e5   : > { %v4643_v8 = vor.u32 %v4642_v51, %v4639_v18  ;;  %v4673_v0 = vrot.slane %v4671_v13, 3  ;;  %v4676_v43 = vrot.slane %v4674_v39, 4  ;;  %v4661_v22 = vsel %vm1550_vm1, %v4652_v56, %v4660_v26  ;;  %v4501_v51 = vld [vmem:[#allocation2 + $0xe0] sm:$0xf8] }
 0x3e6   : > { %v4693_v18 = vrot.slane %v4691_v53, 4  ;;  %v4714_v52 = vshrl.u32 %v4501_v51, 16  ;;  %v4702_v13 = vrot.slane %v4700_v27, 4  ;;  %v4707_v39 = vrot.slane %v4705_v62, 3  ;;  %v4503_v53 = vld [vmem:[#allocation2 + $0xf0] sm:$0xf8] }
 0x3e7   : > { %8407 = vmatpush3.bf16.msra.mxu0 %v9069_v21  ;;  %v4635_v21 = vor.u32 %v4634_v41, %v4631_v4  ;;  %v4685_v4 = vrot.slane %v4683_v40, 4  ;;  %v4690_v41 = vrot.slane %v4688_v37, 3  ;;  %v4677_v54 = vor.u32 %v4676_v43, %v4673_v0  ;;  %v4505_v0 = vld [vmem:[#allocation2 + $0x100] sm:$0xf8] }
 0x3e8   : > { %8408 = vmatprep.subr.bf16.mxu0 %v9070_v16  ;;  %v4716_v40 = vrot.slane %v4714_v52, 3  ;;  %v4751_v62 = vshll.u32 %v4505_v0, 16 }
 0x3e9   : > { %v4644_v61 = vsel %vm1550_vm1, %v4635_v21, %v4643_v8  ;;  %v4717_v21 = vshll.u32 %v4501_v51, 16  ;;  %v4686_v8 = vor.u32 %v4685_v4, %v4682_v1  ;;  %v4711_v1 = vor.u32 %v4710_v59, %v4707_v39 }
 0x3ea   : > { %8377 = vmatmul.mubr.bf16.gmra.mrb[8].mxu0 %v4610_v10  ;;  %v4697_v10 = vshrl.u32 %v4499_v49, 16  ;;  %v4734_v4 = vshll.u32 %v4503_v53, 16  ;;  %v4753_v39 = vrot.slane %v4751_v62, 4  ;;  %v10572_v62 = vld [vmem:[#allocation2 + $0x20] sm:$0xf0] }
 0x3eb   : > { %8380 = vmatprep.mubr.bf16.mxu0 %v4627_v48  ;;  %8409 = vmatpush3.bf16.msra.mxu0 %v9070_v16  ;;  %v4665_v16 = vrot.slane %v4663_v5, 3  ;;  %v10549_v48 = vld [vmem:[#allocation9 + $0x200] sm:$0xff]   ;;  %v4694_v5 = vor.u32 %v4693_v18, %v4690_v41  ;;  %v4719_v37 = vrot.slane %v4717_v21, 4  ;;  %v4507_v21 = vld [vmem:[#allocation2 + $0x110] sm:$0xf8] }
 0x3ec   : > { %8410 = vmatprep.subr.bf16.mxu0 %v9071_v46 }
 0x3ed   : > { %v4669_v2 = vor.u32 %v4668_v3, %v4665_v16  ;;  %v10556_v3 = vld [vmem:[#allocation2 + $0xf8] sm:$0xf]  ;;  %v4720_v41 = vor.u32 %v4719_v37, %v4716_v40  ;;  %v4765_v40 = vshrl.u32 %v4507_v21, 16  ;;  %v4768_v37 = vshll.u32 %v4507_v21, 16  ;;  %v10578_v21 = vld [vmem:[#allocation2 + $0x30] sm:$0xf0] }
 0x3ee   : > { %v4739_v18 = vshrl.u32 %v10556_v3, 16  ;;  %v4742_v51 = vshll.u32 %v10556_v3, 16 }
 0x3ef   : > { %8411 = vmatpush3.bf16.msra.mxu0 %v9071_v46  ;;  %v10545_v46 = vld [vmem:[#allocation2 + $0xe8] sm:$0xf]  ;;  %v4678_v26 = vsel %vm1550_vm1, %v4669_v2, %v4677_v54 }
 0x3f0   : > { %8412 = vmatprep.subr.bf16.mxu0 %v9072_v33  ;;  %v4722_v32 = vshrl.u32 %v10545_v46, 16  ;;  %v4725_v56 = vshll.u32 %v10545_v46, 16 }
 0x3f2   : > { %8381 = vmatmul.mubr.bf16.gmra.mrb[12].mxu0 %v4644_v61  ;;  %v4695_v61 = vsel %vm1550_vm1, %v4686_v8, %v4694_v5  ;;  %v4724_v16 = vrot.slane %v4722_v32, 3  ;;  %v4727_v49 = vrot.slane %v4725_v56, 4  ;;  %v10565_v8 = vld [vmem:[#allocation2 + $0x118] sm:$0xf]  ;;  %v4736_v5 = vrot.slane %v4734_v4, 4 }
 0x3f3   : > { %8384 = vmatprep.mubr.bf16.mxu0 %v4661_v22  ;;  %8413 = vmatpush3.bf16.msra.mxu0 %v9072_v33  ;;  %v4699_v33 = vrot.slane %v4697_v10, 3  ;;  %v4731_v22 = vshrl.u32 %v4503_v53, 16  ;;  %v4748_v10 = vshrl.u32 %v4505_v0, 16  ;;  %v4741_v32 = vrot.slane %v4739_v18, 3 }
 0x3f4   : > { %8414 = vmatprep.subr.bf16.mxu0 %v9073_v58  ;;  %v4728_v27 = vor.u32 %v4727_v49, %v4724_v16  ;;  %v4744_v56 = vrot.slane %v4742_v51, 4  ;;  %v4773_v53 = vshrl.u32 %v10565_v8, 16 }
 0x3f5   : > { %v4703_v43 = vor.u32 %v4702_v13, %v4699_v33  ;;  %v4733_v52 = vrot.slane %v4731_v22, 3  ;;  %v4750_v33 = vrot.slane %v4748_v10, 3  ;;  %v4770_v22 = vrot.slane %v4768_v37, 4  ;;  %v9075_v37 = vld [vmem:[#allocation9 + $0x208] sm:$0xff]  }
 0x3f6   : > { %v4729_v13 = vsel %vm1550_vm1, %v4720_v41, %v4728_v27  ;;  %v4745_v49 = vor.u32 %v4744_v56, %v4741_v32  ;;  %v4775_v4 = vrot.slane %v4773_v53, 3  ;;  %v9084_v32 = vld [vmem:[#allocation12 + $0x4] ss:$16 sps:$4 sm:$0xff]   ;;  %v10580_v56 = vld [vmem:[#allocation2 + $0x40] sm:$0xf0] }
 0x3f7   : > { %8415 = vmatpush3.bf16.msra.mxu0 %v9073_v58  ;;  %v10558_v58 = vld [vmem:[#allocation2 + $0x108] sm:$0xf]  ;;  %v4712_v54 = vsel %vm1550_vm1, %v4703_v43, %v4711_v1  ;;  %v4737_v16 = vor.u32 %v4736_v5, %v4733_v52  ;;  %v4754_v0 = vor.u32 %v4753_v39, %v4750_v33  ;;  %v4767_v1 = vrot.slane %v4765_v40, 3  ;;  %v9082_v5 = vld [vmem:[#allocation12] ss:$16 sps:$4 sm:$0xff]   ;;  %6480 = vmatprep.subr.bf16.mxu1 %v9084_v32 }
 0x3f8   : > { %8448 = vmatprep.subr.bf16.mxu0 %v10549_v48  ;;  %v4756_v34 = vshrl.u32 %v10558_v58, 16  ;;  %v4759_v2 = vshll.u32 %v10558_v58, 16  ;;  %v9087_v33 = vld [vmem:[#allocation12 + $0x24] ss:$16 sps:$4 sm:$0xff]   ;;  %v5107_v39 = vrot.slane %v10492_v36, 4  ;;  %6481 = vmatpush1.bf16.msra.mxu1 %v9082_v5 }
 0x3f9   : > { %v4746_v41 = vsel %vm1550_vm1, %v4737_v16, %v4745_v49  ;;  %v4771_v10 = vor.u32 %v4770_v22, %v4767_v1  ;;  %6482 = vmatprep.subr.bf16.mxu1 %v9087_v33  ;;  %v9090_v40 = vld [vmem:[#allocation12 + $0x44] ss:$16 sps:$4 sm:$0xff]   ;;  %v10588_v49 = vld [vmem:[#allocation2 + $0x50] sm:$0xf0]  ;;  %v5113_v1 = vrot.slane %v10501_v24, 4  ;;  %v5122_v33 = vrot.slane %v10515_v28, 4 }
 0x3fa   : > { %8385 = vmatmul.mubr.bf16.gmra.mrb[16].mxu0 %v4678_v26  ;;  %v4758_v59 = vrot.slane %v4756_v34, 3  ;;  %v4761_v26 = vrot.slane %v4759_v2, 4  ;;  %v5103_v34 = vrot.slane %v10572_v62, 4  ;;  %v5104_v2 = vrot.slane %v10484_v57, 4  ;;  %v9085_v57 = vld [vmem:[#allocation12 + $0x20] ss:$16 sps:$4 sm:$0xff]  }
 0x3fb   : > { %8388 = vmatprep.mubr.bf16.mxu0 %v4695_v61  ;;  %v4776_v61 = vshll.u32 %v10565_v8, 16  ;;  %v9093_v36 = vld [vmem:[#allocation12 + $0x64] ss:$16 sps:$4 sm:$0xff]   ;;  %v9091_v22 = vld [vmem:[#allocation12 + $0x60] ss:$16 sps:$4 sm:$0xff]  }
 0x3fc   : > { %v4762_v43 = vor.u32 %v4761_v26, %v4758_v59  ;;  %v5105_v52 = vsel %vm1903_vm0, %v5103_v34, %v5104_v2  ;;  %v5109_v59 = vrot.slane %v10580_v56, 4  ;;  %v5110_v26 = vrot.slane %v10494_v42, 4  ;;  %6483 = vmatpush1.bf16.msra.mxu1 %v9085_v57  ;;  %v9076_v42 = vld [vmem:[#allocation9 + $0x210] sm:$0xff]   ;;  %v10601_v2 = vld [vmem:[#allocation2 + $0x80] sm:$0xf0] }
 0x3fd   : > { %v4778_v18 = vrot.slane %v4776_v61, 4  ;;  %v9088_v61 = vld [vmem:[#allocation12 + $0x40] ss:$16 sps:$4 sm:$0xff]   ;;  %6484 = vmatprep.subr.bf16.mxu1 %v9090_v40  ;;  %v9099_v24 = vld [vmem:[#allocation12 + $0xa4] ss:$16 sps:$4 sm:$0xff]   ;;  %v5121_v32 = vrot.slane %v10601_v2, 4 }
 0x3fe   : > { %v4763_v51 = vsel %vm1550_vm1, %v4754_v0, %v4762_v43  ;;  %v5111_v16 = vsel %vm1903_vm0, %v5109_v59, %v5110_v26  ;;  %v10591_v0 = vld [vmem:[#allocation2 + $0x60] sm:$0xf0]  ;;  %v5112_v43 = vrot.slane %v10588_v49, 4  ;;  %v10599_v34 = vld [vmem:[#allocation2 + $0x70] sm:$0xf0]  ;;  %v5125_v40 = vrot.slane %v10522_v47, 4 }
 0x3ff   : > { %v4779_v27 = vor.u32 %v4778_v18, %v4775_v4  ;;  %v5115_v4 = vrot.slane %v10591_v0, 4  ;;  %v5116_v18 = vrot.slane %v10504_v50, 4  ;;  %v9078_v50 = vld [vmem:[#allocation9 + $0x220] sm:$0xff]   ;;  %v5123_v57 = vsel %vm1903_vm0, %v5121_v32, %v5122_v33  ;;  %v10609_v59 = vld [vmem:[#allocation2 + $0x90] sm:$0xf0] }
 0x400   : > { %6485 = vmatpush1.bf16.msra.mxu1 %v9088_v61  ;;  %v9097_v5 = vld [vmem:[#allocation12 + $0xa0] ss:$16 sps:$4 sm:$0xff]   ;;  %v5124_v28 = vrot.slane %v10609_v59, 4  ;;  %v9081_v61 = vld [vmem:[#allocation9 + $0x238] sm:$0xff]   ;;  %v5143_v32 = vrot.slane %v10556_v3, 4  ;;  %v5445_v33 = vshll.u32 %v10572_v62, 16 }
 0x401   : > { %6486 = vmatprep.subr.bf16.mxu1 %v9093_v36  ;;  %v9080_v26 = vld [vmem:[#allocation9 + $0x230] sm:$0xff]  }
 0x402   : > { %8389 = vmatmul.mubr.bf16.gmra.mrb[20].mxu0 %v4712_v54  ;;  %v4780_v54 = vsel %vm1550_vm1, %v4771_v10, %v4779_v27  ;;  %v9094_v10 = vld [vmem:[#allocation12 + $0x80] ss:$16 sps:$4 sm:$0xff]   ;;  %v5117_v27 = vsel %vm1903_vm0, %v5115_v4, %v5116_v18 }
 0x403   : > { %8392 = vmatprep.mubr.bf16.mxu0 %v4729_v13  ;;  %v5106_v13 = vrot.slane %v10578_v21, 4 }
 0x404   : > { %6487 = vmatpush1.bf16.msra.mxu1 %v9091_v22  ;;  %v5134_v22 = vrot.slane %v10535_v7, 4 }
 0x405   : > { %v5108_v53 = vsel %vm1903_vm0, %v5106_v13, %v5107_v39  ;;  %v9079_v13 = vld [vmem:[#allocation9 + $0x228] sm:$0xff]  }
 0x40a   : > { %8393 = vmatmul.mubr.bf16.gmra.mrb[24].mxu0 %v4746_v41  ;;  %v9096_v41 = vld [vmem:[#allocation12 + $0x84] ss:$16 sps:$4 sm:$0xff]  }
 0x40b   : > { %8396 = vmatprep.mubr.bf16.mxu0 %v4763_v51  ;;  %v9077_v51 = vld [vmem:[#allocation9 + $0x218] sm:$0xff]   ;;  %6488 = vmatprep.subr.bf16.mxu1 %v9096_v41  ;;  %v10629_v41 = vld [vmem:[#allocation2 + $0xd0] sm:$0xf0] }
 0x40c   : > { %6489 = vmatpush1.bf16.msra.mxu1 %v9094_v10  ;;  %v5137_v10 = vrot.slane %v10542_v30, 4  ;;  %v5442_v30 = vshrl.u32 %v10572_v62, 16 }
 0x40d   : > { %6490 = vmatprep.subr.bf16.mxu1 %v9099_v24 }
 0x410   : > { %6491 = vmatpush1.bf16.msra.mxu1 %v9097_v5 }
 0x412   : > { %8397 = vmatmul.mubr.bf16.gmra.mrb[28].mxu0 %v4780_v54  ;;  %v5118_v54 = vrot.slane %v10599_v34, 4 }
 0x413   : > { %8416 = vmatprep.mubr.bf16.mxu0 %v5105_v52  ;;  %v5119_v52 = vrot.slane %v10512_v60, 4  ;;  %v10611_v60 = vld [vmem:[#allocation2 + $0xa0] sm:$0xf0] }
 0x415   : > { %v5120_v39 = vsel %vm1903_vm0, %v5118_v54, %v5119_v52  ;;  %v10641_v54 = vld [vmem:[#allocation2 + $0x100] sm:$0xf0]  ;;  %v5425_v52 = vld [vmem:[#allocation2 + $0x28] sm:$0x1f] }
 0x41a   : > { %8417 = vmatmul.mubr.bf16.vlgmr.msra.gmra.mrb[0].mxu0 %v5108_v53  ;;  %v5128_v53 = vrot.slane %v10525_v20, 4 }
 0x41b   : > { %8420 = vmatprep.mubr.bf16.mxu0 %v5111_v16  ;;  %8449 = vmatpush3.bf16.msra.mxu0 %v10549_v48  ;;  %v5114_v48 = vsel %vm1903_vm0, %v5112_v43, %v5113_v1  ;;  %v5126_v16 = vsel %vm1903_vm0, %v5124_v28, %v5125_v40  ;;  %v10621_v43 = vld [vmem:[#allocation2 + $0xc0] sm:$0xf0]  ;;  %v5131_v1 = vrot.slane %v10533_v35, 4  ;;  %v5426_v28 = vld [vmem:[#allocation2 + $0x38] sm:$0x1f] }
 0x41c   : > { %8450 = vmatprep.subr.bf16.mxu0 %v9075_v37  ;;  %v5133_v20 = vrot.slane %v10621_v43, 4 }
 0x41e   : > { %v5135_v18 = vsel %vm1903_vm0, %v5133_v20, %v5134_v22  ;;  %v5470_v20 = vshll.u32 %v5426_v28, 16  ;;  %v5427_v22 = vld [vmem:[#allocation2 + $0x48] sm:$0x1f] }
 0x41f   : > { %8451 = vmatpush3.bf16.msra.mxu0 %v9075_v37  ;;  %v5127_v37 = vrot.slane %v10611_v60, 4 }
 0x420   : > { %8452 = vmatprep.subr.bf16.mxu0 %v9076_v42 }
 0x421   : > { %v5129_v36 = vsel %vm1903_vm0, %v5127_v37, %v5128_v53  ;;  %v5444_v37 = vrot.slane %v5442_v30, 4  ;;  %v5447_v53 = vrot.slane %v5445_v33, 5  ;;  %v5428_v30 = vld [vmem:[#allocation2 + $0x58] sm:$0x1f] }
 0x422   : > { %8421 = vmatmul.mubr.bf16.gmra.mrb[4].mxu0 %v5114_v48  ;;  %v5136_v48 = vrot.slane %v10629_v41, 4 }
 0x423   : > { %8424 = vmatprep.mubr.bf16.mxu0 %v5117_v27  ;;  %8453 = vmatpush3.bf16.msra.mxu0 %v9076_v42  ;;  %v10619_v42 = vld [vmem:[#allocation2 + $0xb0] sm:$0xf0]  ;;  %v5140_v27 = vrot.slane %v10545_v46, 4  ;;  %v5145_v46 = vrot.slane %v10641_v54, 4 }
 0x424   : > { %8454 = vmatprep.subr.bf16.mxu0 %v9077_v51  ;;  %v5130_v47 = vrot.slane %v10619_v42, 4  ;;  %v5138_v7 = vsel %vm1903_vm0, %v5136_v48, %v5137_v10  ;;  %v5476_v48 = vshrl.u32 %v10580_v56, 16 }
 0x426   : > { %v5132_v4 = vsel %vm1903_vm0, %v5130_v47, %v5131_v1  ;;  %v5149_v47 = vrot.slane %v10565_v8, 4  ;;  %v5467_v1 = vshrl.u32 %v5426_v28, 16 }
 0x427   : > { %8455 = vmatpush3.bf16.msra.mxu0 %v9077_v51  ;;  %v10631_v51 = vld [vmem:[#allocation2 + $0xe0] sm:$0xf0] }
 0x428   : > { %8456 = vmatprep.subr.bf16.mxu0 %v9078_v50  ;;  %v5139_v35 = vrot.slane %v10631_v51, 4 }
 0x42a   : > { %8425 = vmatmul.mubr.bf16.gmra.mrb[8].mxu0 %v5120_v39  ;;  %v5141_v24 = vsel %vm1903_vm0, %v5139_v35, %v5140_v27  ;;  %v5450_v39 = vshrl.u32 %v5425_v52, 16  ;;  %v5479_v35 = vshll.u32 %v10580_v56, 16  ;;  %v5484_v27 = vshrl.u32 %v5427_v22, 16 }
 0x42b   : > { %8428 = vmatprep.mubr.bf16.mxu0 %v5123_v57  ;;  %8457 = vmatpush3.bf16.msra.mxu0 %v9078_v50  ;;  %v10639_v50 = vld [vmem:[#allocation2 + $0xf0] sm:$0xf0]  ;;  %v5453_v57 = vshll.u32 %v5425_v52, 16  ;;  %v5469_v52 = vrot.slane %v5467_v1, 4  ;;  %v5493_v56 = vshrl.u32 %v10588_v49, 16 }
 0x42c   : > { %8458 = vmatprep.subr.bf16.mxu0 %v9079_v13  ;;  %v5142_v5 = vrot.slane %v10639_v50, 4  ;;  %v5481_v33 = vrot.slane %v5479_v35, 5 }
 0x42d   : > { %v5455_v62 = vrot.slane %v5453_v57, 5  ;;  %v5495_v1 = vrot.slane %v5493_v56, 4 }
 0x42e   : > { %v5144_v40 = vsel %vm1903_vm0, %v5142_v5, %v5143_v32  ;;  %v5472_v5 = vrot.slane %v5470_v20, 5  ;;  %v5478_v32 = vrot.slane %v5476_v48, 4 }
 0x42f   : > { %8459 = vmatpush3.bf16.msra.mxu0 %v9079_v13  ;;  %v5146_v13 = vrot.slane %v10558_v58, 4 }
 0x430   : > { %8460 = vmatprep.subr.bf16.mxu0 %v9080_v26  ;;  %v5473_v28 = vor.u32 %v5472_v5, %v5469_v52  ;;  %v5431_v52 = vld [vmem:[#allocation2 + $0x88] sm:$0x1f] }
 0x431   : > { %v5147_v3 = vsel %vm1903_vm0, %v5145_v46, %v5146_v13  ;;  %v5486_v46 = vrot.slane %v5484_v27, 4 }
 0x432   : > { %8429 = vmatmul.mubr.bf16.gmra.mrb[12].mxu0 %v5126_v16  ;;  %v5452_v16 = vrot.slane %v5450_v39, 4  ;;  %v5429_v39 = vld [vmem:[#allocation2 + $0x68] sm:$0x1f] }
 0x433   : > { %8432 = vmatprep.mubr.bf16.mxu0 %v5129_v36  ;;  %8461 = vmatpush3.bf16.msra.mxu0 %v9080_v26  ;;  %v10649_v26 = vld [vmem:[#allocation2 + $0x110] sm:$0xf0]  ;;  %v5462_v36 = vshll.u32 %v10578_v21, 16 }
 0x434   : > { %8462 = vmatprep.subr.bf16.mxu0 %v9081_v61  ;;  %v5148_v58 = vrot.slane %v10649_v26, 4  ;;  %v5456_v10 = vor.u32 %v5455_v62, %v5452_v16  ;;  %v5518_v16 = vshrl.u32 %v5429_v39, 16  ;;  %v5521_v62 = vshll.u32 %v5429_v39, 16 }
 0x435   : > { %v5555_v39 = vshll.u32 %v5431_v52, 16 }
 0x436   : > { %v5523_v35 = vrot.slane %v5521_v62, 5 }
 0x437   : > { %8463 = vmatpush3.bf16.msra.mxu0 %v9081_v61  ;;  %v5459_v61 = vshrl.u32 %v10578_v21, 16  ;;  %v5464_v21 = vrot.slane %v5462_v36, 5  ;;  %v5482_v36 = vor.u32 %v5481_v33, %v5478_v32  ;;  %v5544_v33 = vshrl.u32 %v10601_v2, 16 }
 0x438   : > { %v5557_v62 = vrot.slane %v5555_v39, 5  ;;  %v5598_v39 = vshll.u32 %v10619_v42, 16 }
 0x43a   : > { %8433 = vmatmul.mubr.bf16.gmra.mrb[16].mxu0 %v5132_v4  ;;  %v5448_v4 = vor.u32 %v5447_v53, %v5444_v37  ;;  %v5501_v37 = vshrl.u32 %v5428_v30, 16  ;;  %v5504_v53 = vshll.u32 %v5428_v30, 16 }
 0x43b   : > { %8436 = vmatprep.mubr.bf16.mxu0 %v5135_v18  ;;  %v5461_v18 = vrot.slane %v5459_v61, 4  ;;  %v5510_v61 = vshrl.u32 %v10591_v0, 16 }
 0x43c   : > { %v5457_v8 = vsel %vm2419_vm2, %v5448_v4, %v5456_v10  ;;  %v5506_v4 = vrot.slane %v5504_v53, 5  ;;  %v5432_v53 = vld [vmem:[#allocation2 + $0x98] sm:$0x1f] }
 0x43d   : > { %v5465_v57 = vor.u32 %v5464_v21, %v5461_v18  ;;  %v5430_v18 = vld [vmem:[#allocation2 + $0x78] sm:$0x1f]  ;;  %v5512_v48 = vrot.slane %v5510_v61, 4  ;;  %v5546_v61 = vrot.slane %v5544_v33, 4 }
 0x43e   : > { %v5538_v21 = vshll.u32 %v5430_v18, 16 }
 0x442   : > { %8437 = vmatmul.mubr.bf16.gmra.mrb[20].mxu0 %v5138_v7  ;;  %v5487_v7 = vshll.u32 %v5427_v22, 16  ;;  %v5503_v22 = vrot.slane %v5501_v37, 4 }
 0x443   : > { %8440 = vmatprep.mubr.bf16.mxu0 %v5141_v24  ;;  %v5150_v24 = vsel %vm1903_vm0, %v5148_v58, %v5149_v47  ;;  %v5474_v47 = vsel %vm2419_vm2, %v5465_v57, %v5473_v28 }
 0x444   : > { %v5489_v13 = vrot.slane %v5487_v7, 5  ;;  %v5530_v7 = vshll.u32 %v10599_v34, 16  ;;  %v5507_v32 = vor.u32 %v5506_v4, %v5503_v22  ;;  %v5572_v22 = vshll.u32 %v5432_v53, 16 }
 0x445   : > { %v5578_v4 = vshrl.u32 %v10611_v60, 16 }
 0x446   : > { %v5490_v58 = vor.u32 %v5489_v13, %v5486_v46  ;;  %v5547_v46 = vshll.u32 %v10601_v2, 16  ;;  %v5552_v13 = vshrl.u32 %v5431_v52, 16  ;;  %v5532_v28 = vrot.slane %v5530_v7, 5 }
 0x447   : > { %v5580_v52 = vrot.slane %v5578_v4, 4  ;;  %v5437_v4 = vld [vmem:[#allocation2 + $0xe8] sm:$0x1f] }
 0x448   : > { %v5491_v27 = vsel %vm2419_vm2, %v5482_v36, %v5490_v58  ;;  %v5433_v36 = vld [vmem:[#allocation2 + $0xa8] sm:$0x1f] }
 0x44a   : > { %8441 = vmatmul.mubr.bf16.gmra.mrb[24].mxu0 %v5144_v40  ;;  %v5496_v40 = vshll.u32 %v10588_v49, 16  ;;  %v5520_v49 = vrot.slane %v5518_v16, 4  ;;  %v5554_v16 = vrot.slane %v5552_v13, 4  ;;  %v5595_v13 = vshrl.u32 %v10619_v42, 16 }
 0x44b   : > { %8444 = vmatprep.mubr.bf16.mxu0 %v5147_v3  ;;  %v5513_v3 = vshll.u32 %v10591_v0, 16  ;;  %v5527_v0 = vshrl.u32 %v10599_v34, 16 }
 0x44c   : > { %v5498_v20 = vrot.slane %v5496_v40, 5  ;;  %v5540_v40 = vrot.slane %v5538_v21, 5  ;;  %v5574_v21 = vrot.slane %v5572_v22, 5 }
 0x44d   : > { %v5515_v10 = vrot.slane %v5513_v3, 5  ;;  %v5529_v57 = vrot.slane %v5527_v0, 4  ;;  %v5549_v3 = vrot.slane %v5547_v46, 5 }
 0x44e   : > { %v5499_v5 = vor.u32 %v5498_v20, %v5495_v1  ;;  %v5564_v1 = vshll.u32 %v10609_v59, 16  ;;  %v5569_v20 = vshrl.u32 %v5432_v53, 16 }
 0x44f   : > { %v5516_v30 = vor.u32 %v5515_v10, %v5512_v48  ;;  %v5533_v58 = vor.u32 %v5532_v28, %v5529_v57  ;;  %v5586_v48 = vshrl.u32 %v5433_v36, 16  ;;  %v5589_v10 = vshll.u32 %v5433_v36, 16 }
 0x450   : > { %v5508_v37 = vsel %vm2419_vm2, %v5499_v5, %v5507_v32  ;;  %v5566_v7 = vrot.slane %v5564_v1, 5  ;;  %v5600_v36 = vrot.slane %v5598_v39, 5  ;;  %v5438_v39 = vld [vmem:[#allocation2 + $0xf8] sm:$0x1f] }
 0x451   : > { %v5588_v32 = vrot.slane %v5586_v48, 4 }
 0x452   : > { %8445 = vmatmul.mubr.bf16.gmra.mrb[28].mxu0 %v5150_v24  ;;  %v5535_v24 = vshrl.u32 %v5430_v18, 16  ;;  %v5581_v18 = vshll.u32 %v10611_v60, 16  ;;  %v5435_v60 = vld [vmem:[#allocation2 + $0xc8] sm:$0x1f] }
 0x453   : > { %8464 = vmatprep.mubr.bf16.mxu0 %v5457_v8  ;;  %v5524_v8 = vor.u32 %v5523_v35, %v5520_v49  ;;  %v5550_v49 = vor.u32 %v5549_v3, %v5546_v61  ;;  %v5558_v35 = vor.u32 %v5557_v62, %v5554_v16  ;;  %v5620_v53 = vshrl.u32 %v5435_v60, 16 }
 0x454   : > { %v5537_v56 = vrot.slane %v5535_v24, 4  ;;  %v5571_v24 = vrot.slane %v5569_v20, 4  ;;  %v5583_v5 = vrot.slane %v5581_v18, 5  ;;  %v5623_v61 = vshll.u32 %v5435_v60, 16 }
 0x455   : > { %v5525_v34 = vsel %vm2419_vm2, %v5516_v30, %v5524_v8  ;;  %v5559_v30 = vsel %vm2419_vm2, %v5550_v49, %v5558_v35  ;;  %v5434_v8 = vld [vmem:[#allocation2 + $0xb8] sm:$0x1f]  ;;  %v5597_v16 = vrot.slane %v5595_v13, 4  ;;  %v5622_v20 = vrot.slane %v5620_v53, 4 }
 0x456   : > { %v5541_v2 = vor.u32 %v5540_v40, %v5537_v56  ;;  %v5575_v46 = vor.u32 %v5574_v21, %v5571_v24  ;;  %v5584_v57 = vor.u32 %v5583_v5, %v5580_v52  ;;  %v5603_v56 = vshrl.u32 %v5434_v8, 16 }
 0x457   : > { %v5606_v40 = vshll.u32 %v5434_v8, 16  ;;  %v5625_v22 = vrot.slane %v5623_v61, 5  ;;  %v5632_v18 = vshll.u32 %v10629_v41, 16  ;;  %v5601_v49 = vor.u32 %v5600_v36, %v5597_v16 }
 0x458   : > { %v5654_v21 = vshrl.u32 %v5437_v4, 16  ;;  %v5657_v52 = vshll.u32 %v5437_v4, 16  ;;  %v5674_v53 = vshll.u32 %v5438_v39, 16  ;;  %v5680_v61 = vshrl.u32 %v10641_v54, 16 }
 0x459   : > { %v5626_v24 = vor.u32 %v5625_v22, %v5622_v20  ;;  %v5683_v16 = vshll.u32 %v10641_v54, 16  ;;  %v5700_v54 = vshll.u32 %v10649_v26, 16 }
 0x45a   : > { %8465 = vmatmul.mubr.bf16.vlgmr.msra.gmra.mrb[0].mxu0 %v5474_v47  ;;  %v5561_v47 = vshrl.u32 %v10609_v59, 16  ;;  %v5591_v59 = vrot.slane %v5589_v10, 5  ;;  %v5659_v13 = vrot.slane %v5657_v52, 5  ;;  %v5676_v20 = vrot.slane %v5674_v53, 5 }
 0x45b   : > { %8468 = vmatprep.mubr.bf16.mxu0 %v5491_v27  ;;  %v5542_v27 = vsel %vm2419_vm2, %v5533_v58, %v5541_v2  ;;  %v5605_v58 = vrot.slane %v5603_v56, 4  ;;  %v5608_v2 = vrot.slane %v5606_v40, 5  ;;  %v5663_v56 = vshrl.u32 %v10639_v50, 16 }
 0x45c   : > { %v5563_v0 = vrot.slane %v5561_v47, 4  ;;  %v5592_v28 = vor.u32 %v5591_v59, %v5588_v32  ;;  %v5436_v47 = vld [vmem:[#allocation2 + $0xd8] sm:$0x1f]  ;;  %v5634_v32 = vrot.slane %v5632_v18, 5  ;;  %v5666_v40 = vshll.u32 %v10639_v50, 16 }
 0x45d   : > { %v5637_v48 = vshrl.u32 %v5436_v47, 16  ;;  %v5640_v10 = vshll.u32 %v5436_v47, 16  ;;  %v5609_v35 = vor.u32 %v5608_v2, %v5605_v58  ;;  %v5665_v2 = vrot.slane %v5663_v56, 4  ;;  %v5440_v47 = vld [vmem:[#allocation2 + $0x118] sm:$0x1f] }
 0x45e   : > { %v5567_v33 = vor.u32 %v5566_v7, %v5563_v0  ;;  %v5593_v62 = vsel %vm2419_vm2, %v5584_v57, %v5592_v28  ;;  %v5649_v0 = vshll.u32 %v10631_v51, 16  ;;  %v5682_v22 = vrot.slane %v5680_v61, 4 }
 0x45f   : > { %v5639_v59 = vrot.slane %v5637_v48, 4  ;;  %v5610_v8 = vsel %vm2419_vm2, %v5601_v49, %v5609_v35  ;;  %v5685_v4 = vrot.slane %v5683_v16, 5  ;;  %v5697_v48 = vshrl.u32 %v10649_v26, 16 }
 0x460   : > { %v5576_v3 = vsel %vm2419_vm2, %v5567_v33, %v5575_v46  ;;  %v5656_v46 = vrot.slane %v5654_v21, 4  ;;  %v5708_v49 = vshll.u32 %v5440_v47, 16  ;;  %v5702_v21 = vrot.slane %v5700_v54, 5  ;;  %v9114_v54 = vld [vmem:[#allocation12 + $0x4c] ss:$16 sps:$4 sm:$0xff]  }
 0x462   : > { %8469 = vmatmul.mubr.bf16.gmra.mrb[4].mxu0 %v5508_v37  ;;  %v5612_v37 = vshrl.u32 %v10621_v43, 16 }
 0x463   : > { %8472 = vmatprep.mubr.bf16.mxu0 %v5525_v34  ;;  %v5615_v34 = vshll.u32 %v10621_v43, 16  ;;  %v5629_v43 = vshrl.u32 %v10629_v41, 16  ;;  %v5651_v41 = vrot.slane %v5649_v0, 5  ;;  %v5686_v0 = vor.u32 %v5685_v4, %v5682_v22 }
 0x464   : > { %v5614_v42 = vrot.slane %v5612_v37, 4 }
 0x465   : > { %v5617_v1 = vrot.slane %v5615_v34, 5  ;;  %v5631_v5 = vrot.slane %v5629_v43, 4  ;;  %v5671_v34 = vshrl.u32 %v5438_v39, 16  ;;  %v10702_v39 = vld [vmem:[#allocation11] ss:$0 sm:$0xff] }
 0x467   : > { %v5618_v7 = vor.u32 %v5617_v1, %v5614_v42  ;;  %v5635_v57 = vor.u32 %v5634_v32, %v5631_v5  ;;  %v5668_v42 = vrot.slane %v5666_v40, 5  ;;  %v5673_v1 = vrot.slane %v5671_v34, 4 }
 0x468   : > { %v5710_v5 = vrot.slane %v5708_v49, 5 }
 0x469   : > { %v5627_v33 = vsel %vm2419_vm2, %v5618_v7, %v5626_v24  ;;  %v5669_v35 = vor.u32 %v5668_v42, %v5665_v2  ;;  %v5699_v24 = vrot.slane %v5697_v48, 4  ;;  %v9111_v42 = vld [vmem:[#allocation12 + $0x2c] ss:$16 sps:$4 sm:$0xff]  }
 0x46a   : > { %8473 = vmatmul.mubr.bf16.gmra.mrb[8].mxu0 %v5542_v27  ;;  %v5646_v27 = vshrl.u32 %v10631_v51, 16  ;;  %v5439_v51 = vld [vmem:[#allocation2 + $0x108] sm:$0x1f] }
 0x46b   : > { %8476 = vmatprep.mubr.bf16.mxu0 %v5559_v30  ;;  %v5642_v30 = vrot.slane %v5640_v10, 5  ;;  %v5691_v36 = vshll.u32 %v5439_v51, 16  ;;  %v5705_v10 = vshrl.u32 %v5440_v47, 16 }
 0x46c   : > { %v5648_v60 = vrot.slane %v5646_v27, 4  ;;  %v5677_v27 = vor.u32 %v5676_v20, %v5673_v1 }
 0x46d   : > { %v5643_v28 = vor.u32 %v5642_v30, %v5639_v59  ;;  %v5693_v18 = vrot.slane %v5691_v36, 5  ;;  %v5707_v52 = vrot.slane %v5705_v10, 4  ;;  %v5703_v30 = vor.u32 %v5702_v21, %v5699_v24 }
 0x46e   : > { %v5652_v37 = vor.u32 %v5651_v41, %v5648_v60  ;;  %v5678_v32 = vsel %vm2419_vm2, %v5669_v35, %v5677_v27  ;;  %v9100_v60 = vld [vmem:[#allocation12 + $0xc0] ss:$16 sps:$4 sm:$0xff]   ;;  %v9102_v41 = vld [vmem:[#allocation12 + $0xc4] ss:$16 sps:$4 sm:$0xff]  }
 0x46f   : > { %v5644_v58 = vsel %vm2419_vm2, %v5635_v57, %v5643_v28  ;;  %6492 = vmatprep.subr.bf16.mxu1 %v9102_v41 }
 0x470   : > { %6493 = vmatpush1.bf16.msra.mxu1 %v9100_v60  ;;  %v9115_v60 = vld [vmem:[#allocation12 + $0x68] ss:$16 sps:$4 sm:$0xff]  }
 0x472   : > { %8477 = vmatmul.mubr.bf16.gmra.mrb[12].mxu0 %v5576_v3  ;;  %v5660_v3 = vor.u32 %v5659_v13, %v5656_v46  ;;  %v9103_v46 = vld [vmem:[#allocation12 + $0xe0] ss:$16 sps:$4 sm:$0xff]   ;;  %v9108_v13 = vld [vmem:[#allocation12 + $0xc] ss:$16 sps:$4 sm:$0xff]  }
 0x473   : > { %8480 = vmatprep.mubr.bf16.mxu0 %v5593_v62  ;;  %v5688_v62 = vshrl.u32 %v5439_v51, 16 }
 0x474   : > { %v5661_v50 = vsel %vm2419_vm2, %v5652_v37, %v5660_v3 }
 0x475   : > { %v5690_v43 = vrot.slane %v5688_v62, 4 }
 0x477   : > { %v5694_v7 = vor.u32 %v5693_v18, %v5690_v43  ;;  %v9109_v18 = vld [vmem:[#allocation12 + $0x28] ss:$16 sps:$4 sm:$0xff]  }
 0x479   : > { %v5695_v59 = vsel %vm2419_vm2, %v5686_v0, %v5694_v7  ;;  %v9112_v7 = vld [vmem:[#allocation12 + $0x48] ss:$16 sps:$4 sm:$0xff]  }
 0x47a   : > { %8481 = vmatmul.mubr.bf16.gmra.mrb[16].mxu0 %v5610_v8  ;;  %v5711_v8 = vor.u32 %v5710_v5, %v5707_v52  ;;  %v9117_v52 = vld [vmem:[#allocation12 + $0x6c] ss:$16 sps:$4 sm:$0xff]  }
 0x47b   : > { %8484 = vmatprep.mubr.bf16.mxu0 %v5627_v33  ;;  %v9105_v33 = vld [vmem:[#allocation12 + $0xe4] ss:$16 sps:$4 sm:$0xff]  }
 0x47c   : > { %v5712_v26 = vsel %vm2419_vm2, %v5703_v30, %v5711_v8  ;;  %6494 = vmatprep.subr.bf16.mxu1 %v9105_v33  ;;  %v9120_v33 = vld [vmem:[#allocation12 + $0x8c] ss:$16 sps:$4 sm:$0xff]  }
 0x47d   : > { %6495 = vmatpush1.bf16.msra.mxu1 %v9103_v46 }
 0x47e   : > { %6673 = vmatprep.subr.bf16.mxu1 %v9108_v13 }
 0x482   : > { %8485 = vmatmul.mubr.bf16.gmra.mrb[20].mxu0 %v5644_v58  ;;  %v9106_v58 = vld [vmem:[#allocation12 + $0x8] ss:$16 sps:$4 sm:$0xff]  }
 0x483   : > { %8488 = vmatprep.mubr.bf16.mxu0 %v5661_v50 }
 0x48a   : > { %8489 = vmatmul.mubr.bf16.gmra.mrb[24].mxu0 %v5678_v32 }
 0x48b   : > { %8492 = vmatprep.mubr.bf16.mxu0 %v5695_v59 }
 0x492   : > { %8493 = vmatmul.mubr.bf16.gmra.mrb[28].mxu0 %v5712_v26 }
 0x52d   : > { %v8466_v51 = vpop.f32.mrb[0].mxu0 }
 0x52e   : > { %v5996_v57 = vadd.f32 %v8466_v51, %v10702_v39  ;;  %v5828_v28 = vpop.f32.mrb[1].mxu0 }
 0x52f   : > { %v5994_v56 = vadd.f32 %v10702_v39, %v5828_v28  ;;  %v8467_v40 = vpop.f32.mrb[2].mxu0 }
 0x530   : > { %v5997_v37 = vadd.f32 %v8467_v40, %v10702_v39  ;;  %v5831_v34 = vpop.f32.mrb[3].mxu0  ;;  %v6028_v61 = vmax.f32 %v5996_v57, 0.0 }
 0x531   : > { %v5995_v53 = vadd.f32 %v10702_v39, %v5831_v34  ;;  %v6026_v16 = vmax.f32 %v5994_v56, 0.0  ;;  %v9118_v56 = vld [vmem:[#allocation12 + $0x88] ss:$16 sps:$4 sm:$0xff]   ;;  %v9123_v34 = vld [vmem:[#allocation12 + $0xac] ss:$16 sps:$4 sm:$0xff]  }
 0x532   : > { %v6029_v3 = vmax.f32 %v5997_v37, 0.0 }
 0x533   : > { %v6027_v62 = vmax.f32 %v5995_v53, 0.0 }
 0x534   : > { %v10708_v36 = vpack.c.bf16 %v6029_v3, %v6028_v61 }
 0x535   : > { %v10710_v2 = vpack.c.bf16 %v6027_v62, %v6026_v16  ;;  %v8470_v47 = vpop.f32.mrb[4].mxu0 }
 0x536   : > { %v6000_v1 = vadd.f32 %v8470_v47, %v10702_v39  ;;  %v5844_v20 = vpop.f32.mrb[5].mxu0  ;;  %v9121_v47 = vld [vmem:[#allocation12 + $0xa8] ss:$16 sps:$4 sm:$0xff]  }
 0x537   : > { %v5998_v22 = vadd.f32 %v10702_v39, %v5844_v20  ;;  %v8471_v50 = vpop.f32.mrb[6].mxu0  ;;  %6513 = vmatmul.mubr.bf16.vlgmr.msra.gmra.mrb[144].mxu1 %v10710_v2 }
 0x538   : > { %v6001_v4 = vadd.f32 %v8471_v50, %v10702_v39  ;;  %v5847_v43 = vpop.f32.mrb[7].mxu0  ;;  %6674 = vmatpush1.bf16.msra.mxu1 %v9106_v58  ;;  %6522 = vmatprep.mubr.bf16.mxu1 %v9423_v45  ;;  %v6032_v10 = vmax.f32 %v6000_v1, 0.0  ;;  %v9126_v1 = vld [vmem:[#allocation12 + $0xcc] ss:$16 sps:$4 sm:$0xff]  }
 0x539   : > { %v5999_v48 = vadd.f32 %v10702_v39, %v5847_v43  ;;  %6675 = vmatprep.subr.bf16.mxu1 %v9111_v42  ;;  %v6030_v35 = vmax.f32 %v5998_v22, 0.0 }
 0x53a   : > { %v6033_v49 = vmax.f32 %v6001_v4, 0.0 }
 0x53b   : > { %v6031_v27 = vmax.f32 %v5999_v48, 0.0 }
 0x53c   : > { %v10718_v0 = vpack.c.bf16 %v6033_v49, %v6032_v10  ;;  %6676 = vmatpush1.bf16.msra.mxu1 %v9109_v18  ;;  %v9124_v18 = vld [vmem:[#allocation12 + $0xc8] ss:$16 sps:$4 sm:$0xff]   ;;  %v9129_v10 = vld [vmem:[#allocation12 + $0xec] ss:$16 sps:$4 sm:$0xff]  }
 0x53d   : > { %v10720_v24 = vpack.c.bf16 %v6031_v27, %v6030_v35  ;;  %v8474_v21 = vpop.f32.mrb[8].mxu0  ;;  %6677 = vmatprep.subr.bf16.mxu1 %v9114_v54 }
 0x53e   : > { %v6004_v5 = vadd.f32 %v8474_v21, %v10702_v39  ;;  %v5860_v32 = vpop.f32.mrb[9].mxu0 }
 0x53f   : > { %v6002_v59 = vadd.f32 %v10702_v39, %v5860_v32  ;;  %v8475_v30 = vpop.f32.mrb[10].mxu0  ;;  %6523 = vmatmul.mubr.bf16.gmra.mrb[148].mxu1 %v10708_v36  ;;  %v9127_v32 = vld [vmem:[#allocation12 + $0xe8] ss:$16 sps:$4 sm:$0xff]  }
 0x540   : > { %v6005_v8 = vadd.f32 %v8475_v30, %v10702_v39  ;;  %v5863_v26 = vpop.f32.mrb[11].mxu0  ;;  %6532 = vmatprep.mubr.bf16.mxu1 %v9423_v45  ;;  %6678 = vmatpush1.bf16.msra.mxu1 %v9112_v7  ;;  %v6036_v46 = vmax.f32 %v6004_v5, 0.0 }
 0x541   : > { %v6003_v41 = vadd.f32 %v10702_v39, %v5863_v26  ;;  %6679 = vmatprep.subr.bf16.mxu1 %v9117_v52  ;;  %v6034_v51 = vmax.f32 %v6002_v59, 0.0 }
 0x542   : > { %v6037_v13 = vmax.f32 %v6005_v8, 0.0 }
 0x543   : > { %v6035_v57 = vmax.f32 %v6003_v41, 0.0 }
 0x544   : > { %v10728_v28 = vpack.c.bf16 %v6037_v13, %v6036_v46  ;;  %6680 = vmatpush1.bf16.msra.mxu1 %v9115_v60 }
 0x545   : > { %v10730_v40 = vpack.c.bf16 %v6035_v57, %v6034_v51  ;;  %v8478_v37 = vpop.f32.mrb[12].mxu0  ;;  %6681 = vmatprep.subr.bf16.mxu1 %v9120_v33 }
 0x546   : > { %v6008_v53 = vadd.f32 %v8478_v37, %v10702_v39  ;;  %v5876_v61 = vpop.f32.mrb[13].mxu0 }
 0x547   : > { %v6006_v3 = vadd.f32 %v10702_v39, %v5876_v61  ;;  %v8479_v16 = vpop.f32.mrb[14].mxu0  ;;  %6533 = vmatmul.mubr.bf16.gmra.mrb[152].mxu1 %v10720_v24 }
 0x548   : > { %v6009_v62 = vadd.f32 %v8479_v16, %v10702_v39  ;;  %v5879_v58 = vpop.f32.mrb[15].mxu0  ;;  %6542 = vmatprep.mubr.bf16.mxu1 %v9423_v45  ;;  %6682 = vmatpush1.bf16.msra.mxu1 %v9118_v56  ;;  %v6040_v20 = vmax.f32 %v6008_v53, 0.0 }
 0x549   : > { %v6007_v42 = vadd.f32 %v10702_v39, %v5879_v58  ;;  %6683 = vmatprep.subr.bf16.mxu1 %v9123_v34  ;;  %v6038_v50 = vmax.f32 %v6006_v3, 0.0 }
 0x54a   : > { %v6041_v22 = vmax.f32 %v6009_v62, 0.0 }
 0x54b   : > { %v6039_v4 = vmax.f32 %v6007_v42, 0.0 }
 0x54c   : > { %v10738_v43 = vpack.c.bf16 %v6041_v22, %v6040_v20  ;;  %6684 = vmatpush1.bf16.msra.mxu1 %v9121_v47 }
 0x54d   : > { %v10740_v48 = vpack.c.bf16 %v6039_v4, %v6038_v50  ;;  %v8482_v54 = vpop.f32.mrb[16].mxu0  ;;  %6685 = vmatprep.subr.bf16.mxu1 %v9126_v1 }
 0x54e   : > { %v8512_v49 = vadd.f32 %v8482_v54, %v10365_v19  ;;  %v5892_v35 = vpop.f32.mrb[17].mxu0 }
 0x54f   : > { %v8513_v27 = vadd.f32 %v5892_v35, %v10367_v14  ;;  %v8483_v7 = vpop.f32.mrb[18].mxu0  ;;  %6543 = vmatmul.mubr.bf16.gmra.mrb[156].mxu1 %v10718_v0 }
 0x550   : > { %v6012_v21 = vadd.f32 %v8512_v49, %v10702_v39  ;;  %v8514_v52 = vadd.f32 %v8483_v7, %v10370_v17  ;;  %v5895_v5 = vpop.f32.mrb[19].mxu0  ;;  %6552 = vmatprep.mubr.bf16.mxu1 %v9423_v45  ;;  %6686 = vmatpush1.bf16.msra.mxu1 %v9124_v18 }
 0x551   : > { %v6010_v59 = vadd.f32 %v8513_v27, %v10702_v39  ;;  %v8515_v30 = vadd.f32 %v5895_v5, %v10375_v38  ;;  %6687 = vmatprep.subr.bf16.mxu1 %v9129_v10 }
 0x552   : > { %v6013_v19 = vadd.f32 %v8514_v52, %v10702_v39  ;;  %v6044_v8 = vmax.f32 %v6012_v21, 0.0 }
 0x553   : > { %v6011_v14 = vadd.f32 %v8515_v30, %v10702_v39  ;;  %v6042_v60 = vmax.f32 %v6010_v59, 0.0 }
 0x554   : > { %v6045_v26 = vmax.f32 %v6013_v19, 0.0  ;;  %6688 = vmatpush1.bf16.msra.mxu1 %v9127_v32 }
 0x555   : > { %v6043_v41 = vmax.f32 %v6011_v14, 0.0  ;;  %v8486_v17 = vpop.f32.mrb[20].mxu0 }
 0x556   : > { %v8516_v33 = vadd.f32 %v8486_v17, %v10396_v25  ;;  %v5908_v46 = vpop.f32.mrb[21].mxu0  ;;  %v10753_v13 = vpack.c.bf16 %v6045_v26, %v6044_v8 }
 0x557   : > { %v8517_v51 = vadd.f32 %v5908_v46, %v10398_v6  ;;  %v8487_v57 = vpop.f32.mrb[22].mxu0  ;;  %6553 = vmatmul.mubr.bf16.gmra.mrb[160].mxu1 %v10730_v40  ;;  %v10757_v38 = vpack.c.bf16 %v6043_v41, %v6042_v60 }
 0x558   : > { %v6016_v56 = vadd.f32 %v8516_v33, %v10702_v39  ;;  %v8518_v37 = vadd.f32 %v8487_v57, %v10401_v9  ;;  %v5911_v34 = vpop.f32.mrb[23].mxu0  ;;  %6562 = vmatprep.mubr.bf16.mxu1 %v9423_v45 }
 0x559   : > { %v6014_v53 = vadd.f32 %v8517_v51, %v10702_v39  ;;  %v8519_v25 = vadd.f32 %v5911_v34, %v10406_v12 }
 0x55a   : > { %v6017_v61 = vadd.f32 %v8518_v37, %v10702_v39  ;;  %v6048_v3 = vmax.f32 %v6016_v56, 0.0 }
 0x55b   : > { %v6015_v6 = vadd.f32 %v8519_v25, %v10702_v39  ;;  %v6046_v62 = vmax.f32 %v6014_v53, 0.0 }
 0x55c   : > { %v6049_v16 = vmax.f32 %v6017_v61, 0.0 }
 0x55d   : > { %v6047_v58 = vmax.f32 %v6015_v6, 0.0  ;;  %v8490_v47 = vpop.f32.mrb[24].mxu0 }
 0x55e   : > { %v8520_v42 = vadd.f32 %v8490_v47, %v10426_v11  ;;  %v5924_v1 = vpop.f32.mrb[25].mxu0  ;;  %v10767_v9 = vpack.c.bf16 %v6049_v16, %v6048_v3 }
 0x55f   : > { %v8521_v20 = vadd.f32 %v5924_v1, %v10429_v63  ;;  %v8491_v22 = vpop.f32.mrb[26].mxu0  ;;  %6563 = vmatmul.mubr.bf16.gmra.mrb[164].mxu1 %v10728_v28  ;;  %v10771_v12 = vpack.c.bf16 %v6047_v58, %v6046_v62  ;;  %v6110_v62 = vld [vmem:[%s9731_s12 + $0x20] sm:$0xff] }
 0x560   : > { %v6020_v50 = vadd.f32 %v8520_v42, %v10702_v39  ;;  %v8522_v4 = vadd.f32 %v8491_v22, %v10431_v55  ;;  %v5927_v18 = vpop.f32.mrb[27].mxu0  ;;  %6572 = vmatprep.mubr.bf16.mxu1 %v9423_v45 }
 0x561   : > { %v6018_v54 = vadd.f32 %v8521_v20, %v10702_v39  ;;  %v8523_v11 = vadd.f32 %v5927_v18, %v10434_v23  ;;  %v6112_v20 = vld [vmem:[%s9731_s12 + $0x30] sm:$0xff]  ;;  %v6179_v18 = vunpack.c.h.bf16 %v6110_v62 }
 0x562   : > { %v6021_v10 = vadd.f32 %v8522_v4, %v10702_v39  ;;  %v6052_v49 = vmax.f32 %v6020_v50, 0.0 }
 0x563   : > { %v6019_v63 = vadd.f32 %v8523_v11, %v10702_v39  ;;  %v6050_v27 = vmax.f32 %v6018_v54, 0.0  ;;  %v6182_v11 = vunpack.c.l.bf16 %v6112_v20 }
 0x564   : > { %v6053_v35 = vmax.f32 %v6021_v10, 0.0 }
 0x565   : > { %v6051_v7 = vmax.f32 %v6019_v63, 0.0  ;;  %v8494_v21 = vpop.f32.mrb[28].mxu0 }
 0x566   : > { %v8524_v52 = vadd.f32 %v8494_v21, %v10447_v31  ;;  %v5940_v5 = vpop.f32.mrb[29].mxu0  ;;  %v10781_v55 = vpack.c.bf16 %v6053_v35, %v6052_v49  ;;  %v6183_v49 = vunpack.c.h.bf16 %v6112_v20 }
 0x567   : > { %v8525_v32 = vadd.f32 %v5940_v5, %v10450_v29  ;;  %v8495_v59 = vpop.f32.mrb[30].mxu0  ;;  %6573 = vmatmul.mubr.bf16.gmra.mrb[168].mxu1 %v10740_v48  ;;  %v10785_v23 = vpack.c.bf16 %v6051_v7, %v6050_v27  ;;  %v6114_v5 = vld [vmem:[%s9731_s12 + $0x40] sm:$0xff] }
 0x568   : > { %v6024_v30 = vadd.f32 %v8524_v52, %v10702_v39  ;;  %v8526_v19 = vadd.f32 %v8495_v59, %v10452_v15  ;;  %v5943_v14 = vpop.f32.mrb[31].mxu0  ;;  %6582 = vmatprep.mubr.bf16.mxu1 %v9423_v45 }
 0x569   : > { %v6022_v8 = vadd.f32 %v8525_v32, %v10702_v39  ;;  %v8527_v31 = vadd.f32 %v5943_v14, %v10455_v44  ;;  %v6300_v44 = vlaneseq  ;;  %v6116_v14 = vld [vmem:[%s9731_s12 + $0x50] sm:$0xff] }
 0x56a   : > { %v6025_v26 = vadd.f32 %v8526_v19, %v10702_v39  ;;  %v6056_v60 = vmax.f32 %v6024_v30, 0.0 }
 0x56b   : > { %v6023_v29 = vadd.f32 %v8527_v31, %v10702_v39  ;;  %v6054_v17 = vmax.f32 %v6022_v8, 0.0  ;;  %v10835_v39 = vshrl.u32 %v6300_v44, 7  ;;  %v6186_v31 = vunpack.c.l.bf16 %v6114_v5 }
 0x56c   : > { %v6057_v41 = vmax.f32 %v6025_v26, 0.0 }
 0x56d   : > { %v6055_v33 = vmax.f32 %v6023_v29, 0.0 }
 0x56e   : > { %v10794_v46 = vpack.c.bf16 %v6057_v41, %v6056_v60  ;;  %v6187_v60 = vunpack.c.h.bf16 %v6114_v5 }
 0x56f   : > { %6583 = vmatmul.mubr.bf16.gmra.mrb[172].mxu1 %v10738_v43  ;;  %v10797_v15 = vpack.c.bf16 %v6055_v33, %v6054_v17  ;;  %v6190_v33 = vunpack.c.l.bf16 %v6116_v14 }
 0x570   : > { %6592 = vmatprep.mubr.bf16.mxu1 %v9423_v45 }
 0x577   : > { %6593 = vmatmul.mubr.bf16.gmra.mrb[176].mxu1 %v10757_v38 }
 0x578   : > { %6602 = vmatprep.mubr.bf16.mxu1 %v9423_v45 }
 0x57f   : > { %6603 = vmatmul.mubr.bf16.gmra.mrb[180].mxu1 %v10753_v13 }
 0x580   : > { %6612 = vmatprep.mubr.bf16.mxu1 %v9423_v45 }
 0x587   : > { %6613 = vmatmul.mubr.bf16.gmra.mrb[184].mxu1 %v10771_v12 }
 0x588   : > { %6622 = vmatprep.mubr.bf16.mxu1 %v9423_v45 }
 0x58f   : > { %6623 = vmatmul.mubr.bf16.gmra.mrb[188].mxu1 %v10767_v9 }
 0x590   : > { %6632 = vmatprep.mubr.bf16.mxu1 %v9423_v45 }
 0x597   : > { %6633 = vmatmul.mubr.bf16.gmra.mrb[192].mxu1 %v10785_v23 }
 0x598   : > { %6642 = vmatprep.mubr.bf16.mxu1 %v9423_v45 }
 0x59f   : > { %6643 = vmatmul.mubr.bf16.gmra.mrb[196].mxu1 %v10781_v55 }
 0x5a0   : > { %6652 = vmatprep.mubr.bf16.mxu1 %v9423_v45 }
 0x5a7   : > { %6653 = vmatmul.mubr.bf16.gmra.mrb[200].mxu1 %v10797_v15 }
 0x5a8   : > { %6662 = vmatprep.mubr.bf16.mxu1 %v9423_v45 }
 0x5af   : > { %6663 = vmatmul.mubr.bf16.gmra.mrb[204].mxu1 %v10794_v46 }
 0x5b0   : > { %6705 = vmatprep.mubr.bf16.mxu1 %v9423_v45 }
 0x5b7   : > { %6706 = vmatmul.mubr.bf16.vlgmr.msra.gmra.mrb[208].mxu1 %v10710_v2  ;;  %v10839_v2 = vld [vmem:[#allocation14] sm:$0xf] }
 0x5b8   : > { %6715 = vmatprep.mubr.bf16.mxu1 %v9423_v45 }
 0x5bf   : > { %6716 = vmatmul.mubr.bf16.gmra.mrb[212].mxu1 %v10708_v36  ;;  %v6302_v36 = vsub.s32 0, %v10835_v39 }
 0x5c0   : > { %6725 = vmatprep.mubr.bf16.mxu1 %v9423_v45 }
 0x5c7   : > { %6726 = vmatmul.mubr.bf16.gmra.mrb[216].mxu1 %v10720_v24  ;;  %v6106_v24 = vld [vmem:[%s9731_s12] sm:$0xff] }
 0x5c8   : > { %6735 = vmatprep.mubr.bf16.mxu1 %v9423_v45  ;;  %v6171_v51 = vunpack.c.h.bf16 %v6106_v24 }
 0x5cf   : > { %6736 = vmatmul.mubr.bf16.gmra.mrb[220].mxu1 %v10718_v0  ;;  %v6306_v0 = vsub.s32 1, %v10835_v39 }
 0x5d0   : > { %6745 = vmatprep.mubr.bf16.mxu1 %v9423_v45 }
 0x5d7   : > { %6746 = vmatmul.mubr.bf16.gmra.mrb[224].mxu1 %v10730_v40  ;;  %v10848_v40 = vrot.slane %v10839_v2, %v6306_v0 }
 0x5d8   : > { %6755 = vmatprep.mubr.bf16.mxu1 %v9423_v45 }
 0x5df   : > { %6756 = vmatmul.mubr.bf16.gmra.mrb[228].mxu1 %v10728_v28  ;;  %v10845_v28 = vrot.slane %v10839_v2, %v6302_v36  ;;  %v6191_v36 = vunpack.c.h.bf16 %v6116_v14 }
 0x5e0   : > { %6765 = vmatprep.mubr.bf16.mxu1 %v9423_v45 }
 0x5e7   : > { %6766 = vmatmul.mubr.bf16.gmra.mrb[232].mxu1 %v10740_v48  ;;  %v6170_v48 = vunpack.c.l.bf16 %v6106_v24 }
 0x5e8   : > { %6775 = vmatprep.mubr.bf16.mxu1 %v9423_v45 }
 0x5ef   : > { %6776 = vmatmul.mubr.bf16.gmra.mrb[236].mxu1 %v10738_v43  ;;  %v6108_v43 = vld [vmem:[%s9731_s12 + $0x10] sm:$0xff] }
 0x5f0   : > { %6785 = vmatprep.mubr.bf16.mxu1 %v9423_v45  ;;  %v6174_v56 = vunpack.c.l.bf16 %v6108_v43  ;;  %v6175_v53 = vunpack.c.h.bf16 %v6108_v43 }
 0x5f7   : > { %6786 = vmatmul.mubr.bf16.gmra.mrb[240].mxu1 %v10757_v38 }
 0x5f8   : > { %6795 = vmatprep.mubr.bf16.mxu1 %v9423_v45 }
 0x5ff   : > { %6796 = vmatmul.mubr.bf16.gmra.mrb[244].mxu1 %v10753_v13 }
 0x600   : > { %6805 = vmatprep.mubr.bf16.mxu1 %v9423_v45 }
 0x607   : > { %6806 = vmatmul.mubr.bf16.gmra.mrb[248].mxu1 %v10771_v12  ;;  %v6178_v12 = vunpack.c.l.bf16 %v6110_v62 }
 0x608   : > { %6815 = vmatprep.mubr.bf16.mxu1 %v9423_v45 }
 0x60a   : > { %v6514_v13 = vpop.f32.mrb[144].mxu1 }
 0x60b   : > { %v6515_v57 = vadd.f32 %v6514_v13, %v10845_v28  ;;  %v6516_v38 = vpop.f32.mrb[145].mxu1 }
 0x60c   : > { %v6517_v37 = vadd.f32 %v6516_v38, %v10848_v40  ;;  %v6518_v34 = vpop.f32.mrb[146].mxu1 }
 0x60d   : > { %v6866_v25 = vadd.f32 %v6515_v57, %v6170_v48  ;;  %v6519_v61 = vadd.f32 %v6518_v34, %v10845_v28  ;;  %v6520_v6 = vpop.f32.mrb[147].mxu1  ;;  %v6120_v34 = vld [vmem:[%s9731_s12 + $0x70] sm:$0xff] }
 0x60e   : > { %v6867_v3 = vadd.f32 %v6517_v37, %v6171_v51  ;;  %v6521_v16 = vadd.f32 %v6520_v6, %v10848_v40  ;;  %v6118_v51 = vld [vmem:[%s9731_s12 + $0x60] sm:$0xff] }
 0x60f   : > { %v6994_v58 = vmax.f32 %v6866_v25, 0.0  ;;  %v6870_v47 = vadd.f32 %v6519_v61, %v6174_v56  ;;  %6816 = vmatmul.mubr.bf16.gmra.mrb[252].mxu1 %v10767_v9  ;;  %v6194_v25 = vunpack.c.l.bf16 %v6118_v51 }
 0x610   : > { %v6995_v42 = vmax.f32 %v6867_v3, 0.0  ;;  %v6871_v1 = vadd.f32 %v6521_v16, %v6175_v53  ;;  %6825 = vmatprep.mubr.bf16.mxu1 %v9423_v45  ;;  %v6195_v3 = vunpack.c.h.bf16 %v6118_v51 }
 0x611   : > { %7122 = vst [vmem:[%s10861_s23] sm:$0xff] %v6994_v58  ;;  %v6998_v22 = vmax.f32 %v6870_v47, 0.0  ;;  %v6198_v58 = vunpack.c.l.bf16 %v6120_v34 }
 0x612   : > { %7123 = vst [vmem:[%s10861_s23 + $0x8] sm:$0xff] %v6995_v42  ;;  %v6999_v50 = vmax.f32 %v6871_v1, 0.0  ;;  %v6524_v4 = vpop.f32.mrb[148].mxu1  ;;  %v6199_v42 = vunpack.c.h.bf16 %v6120_v34 }
 0x613   : > { %7126 = vst [vmem:[%s10861_s23 + $0x20] sm:$0xff] %v6998_v22  ;;  %v6525_v9 = vadd.f32 %v6524_v4, %v10845_v28  ;;  %v6526_v54 = vpop.f32.mrb[149].mxu1  ;;  %v6122_v4 = vld [vmem:[%s9731_s12 + $0x80] sm:$0xff] }
 0x614   : > { %7127 = vst [vmem:[%s10861_s23 + $0x28] sm:$0xff] %v6999_v50  ;;  %v6527_v10 = vadd.f32 %v6526_v54, %v10848_v40  ;;  %v6528_v63 = vpop.f32.mrb[150].mxu1 }
 0x615   : > { %v6874_v35 = vadd.f32 %v6525_v9, %v6178_v12  ;;  %v6529_v27 = vadd.f32 %v6528_v63, %v10845_v28  ;;  %v6530_v7 = vpop.f32.mrb[151].mxu1 }
 0x616   : > { %v6875_v21 = vadd.f32 %v6527_v10, %v6179_v18  ;;  %v6531_v52 = vadd.f32 %v6530_v7, %v10848_v40  ;;  %v6124_v10 = vld [vmem:[%s9731_s12 + $0x90] sm:$0xff]  ;;  %v6203_v7 = vunpack.c.h.bf16 %v6122_v4 }
 0x617   : > { %v7002_v32 = vmax.f32 %v6874_v35, 0.0  ;;  %v6878_v59 = vadd.f32 %v6529_v27, %v6182_v11  ;;  %6826 = vmatmul.mubr.bf16.gmra.mrb[0].mxu1 %v10785_v23  ;;  %v6206_v5 = vunpack.c.l.bf16 %v6124_v10 }
 0x618   : > { %v7003_v30 = vmax.f32 %v6875_v21, 0.0  ;;  %v6879_v19 = vadd.f32 %v6531_v52, %v6183_v49  ;;  %6835 = vmatprep.mubr.bf16.mxu1 %v9423_v45  ;;  %v6202_v49 = vunpack.c.l.bf16 %v6122_v4 }
 0x619   : > { %7130 = vst [vmem:[%s10861_s23 + $0x40] sm:$0xff] %v7002_v32  ;;  %v7006_v8 = vmax.f32 %v6878_v59, 0.0 }
 0x61a   : > { %7131 = vst [vmem:[%s10861_s23 + $0x48] sm:$0xff] %v7003_v30  ;;  %v7007_v26 = vmax.f32 %v6879_v19, 0.0  ;;  %v6534_v29 = vpop.f32.mrb[152].mxu1 }
 0x61b   : > { %7134 = vst [vmem:[%s10861_s23 + $0x60] sm:$0xff] %v7006_v8  ;;  %v6535_v41 = vadd.f32 %v6534_v29, %v10845_v28  ;;  %v6536_v17 = vpop.f32.mrb[153].mxu1 }
 0x61c   : > { %7135 = vst [vmem:[%s10861_s23 + $0x68] sm:$0xff] %v7007_v26  ;;  %v6537_v23 = vadd.f32 %v6536_v17, %v10848_v40  ;;  %v6538_v44 = vpop.f32.mrb[154].mxu1  ;;  %v6128_v17 = vld [vmem:[%s9731_s12 + $0xb0] sm:$0xff] }
 0x61d   : > { %v6882_v0 = vadd.f32 %v6535_v41, %v6186_v31  ;;  %v6539_v24 = vadd.f32 %v6538_v44, %v10845_v28  ;;  %v6540_v43 = vpop.f32.mrb[155].mxu1  ;;  %v6126_v31 = vld [vmem:[%s9731_s12 + $0xa0] sm:$0xff]  ;;  %v6215_v51 = vunpack.c.h.bf16 %v6128_v17 }
 0x61e   : > { %v6883_v48 = vadd.f32 %v6537_v23, %v6187_v60  ;;  %v6541_v13 = vadd.f32 %v6540_v43, %v10848_v40  ;;  %v6210_v23 = vunpack.c.l.bf16 %v6126_v31 }
 0x61f   : > { %v7010_v57 = vmax.f32 %v6882_v0, 0.0  ;;  %v6886_v38 = vadd.f32 %v6539_v24, %v6190_v33  ;;  %6836 = vmatmul.mubr.bf16.gmra.mrb[4].mxu1 %v10781_v55  ;;  %v6211_v0 = vunpack.c.h.bf16 %v6126_v31 }
 0x620   : > { %v7011_v56 = vmax.f32 %v6883_v48, 0.0  ;;  %v6887_v37 = vadd.f32 %v6541_v13, %v6191_v36  ;;  %6845 = vmatprep.mubr.bf16.mxu1 %v9423_v45  ;;  %v6214_v48 = vunpack.c.l.bf16 %v6128_v17 }
 0x621   : > { %7138 = vst [vmem:[%s10861_s23 + $0x80] sm:$0xff] %v7010_v57  ;;  %v7014_v53 = vmax.f32 %v6886_v38, 0.0 }
 0x622   : > { %7139 = vst [vmem:[%s10861_s23 + $0x88] sm:$0xff] %v7011_v56  ;;  %v7015_v61 = vmax.f32 %v6887_v37, 0.0  ;;  %v6544_v6 = vpop.f32.mrb[156].mxu1 }
 0x623   : > { %7142 = vst [vmem:[%s10861_s23 + $0xa0] sm:$0xff] %v7014_v53  ;;  %v6545_v16 = vadd.f32 %v6544_v6, %v10845_v28  ;;  %v6546_v62 = vpop.f32.mrb[157].mxu1  ;;  %v6130_v53 = vld [vmem:[%s9731_s12 + $0xc0] sm:$0xff] }
 0x624   : > { %7143 = vst [vmem:[%s10861_s23 + $0xa8] sm:$0xff] %v7015_v61  ;;  %v6547_v55 = vadd.f32 %v6546_v62, %v10848_v40  ;;  %v6548_v47 = vpop.f32.mrb[158].mxu1 }
 0x625   : > { %v6890_v1 = vadd.f32 %v6545_v16, %v6194_v25  ;;  %v6549_v20 = vadd.f32 %v6548_v47, %v10845_v28  ;;  %v6550_v22 = vpop.f32.mrb[159].mxu1  ;;  %v6132_v16 = vld [vmem:[%s9731_s12 + $0xd0] sm:$0xff] }
 0x626   : > { %v6891_v12 = vadd.f32 %v6547_v55, %v6195_v3  ;;  %v6551_v50 = vadd.f32 %v6550_v22, %v10848_v40  ;;  %v6222_v22 = vunpack.c.l.bf16 %v6132_v16  ;;  %v6223_v4 = vunpack.c.h.bf16 %v6132_v16 }
 0x627   : > { %v7018_v18 = vmax.f32 %v6890_v1, 0.0  ;;  %v6894_v9 = vadd.f32 %v6549_v20, %v6198_v58  ;;  %6846 = vmatmul.mubr.bf16.gmra.mrb[8].mxu1 %v10797_v15  ;;  %v6218_v58 = vunpack.c.l.bf16 %v6130_v53 }
 0x628   : > { %v7019_v54 = vmax.f32 %v6891_v12, 0.0  ;;  %v6895_v11 = vadd.f32 %v6551_v50, %v6199_v42  ;;  %6855 = vmatprep.mubr.bf16.mxu1 %v9423_v45  ;;  %v6207_v45 = vunpack.c.h.bf16 %v6124_v10  ;;  %v6219_v42 = vunpack.c.h.bf16 %v6130_v53 }
 0x629   : > { %7146 = vst [vmem:[%s10861_s23 + $0xc0] sm:$0xff] %v7018_v18  ;;  %v7022_v63 = vmax.f32 %v6894_v9, 0.0 }
 0x62a   : > { %7147 = vst [vmem:[%s10861_s23 + $0xc8] sm:$0xff] %v7019_v54  ;;  %v7023_v35 = vmax.f32 %v6895_v11, 0.0  ;;  %v6554_v27 = vpop.f32.mrb[160].mxu1 }
 0x62b   : > { %7150 = vst [vmem:[%s10861_s23 + $0xe0] sm:$0xff] %v7022_v63  ;;  %v6555_v21 = vadd.f32 %v6554_v27, %v10845_v28  ;;  %v6556_v52 = vpop.f32.mrb[161].mxu1  ;;  %v6134_v63 = vld [vmem:[%s9731_s12 + $0xe0] sm:$0xff] }
 0x62c   : > { %7151 = vst [vmem:[%s10861_s23 + $0xe8] sm:$0xff] %v7023_v35  ;;  %v6557_v15 = vadd.f32 %v6556_v52, %v10848_v40  ;;  %v6558_v32 = vpop.f32.mrb[162].mxu1 }
 0x62d   : > { %v6898_v59 = vadd.f32 %v6555_v21, %v6202_v49  ;;  %v6559_v30 = vadd.f32 %v6558_v32, %v10845_v28  ;;  %v6560_v19 = vpop.f32.mrb[163].mxu1  ;;  %v6136_v21 = vld [vmem:[%s9731_s12 + $0xf0] sm:$0xff] }
 0x62e   : > { %v6899_v14 = vadd.f32 %v6557_v15, %v6203_v7  ;;  %v6561_v8 = vadd.f32 %v6560_v19, %v10848_v40  ;;  %v6230_v19 = vunpack.c.l.bf16 %v6136_v21  ;;  %v6231_v31 = vunpack.c.h.bf16 %v6136_v21 }
 0x62f   : > { %v7026_v26 = vmax.f32 %v6898_v59, 0.0  ;;  %v6902_v29 = vadd.f32 %v6559_v30, %v6206_v5  ;;  %6856 = vmatmul.mubr.bf16.gmra.mrb[12].mxu1 %v10794_v46  ;;  %v6226_v5 = vunpack.c.l.bf16 %v6134_v63 }
 0x630   : > { %v7027_v60 = vmax.f32 %v6899_v14, 0.0  ;;  %v6903_v41 = vadd.f32 %v6561_v8, %v6207_v45  ;;  %v6227_v45 = vunpack.c.h.bf16 %v6134_v63 }
 0x631   : > { %7154 = vst [vmem:[%s10861_s23 + $0x100] sm:$0xff] %v7026_v26  ;;  %v7030_v33 = vmax.f32 %v6902_v29, 0.0 }
 0x632   : > { %7155 = vst [vmem:[%s10861_s23 + $0x108] sm:$0xff] %v7027_v60  ;;  %v7031_v44 = vmax.f32 %v6903_v41, 0.0  ;;  %v6564_v36 = vpop.f32.mrb[164].mxu1 }
 0x633   : > { %7158 = vst [vmem:[%s10861_s23 + $0x120] sm:$0xff] %v7030_v33  ;;  %v6565_v24 = vadd.f32 %v6564_v36, %v10845_v28  ;;  %v6566_v43 = vpop.f32.mrb[165].mxu1  ;;  %v6138_v33 = vld [vmem:[%s9731_s12 + $0x100] sm:$0xff] }
 0x634   : > { %7159 = vst [vmem:[%s10861_s23 + $0x128] sm:$0xff] %v7031_v44  ;;  %v6567_v46 = vadd.f32 %v6566_v43, %v10848_v40  ;;  %v6568_v13 = vpop.f32.mrb[166].mxu1 }
 0x635   : > { %v6906_v57 = vadd.f32 %v6565_v24, %v6210_v23  ;;  %v6569_v38 = vadd.f32 %v6568_v13, %v10845_v28  ;;  %v6570_v56 = vpop.f32.mrb[167].mxu1  ;;  %v6140_v24 = vld [vmem:[%s9731_s12 + $0x110] sm:$0xff] }
 0x636   : > { %v6907_v37 = vadd.f32 %v6567_v46, %v6211_v0  ;;  %v6571_v34 = vadd.f32 %v6570_v56, %v10848_v40  ;;  %v6238_v56 = vunpack.c.l.bf16 %v6140_v24  ;;  %v6239_v53 = vunpack.c.h.bf16 %v6140_v24 }
 0x637   : > { %v7034_v25 = vmax.f32 %v6906_v57, 0.0  ;;  %v6910_v61 = vadd.f32 %v6569_v38, %v6214_v48  ;;  %v6234_v48 = vunpack.c.l.bf16 %v6138_v33 }
 0x638   : > { %v7035_v6 = vmax.f32 %v6907_v37, 0.0  ;;  %v6911_v3 = vadd.f32 %v6571_v34, %v6215_v51  ;;  %v6235_v51 = vunpack.c.h.bf16 %v6138_v33 }
 0x639   : > { %7162 = vst [vmem:[%s10861_s23 + $0x140] sm:$0xff] %v7034_v25  ;;  %v7038_v62 = vmax.f32 %v6910_v61, 0.0 }
 0x63a   : > { %7163 = vst [vmem:[%s10861_s23 + $0x148] sm:$0xff] %v7035_v6  ;;  %v7039_v55 = vmax.f32 %v6911_v3, 0.0  ;;  %v6574_v47 = vpop.f32.mrb[168].mxu1 }
 0x63b   : > { %7166 = vst [vmem:[%s10861_s23 + $0x160] sm:$0xff] %v7038_v62  ;;  %v6575_v1 = vadd.f32 %v6574_v47, %v10845_v28  ;;  %v6576_v20 = vpop.f32.mrb[169].mxu1  ;;  %v6142_v62 = vld [vmem:[%s9731_s12 + $0x120] sm:$0xff] }
 0x63c   : > { %7167 = vst [vmem:[%s10861_s23 + $0x168] sm:$0xff] %v7039_v55  ;;  %v6577_v12 = vadd.f32 %v6576_v20, %v10848_v40  ;;  %v6578_v50 = vpop.f32.mrb[170].mxu1 }
 0x63d   : > { %v6914_v18 = vadd.f32 %v6575_v1, %v6218_v58  ;;  %v6579_v9 = vadd.f32 %v6578_v50, %v10845_v28  ;;  %v6580_v54 = vpop.f32.mrb[171].mxu1  ;;  %v6144_v1 = vld [vmem:[%s9731_s12 + $0x130] sm:$0xff] }
 0x63e   : > { %v6915_v11 = vadd.f32 %v6577_v12, %v6219_v42  ;;  %v6581_v10 = vadd.f32 %v6580_v54, %v10848_v40  ;;  %v6246_v54 = vunpack.c.l.bf16 %v6144_v1  ;;  %v6247_v63 = vunpack.c.h.bf16 %v6144_v1 }
 0x63f   : > { %v7042_v49 = vmax.f32 %v6914_v18, 0.0  ;;  %v6918_v35 = vadd.f32 %v6579_v9, %v6222_v22  ;;  %v6242_v22 = vunpack.c.l.bf16 %v6142_v62 }
 0x640   : > { %v7043_v27 = vmax.f32 %v6915_v11, 0.0  ;;  %v6919_v7 = vadd.f32 %v6581_v10, %v6223_v4  ;;  %v6243_v4 = vunpack.c.h.bf16 %v6142_v62 }
 0x641   : > { %7170 = vst [vmem:[%s10861_s23 + $0x180] sm:$0xff] %v7042_v49  ;;  %v7046_v52 = vmax.f32 %v6918_v35, 0.0 }
 0x642   : > { %7171 = vst [vmem:[%s10861_s23 + $0x188] sm:$0xff] %v7043_v27  ;;  %v7047_v15 = vmax.f32 %v6919_v7, 0.0  ;;  %v6584_v32 = vpop.f32.mrb[172].mxu1 }
 0x643   : > { %7174 = vst [vmem:[%s10861_s23 + $0x1a0] sm:$0xff] %v7046_v52  ;;  %v6585_v59 = vadd.f32 %v6584_v32, %v10845_v28  ;;  %v6586_v30 = vpop.f32.mrb[173].mxu1  ;;  %v6146_v52 = vld [vmem:[%s9731_s12 + $0x140] sm:$0xff] }
 0x644   : > { %7175 = vst [vmem:[%s10861_s23 + $0x1a8] sm:$0xff] %v7047_v15  ;;  %v6587_v14 = vadd.f32 %v6586_v30, %v10848_v40  ;;  %v6588_v8 = vpop.f32.mrb[174].mxu1 }
 0x645   : > { %v6922_v26 = vadd.f32 %v6585_v59, %v6226_v5  ;;  %v6589_v29 = vadd.f32 %v6588_v8, %v10845_v28  ;;  %v6590_v60 = vpop.f32.mrb[175].mxu1  ;;  %v6148_v59 = vld [vmem:[%s9731_s12 + $0x150] sm:$0xff] }
 0x646   : > { %v6923_v41 = vadd.f32 %v6587_v14, %v6227_v45  ;;  %v6591_v17 = vadd.f32 %v6590_v60, %v10848_v40  ;;  %v6254_v60 = vunpack.c.l.bf16 %v6148_v59  ;;  %v6255_v33 = vunpack.c.h.bf16 %v6148_v59 }
 0x647   : > { %v7050_v23 = vmax.f32 %v6922_v26, 0.0  ;;  %v6926_v44 = vadd.f32 %v6589_v29, %v6230_v19  ;;  %v6250_v19 = vunpack.c.l.bf16 %v6146_v52 }
 0x648   : > { %v7051_v36 = vmax.f32 %v6923_v41, 0.0  ;;  %v6927_v0 = vadd.f32 %v6591_v17, %v6231_v31  ;;  %v6251_v31 = vunpack.c.h.bf16 %v6146_v52 }
 0x649   : > { %7178 = vst [vmem:[%s10861_s23 + $0x1c0] sm:$0xff] %v7050_v23  ;;  %v7054_v43 = vmax.f32 %v6926_v44, 0.0 }
 0x64a   : > { %7179 = vst [vmem:[%s10861_s23 + $0x1c8] sm:$0xff] %v7051_v36  ;;  %v7055_v46 = vmax.f32 %v6927_v0, 0.0  ;;  %v6594_v13 = vpop.f32.mrb[176].mxu1 }
 0x64b   : > { %7182 = vst [vmem:[%s10861_s23 + $0x1e0] sm:$0xff] %v7054_v43  ;;  %v6595_v57 = vadd.f32 %v6594_v13, %v10845_v28  ;;  %v6596_v38 = vpop.f32.mrb[177].mxu1  ;;  %v6150_v43 = vld [vmem:[%s9731_s12 + $0x160] sm:$0xff] }
 0x64c   : > { %7183 = vst [vmem:[%s10861_s23 + $0x1e8] sm:$0xff] %v7055_v46  ;;  %v6597_v37 = vadd.f32 %v6596_v38, %v10848_v40  ;;  %v6598_v34 = vpop.f32.mrb[178].mxu1 }
 0x64d   : > { %v6930_v25 = vadd.f32 %v6595_v57, %v6234_v48  ;;  %v6599_v61 = vadd.f32 %v6598_v34, %v10845_v28  ;;  %v6600_v6 = vpop.f32.mrb[179].mxu1  ;;  %v6152_v57 = vld [vmem:[%s9731_s12 + $0x170] sm:$0xff] }
 0x64e   : > { %v6931_v3 = vadd.f32 %v6597_v37, %v6235_v51  ;;  %v6601_v16 = vadd.f32 %v6600_v6, %v10848_v40  ;;  %v6262_v6 = vunpack.c.l.bf16 %v6152_v57  ;;  %v6263_v62 = vunpack.c.h.bf16 %v6152_v57 }
 0x64f   : > { %v7058_v58 = vmax.f32 %v6930_v25, 0.0  ;;  %v6934_v55 = vadd.f32 %v6599_v61, %v6238_v56  ;;  %v6258_v56 = vunpack.c.l.bf16 %v6150_v43 }
 0x650   : > { %v7059_v47 = vmax.f32 %v6931_v3, 0.0  ;;  %v6935_v42 = vadd.f32 %v6601_v16, %v6239_v53  ;;  %v6259_v53 = vunpack.c.h.bf16 %v6150_v43 }
 0x651   : > { %7186 = vst [vmem:[%s10861_s23 + $0x200] sm:$0xff] %v7058_v58  ;;  %v7062_v20 = vmax.f32 %v6934_v55, 0.0 }
 0x652   : > { %7187 = vst [vmem:[%s10861_s23 + $0x208] sm:$0xff] %v7059_v47  ;;  %v7063_v12 = vmax.f32 %v6935_v42, 0.0  ;;  %v6604_v50 = vpop.f32.mrb[180].mxu1 }
 0x653   : > { %7190 = vst [vmem:[%s10861_s23 + $0x220] sm:$0xff] %v7062_v20  ;;  %v6605_v18 = vadd.f32 %v6604_v50, %v10845_v28  ;;  %v6606_v9 = vpop.f32.mrb[181].mxu1  ;;  %v6154_v20 = vld [vmem:[%s9731_s12 + $0x180] sm:$0xff] }
 0x654   : > { %7191 = vst [vmem:[%s10861_s23 + $0x228] sm:$0xff] %v7063_v12  ;;  %v6607_v11 = vadd.f32 %v6606_v9, %v10848_v40  ;;  %v6608_v10 = vpop.f32.mrb[182].mxu1 }
 0x655   : > { %v6938_v49 = vadd.f32 %v6605_v18, %v6242_v22  ;;  %v6609_v35 = vadd.f32 %v6608_v10, %v10845_v28  ;;  %v6610_v27 = vpop.f32.mrb[183].mxu1  ;;  %v6156_v18 = vld [vmem:[%s9731_s12 + $0x190] sm:$0xff] }
 0x656   : > { %v6939_v7 = vadd.f32 %v6607_v11, %v6243_v4  ;;  %v6611_v21 = vadd.f32 %v6610_v27, %v10848_v40  ;;  %v6270_v27 = vunpack.c.l.bf16 %v6156_v18  ;;  %v6271_v52 = vunpack.c.h.bf16 %v6156_v18 }
 0x657   : > { %v7066_v5 = vmax.f32 %v6938_v49, 0.0  ;;  %v6942_v15 = vadd.f32 %v6609_v35, %v6246_v54  ;;  %v6266_v54 = vunpack.c.l.bf16 %v6154_v20 }
 0x658   : > { %v7067_v32 = vmax.f32 %v6939_v7, 0.0  ;;  %v6943_v45 = vadd.f32 %v6611_v21, %v6247_v63  ;;  %v6267_v63 = vunpack.c.h.bf16 %v6154_v20 }
 0x659   : > { %7194 = vst [vmem:[%s10861_s23 + $0x240] sm:$0xff] %v7066_v5  ;;  %v7070_v30 = vmax.f32 %v6942_v15, 0.0 }
 0x65a   : > { %7195 = vst [vmem:[%s10861_s23 + $0x248] sm:$0xff] %v7067_v32  ;;  %v7071_v14 = vmax.f32 %v6943_v45, 0.0  ;;  %v6614_v8 = vpop.f32.mrb[184].mxu1 }
 0x65b   : > { %7198 = vst [vmem:[%s10861_s23 + $0x260] sm:$0xff] %v7070_v30  ;;  %v6615_v26 = vadd.f32 %v6614_v8, %v10845_v28  ;;  %v6616_v29 = vpop.f32.mrb[185].mxu1  ;;  %v6158_v30 = vld [vmem:[%s9731_s12 + $0x1a0] sm:$0xff] }
 0x65c   : > { %7199 = vst [vmem:[%s10861_s23 + $0x268] sm:$0xff] %v7071_v14  ;;  %v6617_v41 = vadd.f32 %v6616_v29, %v10848_v40  ;;  %v6618_v17 = vpop.f32.mrb[186].mxu1 }
 0x65d   : > { %v6946_v23 = vadd.f32 %v6615_v26, %v6250_v19  ;;  %v6619_v44 = vadd.f32 %v6618_v17, %v10845_v28  ;;  %v6620_v36 = vpop.f32.mrb[187].mxu1  ;;  %v6160_v26 = vld [vmem:[%s9731_s12 + $0x1b0] sm:$0xff] }
 0x65e   : > { %v6947_v0 = vadd.f32 %v6617_v41, %v6251_v31  ;;  %v6621_v24 = vadd.f32 %v6620_v36, %v10848_v40  ;;  %v6278_v36 = vunpack.c.l.bf16 %v6160_v26  ;;  %v6279_v43 = vunpack.c.h.bf16 %v6160_v26 }
 0x65f   : > { %v7074_v48 = vmax.f32 %v6946_v23, 0.0  ;;  %v6950_v46 = vadd.f32 %v6619_v44, %v6254_v60  ;;  %v6274_v60 = vunpack.c.l.bf16 %v6158_v30 }
 0x660   : > { %v7075_v13 = vmax.f32 %v6947_v0, 0.0  ;;  %v6951_v51 = vadd.f32 %v6621_v24, %v6255_v33  ;;  %v6275_v33 = vunpack.c.h.bf16 %v6158_v30 }
 0x661   : > { %7202 = vst [vmem:[%s10861_s23 + $0x280] sm:$0xff] %v7074_v48  ;;  %v7078_v38 = vmax.f32 %v6950_v46, 0.0 }
 0x662   : > { %7203 = vst [vmem:[%s10861_s23 + $0x288] sm:$0xff] %v7075_v13  ;;  %v7079_v37 = vmax.f32 %v6951_v51, 0.0  ;;  %v6624_v34 = vpop.f32.mrb[188].mxu1 }
 0x663   : > { %7206 = vst [vmem:[%s10861_s23 + $0x2a0] sm:$0xff] %v7078_v38  ;;  %v6625_v25 = vadd.f32 %v6624_v34, %v10845_v28  ;;  %v6626_v61 = vpop.f32.mrb[189].mxu1  ;;  %v6162_v38 = vld [vmem:[%s9731_s12 + $0x1c0] sm:$0xff] }
 0x664   : > { %7207 = vst [vmem:[%s10861_s23 + $0x2a8] sm:$0xff] %v7079_v37  ;;  %v6627_v3 = vadd.f32 %v6626_v61, %v10848_v40  ;;  %v6628_v16 = vpop.f32.mrb[190].mxu1 }
 0x665   : > { %v6954_v58 = vadd.f32 %v6625_v25, %v6258_v56  ;;  %v6629_v55 = vadd.f32 %v6628_v16, %v10845_v28  ;;  %v6630_v47 = vpop.f32.mrb[191].mxu1  ;;  %v6164_v25 = vld [vmem:[%s9731_s12 + $0x1d0] sm:$0xff] }
 0x666   : > { %v6955_v42 = vadd.f32 %v6627_v3, %v6259_v53  ;;  %v6631_v1 = vadd.f32 %v6630_v47, %v10848_v40  ;;  %v6286_v47 = vunpack.c.l.bf16 %v6164_v25  ;;  %v6287_v20 = vunpack.c.h.bf16 %v6164_v25 }
 0x667   : > { %v7082_v22 = vmax.f32 %v6954_v58, 0.0  ;;  %v6958_v12 = vadd.f32 %v6629_v55, %v6262_v6  ;;  %v6282_v6 = vunpack.c.l.bf16 %v6162_v38 }
 0x668   : > { %v7083_v50 = vmax.f32 %v6955_v42, 0.0  ;;  %v6959_v4 = vadd.f32 %v6631_v1, %v6263_v62  ;;  %v6283_v62 = vunpack.c.h.bf16 %v6162_v38 }
 0x669   : > { %7210 = vst [vmem:[%s10861_s23 + $0x2c0] sm:$0xff] %v7082_v22  ;;  %v7086_v9 = vmax.f32 %v6958_v12, 0.0 }
 0x66a   : > { %7211 = vst [vmem:[%s10861_s23 + $0x2c8] sm:$0xff] %v7083_v50  ;;  %v7087_v11 = vmax.f32 %v6959_v4, 0.0  ;;  %v6634_v10 = vpop.f32.mrb[192].mxu1 }
 0x66b   : > { %7214 = vst [vmem:[%s10861_s23 + $0x2e0] sm:$0xff] %v7086_v9  ;;  %v6635_v49 = vadd.f32 %v6634_v10, %v10845_v28  ;;  %v6636_v35 = vpop.f32.mrb[193].mxu1  ;;  %v6166_v9 = vld [vmem:[%s9731_s12 + $0x1e0] sm:$0xff] }
 0x66c   : > { %7215 = vst [vmem:[%s10861_s23 + $0x2e8] sm:$0xff] %v7087_v11  ;;  %v6637_v7 = vadd.f32 %v6636_v35, %v10848_v40  ;;  %v6638_v21 = vpop.f32.mrb[194].mxu1 }
 0x66d   : > { %v6962_v5 = vadd.f32 %v6635_v49, %v6266_v54  ;;  %v6639_v15 = vadd.f32 %v6638_v21, %v10845_v28  ;;  %v6640_v32 = vpop.f32.mrb[195].mxu1  ;;  %v6168_v49 = vld [vmem:[%s9731_s12 + $0x1f0] sm:$0xff] }
 0x66e   : > { %v6963_v45 = vadd.f32 %v6637_v7, %v6267_v63  ;;  %v6641_v59 = vadd.f32 %v6640_v32, %v10848_v40  ;;  %v6294_v32 = vunpack.c.l.bf16 %v6168_v49 }
 0x66f   : > { %v7090_v19 = vmax.f32 %v6962_v5, 0.0  ;;  %v6966_v14 = vadd.f32 %v6639_v15, %v6270_v27  ;;  %v6290_v27 = vunpack.c.l.bf16 %v6166_v9 }
 0x670   : > { %v7091_v8 = vmax.f32 %v6963_v45, 0.0  ;;  %v6967_v31 = vadd.f32 %v6641_v59, %v6271_v52  ;;  %v6291_v52 = vunpack.c.h.bf16 %v6166_v9  ;;  %v6310_v45 = vsub.s32 2, %v10835_v39 }
 0x671   : > { %7218 = vst [vmem:[%s10861_s23 + $0x300] sm:$0xff] %v7090_v19  ;;  %v7094_v29 = vmax.f32 %v6966_v14, 0.0  ;;  %v6295_v19 = vunpack.c.h.bf16 %v6168_v49  ;;  %v6314_v14 = vsub.s32 3, %v10835_v39 }
 0x672   : > { %7219 = vst [vmem:[%s10861_s23 + $0x308] sm:$0xff] %v7091_v8  ;;  %v7095_v41 = vmax.f32 %v6967_v31, 0.0  ;;  %v6644_v17 = vpop.f32.mrb[196].mxu1 }
 0x673   : > { %7222 = vst [vmem:[%s10861_s23 + $0x320] sm:$0xff] %v7094_v29  ;;  %v6645_v23 = vadd.f32 %v6644_v17, %v10845_v28  ;;  %v6646_v44 = vpop.f32.mrb[197].mxu1  ;;  %v11025_v39 = vrot.slane %v10839_v2, %v6314_v14 }
 0x674   : > { %7223 = vst [vmem:[%s10861_s23 + $0x328] sm:$0xff] %v7095_v41  ;;  %v6647_v0 = vadd.f32 %v6646_v44, %v10848_v40  ;;  %v6648_v24 = vpop.f32.mrb[198].mxu1  ;;  %v6107_v41 = vld [vmem:[%s9731_s12 + $0x8] sm:$0xff] }
 0x675   : > { %v6970_v48 = vadd.f32 %v6645_v23, %v6274_v60  ;;  %v6649_v46 = vadd.f32 %v6648_v24, %v10845_v28  ;;  %v6650_v13 = vpop.f32.mrb[199].mxu1  ;;  %v11022_v23 = vrot.slane %v10839_v2, %v6310_v45  ;;  %v6172_v24 = vunpack.c.l.bf16 %v6107_v41 }
 0x676   : > { %v6971_v51 = vadd.f32 %v6647_v0, %v6275_v33  ;;  %v6651_v57 = vadd.f32 %v6650_v13, %v10848_v40  ;;  %v6109_v0 = vld [vmem:[%s9731_s12 + $0x18] sm:$0xff] }
 0x677   : > { %v7098_v56 = vmax.f32 %v6970_v48, 0.0  ;;  %v6974_v37 = vadd.f32 %v6649_v46, %v6278_v36  ;;  %v6173_v48 = vunpack.c.h.bf16 %v6107_v41  ;;  %v6177_v38 = vunpack.c.h.bf16 %v6109_v0 }
 0x678   : > { %v7099_v34 = vmax.f32 %v6971_v51, 0.0  ;;  %v6975_v53 = vadd.f32 %v6651_v57, %v6279_v43  ;;  %v6176_v51 = vunpack.c.l.bf16 %v6109_v0 }
 0x679   : > { %7226 = vst [vmem:[%s10861_s23 + $0x340] sm:$0xff] %v7098_v56  ;;  %v7102_v61 = vmax.f32 %v6974_v37, 0.0 }
 0x67a   : > { %7227 = vst [vmem:[%s10861_s23 + $0x348] sm:$0xff] %v7099_v34  ;;  %v7103_v3 = vmax.f32 %v6975_v53, 0.0  ;;  %v6654_v16 = vpop.f32.mrb[200].mxu1 }
 0x67b   : > { %7230 = vst [vmem:[%s10861_s23 + $0x360] sm:$0xff] %v7102_v61  ;;  %v6655_v58 = vadd.f32 %v6654_v16, %v10845_v28  ;;  %v6656_v55 = vpop.f32.mrb[201].mxu1  ;;  %v6111_v61 = vld [vmem:[%s9731_s12 + $0x28] sm:$0xff] }
 0x67c   : > { %7231 = vst [vmem:[%s10861_s23 + $0x368] sm:$0xff] %v7103_v3  ;;  %v6657_v42 = vadd.f32 %v6656_v55, %v10848_v40  ;;  %v6658_v1 = vpop.f32.mrb[202].mxu1 }
 0x67d   : > { %v6978_v22 = vadd.f32 %v6655_v58, %v6282_v6  ;;  %v6659_v12 = vadd.f32 %v6658_v1, %v10845_v28  ;;  %v6660_v50 = vpop.f32.mrb[203].mxu1  ;;  %v6113_v58 = vld [vmem:[%s9731_s12 + $0x38] sm:$0xff] }
 0x67e   : > { %v6979_v4 = vadd.f32 %v6657_v42, %v6283_v62  ;;  %v6661_v18 = vadd.f32 %v6660_v50, %v10848_v40  ;;  %v6184_v50 = vunpack.c.l.bf16 %v6113_v58  ;;  %v6185_v9 = vunpack.c.h.bf16 %v6113_v58 }
 0x67f   : > { %v7106_v54 = vmax.f32 %v6978_v22, 0.0  ;;  %v6982_v11 = vadd.f32 %v6659_v12, %v6286_v47  ;;  %v6180_v47 = vunpack.c.l.bf16 %v6111_v61 }
 0x680   : > { %v7107_v10 = vmax.f32 %v6979_v4, 0.0  ;;  %v6983_v63 = vadd.f32 %v6661_v18, %v6287_v20  ;;  %v6181_v20 = vunpack.c.h.bf16 %v6111_v61 }
 0x681   : > { %7234 = vst [vmem:[%s10861_s23 + $0x380] sm:$0xff] %v7106_v54  ;;  %v7110_v35 = vmax.f32 %v6982_v11, 0.0 }
 0x682   : > { %7235 = vst [vmem:[%s10861_s23 + $0x388] sm:$0xff] %v7107_v10  ;;  %v7111_v7 = vmax.f32 %v6983_v63, 0.0  ;;  %v6664_v21 = vpop.f32.mrb[204].mxu1 }
 0x683   : > { %7238 = vst [vmem:[%s10861_s23 + $0x3a0] sm:$0xff] %v7110_v35  ;;  %v6665_v5 = vadd.f32 %v6664_v21, %v10845_v28  ;;  %v6666_v15 = vpop.f32.mrb[205].mxu1  ;;  %v6115_v35 = vld [vmem:[%s9731_s12 + $0x48] sm:$0xff] }
 0x684   : > { %7239 = vst [vmem:[%s10861_s23 + $0x3a8] sm:$0xff] %v7111_v7  ;;  %v6667_v59 = vadd.f32 %v6666_v15, %v10848_v40  ;;  %v6668_v30 = vpop.f32.mrb[206].mxu1 }
 0x685   : > { %v6986_v8 = vadd.f32 %v6665_v5, %v6290_v27  ;;  %v6669_v31 = vadd.f32 %v6668_v30, %v10845_v28  ;;  %v6670_v26 = vpop.f32.mrb[207].mxu1  ;;  %v6117_v5 = vld [vmem:[%s9731_s12 + $0x58] sm:$0xff]  ;;  %v6189_v30 = vunpack.c.h.bf16 %v6115_v35 }
 0x686   : > { %v6987_v29 = vadd.f32 %v6667_v59, %v6291_v52  ;;  %v6671_v60 = vadd.f32 %v6670_v26, %v10848_v40 }
 0x687   : > { %v7114_v17 = vmax.f32 %v6986_v8, 0.0  ;;  %v6990_v33 = vadd.f32 %v6669_v31, %v6294_v32  ;;  %v6188_v32 = vunpack.c.l.bf16 %v6115_v35  ;;  %v6192_v8 = vunpack.c.l.bf16 %v6117_v5 }
 0x688   : > { %v7115_v44 = vmax.f32 %v6987_v29, 0.0  ;;  %v6991_v36 = vadd.f32 %v6671_v60, %v6295_v19  ;;  %v6193_v29 = vunpack.c.h.bf16 %v6117_v5 }
 0x689   : > { %7242 = vst [vmem:[%s10861_s23 + $0x3c0] sm:$0xff] %v7114_v17  ;;  %v7118_v28 = vmax.f32 %v6990_v33, 0.0 }
 0x68a   : > { %7243 = vst [vmem:[%s10861_s23 + $0x3c8] sm:$0xff] %v7115_v44  ;;  %v7119_v43 = vmax.f32 %v6991_v36, 0.0  ;;  %v6707_v40 = vpop.f32.mrb[208].mxu1  ;;  %v6119_v36 = vld [vmem:[%s9731_s12 + $0x68] sm:$0xff] }
 0x68b   : > { %7246 = vst [vmem:[%s10861_s23 + $0x3e0] sm:$0xff] %v7118_v28  ;;  %v6708_v46 = vadd.f32 %v6707_v40, %v11022_v23  ;;  %v6709_v13 = vpop.f32.mrb[209].mxu1  ;;  %v6121_v40 = vld [vmem:[%s9731_s12 + $0x78] sm:$0xff] }
 0x68c   : > { %7247 = vst [vmem:[%s10861_s23 + $0x3e8] sm:$0xff] %v7119_v43  ;;  %v6710_v2 = vadd.f32 %v6709_v13, %v11025_v39  ;;  %v6711_v57 = vpop.f32.mrb[210].mxu1 }
 0x68d   : > { %v6868_v56 = vadd.f32 %v6708_v46, %v6172_v24  ;;  %v6712_v37 = vadd.f32 %v6711_v57, %v11022_v23  ;;  %v6713_v34 = vpop.f32.mrb[211].mxu1  ;;  %v6196_v46 = vunpack.c.l.bf16 %v6119_v36 }
 0x68e   : > { %v6869_v53 = vadd.f32 %v6710_v2, %v6173_v48  ;;  %v6714_v25 = vadd.f32 %v6713_v34, %v11025_v39  ;;  %v6197_v2 = vunpack.c.h.bf16 %v6119_v36 }
 0x68f   : > { %v6996_v6 = vmax.f32 %v6868_v56, 0.0  ;;  %v6872_v3 = vadd.f32 %v6712_v37, %v6176_v51  ;;  %v6200_v56 = vunpack.c.l.bf16 %v6121_v40 }
 0x690   : > { %v6997_v16 = vmax.f32 %v6869_v53, 0.0  ;;  %v6873_v62 = vadd.f32 %v6714_v25, %v6177_v38  ;;  %v6201_v53 = vunpack.c.h.bf16 %v6121_v40 }
 0x691   : > { %7124 = vst [vmem:[%s10861_s23 + $0x10] sm:$0xff] %v6996_v6  ;;  %v7000_v55 = vmax.f32 %v6872_v3, 0.0 }
 0x692   : > { %7125 = vst [vmem:[%s10861_s23 + $0x18] sm:$0xff] %v6997_v16  ;;  %v7001_v42 = vmax.f32 %v6873_v62, 0.0  ;;  %v6717_v1 = vpop.f32.mrb[212].mxu1  ;;  %v6123_v62 = vld [vmem:[%s9731_s12 + $0x88] sm:$0xff] }
 0x693   : > { %7128 = vst [vmem:[%s10861_s23 + $0x30] sm:$0xff] %v7000_v55  ;;  %v6718_v22 = vadd.f32 %v6717_v1, %v11022_v23  ;;  %v6719_v12 = vpop.f32.mrb[213].mxu1  ;;  %v6125_v1 = vld [vmem:[%s9731_s12 + $0x98] sm:$0xff] }
 0x694   : > { %7129 = vst [vmem:[%s10861_s23 + $0x38] sm:$0xff] %v7001_v42  ;;  %v6720_v4 = vadd.f32 %v6719_v12, %v11025_v39  ;;  %v6721_v18 = vpop.f32.mrb[214].mxu1 }
 0x695   : > { %v6876_v54 = vadd.f32 %v6718_v22, %v6180_v47  ;;  %v6722_v11 = vadd.f32 %v6721_v18, %v11022_v23  ;;  %v6723_v10 = vpop.f32.mrb[215].mxu1  ;;  %v6204_v22 = vunpack.c.l.bf16 %v6123_v62 }
 0x696   : > { %v6877_v63 = vadd.f32 %v6720_v4, %v6181_v20  ;;  %v6724_v49 = vadd.f32 %v6723_v10, %v11025_v39  ;;  %v6205_v4 = vunpack.c.h.bf16 %v6123_v62 }
 0x697   : > { %v7004_v27 = vmax.f32 %v6876_v54, 0.0  ;;  %v6880_v7 = vadd.f32 %v6722_v11, %v6184_v50  ;;  %v6208_v54 = vunpack.c.l.bf16 %v6125_v1 }
 0x698   : > { %v7005_v21 = vmax.f32 %v6877_v63, 0.0  ;;  %v6881_v52 = vadd.f32 %v6724_v49, %v6185_v9  ;;  %v6209_v63 = vunpack.c.h.bf16 %v6125_v1 }
 0x699   : > { %7132 = vst [vmem:[%s10861_s23 + $0x50] sm:$0xff] %v7004_v27  ;;  %v7008_v15 = vmax.f32 %v6880_v7, 0.0 }
 0x69a   : > { %7133 = vst [vmem:[%s10861_s23 + $0x58] sm:$0xff] %v7005_v21  ;;  %v7009_v45 = vmax.f32 %v6881_v52, 0.0  ;;  %v6727_v59 = vpop.f32.mrb[216].mxu1  ;;  %v6127_v52 = vld [vmem:[%s9731_s12 + $0xa8] sm:$0xff] }
 0x69b   : > { %7136 = vst [vmem:[%s10861_s23 + $0x70] sm:$0xff] %v7008_v15  ;;  %v6728_v19 = vadd.f32 %v6727_v59, %v11022_v23  ;;  %v6729_v14 = vpop.f32.mrb[217].mxu1  ;;  %v6129_v59 = vld [vmem:[%s9731_s12 + $0xb8] sm:$0xff] }
 0x69c   : > { %7137 = vst [vmem:[%s10861_s23 + $0x78] sm:$0xff] %v7009_v45  ;;  %v6730_v31 = vadd.f32 %v6729_v14, %v11025_v39  ;;  %v6731_v26 = vpop.f32.mrb[218].mxu1 }
 0x69d   : > { %v6884_v60 = vadd.f32 %v6728_v19, %v6188_v32  ;;  %v6732_v41 = vadd.f32 %v6731_v26, %v11022_v23  ;;  %v6733_v17 = vpop.f32.mrb[219].mxu1  ;;  %v6212_v19 = vunpack.c.l.bf16 %v6127_v52 }
 0x69e   : > { %v6885_v33 = vadd.f32 %v6730_v31, %v6189_v30  ;;  %v6734_v44 = vadd.f32 %v6733_v17, %v11025_v39  ;;  %v6213_v31 = vunpack.c.h.bf16 %v6127_v52 }
 0x69f   : > { %v7012_v0 = vmax.f32 %v6884_v60, 0.0  ;;  %v6888_v28 = vadd.f32 %v6732_v41, %v6192_v8  ;;  %v6216_v60 = vunpack.c.l.bf16 %v6129_v59 }
 0x6a0   : > { %v7013_v24 = vmax.f32 %v6885_v33, 0.0  ;;  %v6889_v43 = vadd.f32 %v6734_v44, %v6193_v29  ;;  %v6217_v33 = vunpack.c.h.bf16 %v6129_v59 }
 0x6a1   : > { %7140 = vst [vmem:[%s10861_s23 + $0x90] sm:$0xff] %v7012_v0  ;;  %v7016_v48 = vmax.f32 %v6888_v28, 0.0 }
 0x6a2   : > { %7141 = vst [vmem:[%s10861_s23 + $0x98] sm:$0xff] %v7013_v24  ;;  %v7017_v13 = vmax.f32 %v6889_v43, 0.0  ;;  %v6737_v51 = vpop.f32.mrb[220].mxu1  ;;  %v6131_v43 = vld [vmem:[%s9731_s12 + $0xc8] sm:$0xff] }
 0x6a3   : > { %7144 = vst [vmem:[%s10861_s23 + $0xb0] sm:$0xff] %v7016_v48  ;;  %v6738_v57 = vadd.f32 %v6737_v51, %v11022_v23  ;;  %v6739_v38 = vpop.f32.mrb[221].mxu1  ;;  %v6133_v51 = vld [vmem:[%s9731_s12 + $0xd8] sm:$0xff] }
 0x6a4   : > { %7145 = vst [vmem:[%s10861_s23 + $0xb8] sm:$0xff] %v7017_v13  ;;  %v6740_v37 = vadd.f32 %v6739_v38, %v11025_v39  ;;  %v6741_v34 = vpop.f32.mrb[222].mxu1 }
 0x6a5   : > { %v6892_v25 = vadd.f32 %v6738_v57, %v6196_v46  ;;  %v6742_v61 = vadd.f32 %v6741_v34, %v11022_v23  ;;  %v6743_v6 = vpop.f32.mrb[223].mxu1  ;;  %v6220_v57 = vunpack.c.l.bf16 %v6131_v43 }
 0x6a6   : > { %v6893_v3 = vadd.f32 %v6740_v37, %v6197_v2  ;;  %v6744_v16 = vadd.f32 %v6743_v6, %v11025_v39  ;;  %v6221_v37 = vunpack.c.h.bf16 %v6131_v43 }
 0x6a7   : > { %v7020_v58 = vmax.f32 %v6892_v25, 0.0  ;;  %v6896_v55 = vadd.f32 %v6742_v61, %v6200_v56  ;;  %v6224_v25 = vunpack.c.l.bf16 %v6133_v51 }
 0x6a8   : > { %v7021_v47 = vmax.f32 %v6893_v3, 0.0  ;;  %v6897_v42 = vadd.f32 %v6744_v16, %v6201_v53  ;;  %v6225_v3 = vunpack.c.h.bf16 %v6133_v51 }
 0x6a9   : > { %7148 = vst [vmem:[%s10861_s23 + $0xd0] sm:$0xff] %v7020_v58  ;;  %v7024_v20 = vmax.f32 %v6896_v55, 0.0 }
 0x6aa   : > { %7149 = vst [vmem:[%s10861_s23 + $0xd8] sm:$0xff] %v7021_v47  ;;  %v7025_v12 = vmax.f32 %v6897_v42, 0.0  ;;  %v6747_v50 = vpop.f32.mrb[224].mxu1  ;;  %v6135_v42 = vld [vmem:[%s9731_s12 + $0xe8] sm:$0xff] }
 0x6ab   : > { %7152 = vst [vmem:[%s10861_s23 + $0xf0] sm:$0xff] %v7024_v20  ;;  %v6748_v18 = vadd.f32 %v6747_v50, %v11022_v23  ;;  %v6749_v9 = vpop.f32.mrb[225].mxu1  ;;  %v6137_v50 = vld [vmem:[%s9731_s12 + $0xf8] sm:$0xff] }
 0x6ac   : > { %7153 = vst [vmem:[%s10861_s23 + $0xf8] sm:$0xff] %v7025_v12  ;;  %v6750_v11 = vadd.f32 %v6749_v9, %v11025_v39  ;;  %v6751_v10 = vpop.f32.mrb[226].mxu1 }
 0x6ad   : > { %v6900_v49 = vadd.f32 %v6748_v18, %v6204_v22  ;;  %v6752_v35 = vadd.f32 %v6751_v10, %v11022_v23  ;;  %v6753_v27 = vpop.f32.mrb[227].mxu1  ;;  %v6228_v18 = vunpack.c.l.bf16 %v6135_v42 }
 0x6ae   : > { %v6901_v7 = vadd.f32 %v6750_v11, %v6205_v4  ;;  %v6754_v21 = vadd.f32 %v6753_v27, %v11025_v39  ;;  %v6229_v11 = vunpack.c.h.bf16 %v6135_v42 }
 0x6af   : > { %v7028_v5 = vmax.f32 %v6900_v49, 0.0  ;;  %v6904_v15 = vadd.f32 %v6752_v35, %v6208_v54  ;;  %v6232_v49 = vunpack.c.l.bf16 %v6137_v50 }
 0x6b0   : > { %v7029_v32 = vmax.f32 %v6901_v7, 0.0  ;;  %v6905_v45 = vadd.f32 %v6754_v21, %v6209_v63  ;;  %v6233_v7 = vunpack.c.h.bf16 %v6137_v50 }
 0x6b1   : > { %7156 = vst [vmem:[%s10861_s23 + $0x110] sm:$0xff] %v7028_v5  ;;  %v7032_v30 = vmax.f32 %v6904_v15, 0.0 }
 0x6b2   : > { %7157 = vst [vmem:[%s10861_s23 + $0x118] sm:$0xff] %v7029_v32  ;;  %v7033_v14 = vmax.f32 %v6905_v45, 0.0  ;;  %v6757_v8 = vpop.f32.mrb[228].mxu1  ;;  %v6139_v45 = vld [vmem:[%s9731_s12 + $0x108] sm:$0xff] }
 0x6b3   : > { %7160 = vst [vmem:[%s10861_s23 + $0x130] sm:$0xff] %v7032_v30  ;;  %v6758_v26 = vadd.f32 %v6757_v8, %v11022_v23  ;;  %v6759_v29 = vpop.f32.mrb[229].mxu1  ;;  %v6141_v8 = vld [vmem:[%s9731_s12 + $0x118] sm:$0xff] }
 0x6b4   : > { %7161 = vst [vmem:[%s10861_s23 + $0x138] sm:$0xff] %v7033_v14  ;;  %v6760_v41 = vadd.f32 %v6759_v29, %v11025_v39  ;;  %v6761_v17 = vpop.f32.mrb[230].mxu1 }
 0x6b5   : > { %v6908_v44 = vadd.f32 %v6758_v26, %v6212_v19  ;;  %v6762_v36 = vadd.f32 %v6761_v17, %v11022_v23  ;;  %v6763_v0 = vpop.f32.mrb[231].mxu1  ;;  %v6236_v26 = vunpack.c.l.bf16 %v6139_v45 }
 0x6b6   : > { %v6909_v28 = vadd.f32 %v6760_v41, %v6213_v31  ;;  %v6764_v24 = vadd.f32 %v6763_v0, %v11025_v39  ;;  %v6237_v41 = vunpack.c.h.bf16 %v6139_v45 }
 0x6b7   : > { %v7036_v40 = vmax.f32 %v6908_v44, 0.0  ;;  %v6912_v48 = vadd.f32 %v6762_v36, %v6216_v60  ;;  %v6240_v44 = vunpack.c.l.bf16 %v6141_v8 }
 0x6b8   : > { %v7037_v46 = vmax.f32 %v6909_v28, 0.0  ;;  %v6913_v13 = vadd.f32 %v6764_v24, %v6217_v33  ;;  %v6241_v28 = vunpack.c.h.bf16 %v6141_v8 }
 0x6b9   : > { %7164 = vst [vmem:[%s10861_s23 + $0x150] sm:$0xff] %v7036_v40  ;;  %v7040_v2 = vmax.f32 %v6912_v48, 0.0 }
 0x6ba   : > { %7165 = vst [vmem:[%s10861_s23 + $0x158] sm:$0xff] %v7037_v46  ;;  %v7041_v38 = vmax.f32 %v6913_v13, 0.0  ;;  %v6767_v56 = vpop.f32.mrb[232].mxu1  ;;  %v6143_v13 = vld [vmem:[%s9731_s12 + $0x128] sm:$0xff] }
 0x6bb   : > { %7168 = vst [vmem:[%s10861_s23 + $0x170] sm:$0xff] %v7040_v2  ;;  %v6768_v34 = vadd.f32 %v6767_v56, %v11022_v23  ;;  %v6769_v53 = vpop.f32.mrb[233].mxu1  ;;  %v6145_v56 = vld [vmem:[%s9731_s12 + $0x138] sm:$0xff] }
 0x6bc   : > { %7169 = vst [vmem:[%s10861_s23 + $0x178] sm:$0xff] %v7041_v38  ;;  %v6770_v61 = vadd.f32 %v6769_v53, %v11025_v39  ;;  %v6771_v6 = vpop.f32.mrb[234].mxu1 }
 0x6bd   : > { %v6916_v16 = vadd.f32 %v6768_v34, %v6220_v57  ;;  %v6772_v62 = vadd.f32 %v6771_v6, %v11022_v23  ;;  %v6773_v58 = vpop.f32.mrb[235].mxu1  ;;  %v6244_v34 = vunpack.c.l.bf16 %v6143_v13 }
 0x6be   : > { %v6917_v55 = vadd.f32 %v6770_v61, %v6221_v37  ;;  %v6774_v47 = vadd.f32 %v6773_v58, %v11025_v39  ;;  %v6245_v61 = vunpack.c.h.bf16 %v6143_v13 }
 0x6bf   : > { %v7044_v1 = vmax.f32 %v6916_v16, 0.0  ;;  %v6920_v20 = vadd.f32 %v6772_v62, %v6224_v25  ;;  %v6248_v16 = vunpack.c.l.bf16 %v6145_v56 }
 0x6c0   : > { %v7045_v22 = vmax.f32 %v6917_v55, 0.0  ;;  %v6921_v12 = vadd.f32 %v6774_v47, %v6225_v3  ;;  %v6249_v55 = vunpack.c.h.bf16 %v6145_v56 }
 0x6c1   : > { %7172 = vst [vmem:[%s10861_s23 + $0x190] sm:$0xff] %v7044_v1  ;;  %v7048_v4 = vmax.f32 %v6920_v20, 0.0 }
 0x6c2   : > { %7173 = vst [vmem:[%s10861_s23 + $0x198] sm:$0xff] %v7045_v22  ;;  %v7049_v9 = vmax.f32 %v6921_v12, 0.0  ;;  %v6777_v54 = vpop.f32.mrb[236].mxu1  ;;  %v6147_v12 = vld [vmem:[%s9731_s12 + $0x148] sm:$0xff] }
 0x6c3   : > { %7176 = vst [vmem:[%s10861_s23 + $0x1b0] sm:$0xff] %v7048_v4  ;;  %v6778_v10 = vadd.f32 %v6777_v54, %v11022_v23  ;;  %v6779_v63 = vpop.f32.mrb[237].mxu1  ;;  %v6149_v54 = vld [vmem:[%s9731_s12 + $0x158] sm:$0xff] }
 0x6c4   : > { %7177 = vst [vmem:[%s10861_s23 + $0x1b8] sm:$0xff] %v7049_v9  ;;  %v6780_v35 = vadd.f32 %v6779_v63, %v11025_v39  ;;  %v6781_v27 = vpop.f32.mrb[238].mxu1 }
 0x6c5   : > { %v6924_v21 = vadd.f32 %v6778_v10, %v6228_v18  ;;  %v6782_v52 = vadd.f32 %v6781_v27, %v11022_v23  ;;  %v6783_v5 = vpop.f32.mrb[239].mxu1  ;;  %v6252_v10 = vunpack.c.l.bf16 %v6147_v12 }
 0x6c6   : > { %v6925_v15 = vadd.f32 %v6780_v35, %v6229_v11  ;;  %v6784_v32 = vadd.f32 %v6783_v5, %v11025_v39  ;;  %v6253_v35 = vunpack.c.h.bf16 %v6147_v12 }
 0x6c7   : > { %v7052_v59 = vmax.f32 %v6924_v21, 0.0  ;;  %v6928_v30 = vadd.f32 %v6782_v52, %v6232_v49  ;;  %v6256_v21 = vunpack.c.l.bf16 %v6149_v54 }
 0x6c8   : > { %v7053_v19 = vmax.f32 %v6925_v15, 0.0  ;;  %v6929_v14 = vadd.f32 %v6784_v32, %v6233_v7  ;;  %v6257_v15 = vunpack.c.h.bf16 %v6149_v54 }
 0x6c9   : > { %7180 = vst [vmem:[%s10861_s23 + $0x1d0] sm:$0xff] %v7052_v59  ;;  %v7056_v31 = vmax.f32 %v6928_v30, 0.0 }
 0x6ca   : > { %7181 = vst [vmem:[%s10861_s23 + $0x1d8] sm:$0xff] %v7053_v19  ;;  %v7057_v29 = vmax.f32 %v6929_v14, 0.0  ;;  %v6787_v60 = vpop.f32.mrb[240].mxu1  ;;  %v6151_v14 = vld [vmem:[%s9731_s12 + $0x168] sm:$0xff] }
 0x6cb   : > { %7184 = vst [vmem:[%s10861_s23 + $0x1f0] sm:$0xff] %v7056_v31  ;;  %v6788_v17 = vadd.f32 %v6787_v60, %v11022_v23  ;;  %v6789_v33 = vpop.f32.mrb[241].mxu1  ;;  %v6153_v60 = vld [vmem:[%s9731_s12 + $0x178] sm:$0xff] }
 0x6cc   : > { %7185 = vst [vmem:[%s10861_s23 + $0x1f8] sm:$0xff] %v7057_v29  ;;  %v6790_v36 = vadd.f32 %v6789_v33, %v11025_v39  ;;  %v6791_v0 = vpop.f32.mrb[242].mxu1 }
 0x6cd   : > { %v6932_v24 = vadd.f32 %v6788_v17, %v6236_v26  ;;  %v6792_v43 = vadd.f32 %v6791_v0, %v11022_v23  ;;  %v6793_v40 = vpop.f32.mrb[243].mxu1  ;;  %v6260_v17 = vunpack.c.l.bf16 %v6151_v14 }
 0x6ce   : > { %v6933_v48 = vadd.f32 %v6790_v36, %v6237_v41  ;;  %v6794_v46 = vadd.f32 %v6793_v40, %v11025_v39  ;;  %v6261_v36 = vunpack.c.h.bf16 %v6151_v14 }
 0x6cf   : > { %v7060_v51 = vmax.f32 %v6932_v24, 0.0  ;;  %v6936_v2 = vadd.f32 %v6792_v43, %v6240_v44  ;;  %v6264_v24 = vunpack.c.l.bf16 %v6153_v60 }
 0x6d0   : > { %v7061_v57 = vmax.f32 %v6933_v48, 0.0  ;;  %v6937_v38 = vadd.f32 %v6794_v46, %v6241_v28  ;;  %v6265_v48 = vunpack.c.h.bf16 %v6153_v60 }
 0x6d1   : > { %7188 = vst [vmem:[%s10861_s23 + $0x210] sm:$0xff] %v7060_v51  ;;  %v7064_v37 = vmax.f32 %v6936_v2, 0.0 }
 0x6d2   : > { %7189 = vst [vmem:[%s10861_s23 + $0x218] sm:$0xff] %v7061_v57  ;;  %v7065_v53 = vmax.f32 %v6937_v38, 0.0  ;;  %v6797_v25 = vpop.f32.mrb[244].mxu1  ;;  %v6155_v38 = vld [vmem:[%s9731_s12 + $0x188] sm:$0xff] }
 0x6d3   : > { %7192 = vst [vmem:[%s10861_s23 + $0x230] sm:$0xff] %v7064_v37  ;;  %v6798_v6 = vadd.f32 %v6797_v25, %v11022_v23  ;;  %v6799_v3 = vpop.f32.mrb[245].mxu1  ;;  %v6157_v25 = vld [vmem:[%s9731_s12 + $0x198] sm:$0xff] }
 0x6d4   : > { %7193 = vst [vmem:[%s10861_s23 + $0x238] sm:$0xff] %v7065_v53  ;;  %v6800_v62 = vadd.f32 %v6799_v3, %v11025_v39  ;;  %v6801_v58 = vpop.f32.mrb[246].mxu1 }
 0x6d5   : > { %v6940_v47 = vadd.f32 %v6798_v6, %v6244_v34  ;;  %v6802_v42 = vadd.f32 %v6801_v58, %v11022_v23  ;;  %v6803_v1 = vpop.f32.mrb[247].mxu1  ;;  %v6268_v6 = vunpack.c.l.bf16 %v6155_v38 }
 0x6d6   : > { %v6941_v20 = vadd.f32 %v6800_v62, %v6245_v61  ;;  %v6804_v22 = vadd.f32 %v6803_v1, %v11025_v39  ;;  %v6269_v62 = vunpack.c.h.bf16 %v6155_v38 }
 0x6d7   : > { %v7068_v50 = vmax.f32 %v6940_v47, 0.0  ;;  %v6944_v4 = vadd.f32 %v6802_v42, %v6248_v16  ;;  %v6272_v47 = vunpack.c.l.bf16 %v6157_v25 }
 0x6d8   : > { %v7069_v18 = vmax.f32 %v6941_v20, 0.0  ;;  %v6945_v9 = vadd.f32 %v6804_v22, %v6249_v55  ;;  %v6273_v20 = vunpack.c.h.bf16 %v6157_v25 }
 0x6d9   : > { %7196 = vst [vmem:[%s10861_s23 + $0x250] sm:$0xff] %v7068_v50  ;;  %v7072_v11 = vmax.f32 %v6944_v4, 0.0 }
 0x6da   : > { %7197 = vst [vmem:[%s10861_s23 + $0x258] sm:$0xff] %v7069_v18  ;;  %v7073_v63 = vmax.f32 %v6945_v9, 0.0  ;;  %v6807_v49 = vpop.f32.mrb[248].mxu1  ;;  %v6159_v9 = vld [vmem:[%s9731_s12 + $0x1a8] sm:$0xff] }
 0x6db   : > { %7200 = vst [vmem:[%s10861_s23 + $0x270] sm:$0xff] %v7072_v11  ;;  %v6808_v27 = vadd.f32 %v6807_v49, %v11022_v23  ;;  %v6809_v7 = vpop.f32.mrb[249].mxu1  ;;  %v6161_v49 = vld [vmem:[%s9731_s12 + $0x1b8] sm:$0xff] }
 0x6dc   : > { %7201 = vst [vmem:[%s10861_s23 + $0x278] sm:$0xff] %v7073_v63  ;;  %v6810_v52 = vadd.f32 %v6809_v7, %v11025_v39  ;;  %v6811_v5 = vpop.f32.mrb[250].mxu1 }
 0x6dd   : > { %v6948_v32 = vadd.f32 %v6808_v27, %v6252_v10  ;;  %v6812_v45 = vadd.f32 %v6811_v5, %v11022_v23  ;;  %v6813_v59 = vpop.f32.mrb[251].mxu1  ;;  %v6276_v27 = vunpack.c.l.bf16 %v6159_v9 }
 0x6de   : > { %v6949_v30 = vadd.f32 %v6810_v52, %v6253_v35  ;;  %v6814_v19 = vadd.f32 %v6813_v59, %v11025_v39  ;;  %v6277_v52 = vunpack.c.h.bf16 %v6159_v9 }
 0x6df   : > { %v7076_v8 = vmax.f32 %v6948_v32, 0.0  ;;  %v6952_v31 = vadd.f32 %v6812_v45, %v6256_v21  ;;  %v6280_v32 = vunpack.c.l.bf16 %v6161_v49 }
 0x6e0   : > { %v7077_v26 = vmax.f32 %v6949_v30, 0.0  ;;  %v6953_v29 = vadd.f32 %v6814_v19, %v6257_v15  ;;  %v6281_v30 = vunpack.c.h.bf16 %v6161_v49 }
 0x6e1   : > { %7204 = vst [vmem:[%s10861_s23 + $0x290] sm:$0xff] %v7076_v8  ;;  %v7080_v41 = vmax.f32 %v6952_v31, 0.0 }
 0x6e2   : > { %7205 = vst [vmem:[%s10861_s23 + $0x298] sm:$0xff] %v7077_v26  ;;  %v7081_v33 = vmax.f32 %v6953_v29, 0.0  ;;  %v6817_v44 = vpop.f32.mrb[252].mxu1  ;;  %v6163_v29 = vld [vmem:[%s9731_s12 + $0x1c8] sm:$0xff] }
 0x6e3   : > { %7208 = vst [vmem:[%s10861_s23 + $0x2b0] sm:$0xff] %v7080_v41  ;;  %v6818_v0 = vadd.f32 %v6817_v44, %v11022_v23  ;;  %v6819_v28 = vpop.f32.mrb[253].mxu1  ;;  %v6165_v44 = vld [vmem:[%s9731_s12 + $0x1d8] sm:$0xff] }
 0x6e4   : > { %7209 = vst [vmem:[%s10861_s23 + $0x2b8] sm:$0xff] %v7081_v33  ;;  %v6820_v43 = vadd.f32 %v6819_v28, %v11025_v39  ;;  %v6821_v40 = vpop.f32.mrb[254].mxu1 }
 0x6e5   : > { %v6956_v46 = vadd.f32 %v6818_v0, %v6260_v17  ;;  %v6822_v13 = vadd.f32 %v6821_v40, %v11022_v23  ;;  %v6823_v51 = vpop.f32.mrb[255].mxu1  ;;  %v6284_v0 = vunpack.c.l.bf16 %v6163_v29 }
 0x6e6   : > { %v6957_v2 = vadd.f32 %v6820_v43, %v6261_v36  ;;  %v6824_v57 = vadd.f32 %v6823_v51, %v11025_v39  ;;  %v6285_v43 = vunpack.c.h.bf16 %v6163_v29 }
 0x6e7   : > { %v7084_v56 = vmax.f32 %v6956_v46, 0.0  ;;  %v6960_v37 = vadd.f32 %v6822_v13, %v6264_v24  ;;  %v6288_v46 = vunpack.c.l.bf16 %v6165_v44 }
 0x6e8   : > { %v7085_v34 = vmax.f32 %v6957_v2, 0.0  ;;  %v6961_v53 = vadd.f32 %v6824_v57, %v6265_v48  ;;  %v6289_v2 = vunpack.c.h.bf16 %v6165_v44 }
 0x6e9   : > { %7212 = vst [vmem:[%s10861_s23 + $0x2d0] sm:$0xff] %v7084_v56  ;;  %v7088_v61 = vmax.f32 %v6960_v37, 0.0 }
 0x6ea   : > { %7213 = vst [vmem:[%s10861_s23 + $0x2d8] sm:$0xff] %v7085_v34  ;;  %v7089_v3 = vmax.f32 %v6961_v53, 0.0  ;;  %v6827_v16 = vpop.f32.mrb[0].mxu1  ;;  %v6167_v53 = vld [vmem:[%s9731_s12 + $0x1e8] sm:$0xff] }
 0x6eb   : > { %7216 = vst [vmem:[%s10861_s23 + $0x2f0] sm:$0xff] %v7088_v61  ;;  %v6828_v58 = vadd.f32 %v6827_v16, %v11022_v23  ;;  %v6829_v55 = vpop.f32.mrb[1].mxu1  ;;  %v6169_v16 = vld [vmem:[%s9731_s12 + $0x1f8] sm:$0xff] }
 0x6ec   : > { %7217 = vst [vmem:[%s10861_s23 + $0x2f8] sm:$0xff] %v7089_v3  ;;  %v6830_v42 = vadd.f32 %v6829_v55, %v11025_v39  ;;  %v6831_v1 = vpop.f32.mrb[2].mxu1 }
 0x6ed   : > { %v6964_v22 = vadd.f32 %v6828_v58, %v6268_v6  ;;  %v6832_v12 = vadd.f32 %v6831_v1, %v11022_v23  ;;  %v6833_v50 = vpop.f32.mrb[3].mxu1  ;;  %v6292_v58 = vunpack.c.l.bf16 %v6167_v53 }
 0x6ee   : > { %v6965_v4 = vadd.f32 %v6830_v42, %v6269_v62  ;;  %v6834_v18 = vadd.f32 %v6833_v50, %v11025_v39  ;;  %v6293_v42 = vunpack.c.h.bf16 %v6167_v53 }
 0x6ef   : > { %v7092_v54 = vmax.f32 %v6964_v22, 0.0  ;;  %v6968_v11 = vadd.f32 %v6832_v12, %v6272_v47  ;;  %v6296_v22 = vunpack.c.l.bf16 %v6169_v16 }
 0x6f0   : > { %v7093_v10 = vmax.f32 %v6965_v4, 0.0  ;;  %v6969_v63 = vadd.f32 %v6834_v18, %v6273_v20  ;;  %v6297_v4 = vunpack.c.h.bf16 %v6169_v16 }
 0x6f1   : > { %7220 = vst [vmem:[%s10861_s23 + $0x310] sm:$0xff] %v7092_v54  ;;  %v7096_v35 = vmax.f32 %v6968_v11, 0.0 }
 0x6f2   : > { %7221 = vst [vmem:[%s10861_s23 + $0x318] sm:$0xff] %v7093_v10  ;;  %v7097_v7 = vmax.f32 %v6969_v63, 0.0  ;;  %v6837_v21 = vpop.f32.mrb[4].mxu1 }
 0x6f3   : > { %7224 = vst [vmem:[%s10861_s23 + $0x330] sm:$0xff] %v7096_v35  ;;  %v6838_v5 = vadd.f32 %v6837_v21, %v11022_v23  ;;  %v6839_v15 = vpop.f32.mrb[5].mxu1 }
 0x6f4   : > { %7225 = vst [vmem:[%s10861_s23 + $0x338] sm:$0xff] %v7097_v7  ;;  %v6840_v45 = vadd.f32 %v6839_v15, %v11025_v39  ;;  %v6841_v59 = vpop.f32.mrb[6].mxu1 }
 0x6f5   : > { %v6972_v19 = vadd.f32 %v6838_v5, %v6276_v27  ;;  %v6842_v14 = vadd.f32 %v6841_v59, %v11022_v23  ;;  %v6843_v8 = vpop.f32.mrb[7].mxu1 }
 0x6f6   : > { %v6973_v31 = vadd.f32 %v6840_v45, %v6277_v52  ;;  %v6844_v26 = vadd.f32 %v6843_v8, %v11025_v39 }
 0x6f7   : > { %v7100_v60 = vmax.f32 %v6972_v19, 0.0  ;;  %v6976_v41 = vadd.f32 %v6842_v14, %v6280_v32 }
 0x6f8   : > { %v7101_v17 = vmax.f32 %v6973_v31, 0.0  ;;  %v6977_v33 = vadd.f32 %v6844_v26, %v6281_v30 }
 0x6f9   : > { %7228 = vst [vmem:[%s10861_s23 + $0x350] sm:$0xff] %v7100_v60  ;;  %v7104_v36 = vmax.f32 %v6976_v41, 0.0 }
 0x6fa   : > { %7229 = vst [vmem:[%s10861_s23 + $0x358] sm:$0xff] %v7101_v17  ;;  %v7105_v28 = vmax.f32 %v6977_v33, 0.0  ;;  %v6847_v24 = vpop.f32.mrb[8].mxu1 }
 0x6fb   : > { %7232 = vst [vmem:[%s10861_s23 + $0x370] sm:$0xff] %v7104_v36  ;;  %v6848_v40 = vadd.f32 %v6847_v24, %v11022_v23  ;;  %v6849_v48 = vpop.f32.mrb[9].mxu1 }
 0x6fc   : > { %7233 = vst [vmem:[%s10861_s23 + $0x378] sm:$0xff] %v7105_v28  ;;  %v6850_v13 = vadd.f32 %v6849_v48, %v11025_v39  ;;  %v6851_v51 = vpop.f32.mrb[10].mxu1 }
 0x6fd   : > { %v6980_v57 = vadd.f32 %v6848_v40, %v6284_v0  ;;  %v6852_v38 = vadd.f32 %v6851_v51, %v11022_v23  ;;  %v6853_v56 = vpop.f32.mrb[11].mxu1 }
 0x6fe   : > { %v6981_v37 = vadd.f32 %v6850_v13, %v6285_v43  ;;  %v6854_v34 = vadd.f32 %v6853_v56, %v11025_v39 }
 0x6ff   : > { %v7108_v25 = vmax.f32 %v6980_v57, 0.0  ;;  %v6984_v61 = vadd.f32 %v6852_v38, %v6288_v46 }
 0x700   : > { %v7109_v6 = vmax.f32 %v6981_v37, 0.0  ;;  %v6985_v3 = vadd.f32 %v6854_v34, %v6289_v2 }
 0x701   : > { %7236 = vst [vmem:[%s10861_s23 + $0x390] sm:$0xff] %v7108_v25  ;;  %v7112_v62 = vmax.f32 %v6984_v61, 0.0 }
 0x702   : > { %7237 = vst [vmem:[%s10861_s23 + $0x398] sm:$0xff] %v7109_v6  ;;  %v7113_v55 = vmax.f32 %v6985_v3, 0.0  ;;  %v6857_v47 = vpop.f32.mrb[12].mxu1 }
 0x703   : > { %7240 = vst [vmem:[%s10861_s23 + $0x3b0] sm:$0xff] %v7112_v62  ;;  %v6858_v1 = vadd.f32 %v6857_v47, %v11022_v23  ;;  %v6859_v20 = vpop.f32.mrb[13].mxu1 }
 0x704   : > { %7241 = vst [vmem:[%s10861_s23 + $0x3b8] sm:$0xff] %v7113_v55  ;;  %v6860_v12 = vadd.f32 %v6859_v20, %v11025_v39  ;;  %v6861_v50 = vpop.f32.mrb[14].mxu1 }
 0x705   : > { %v6988_v18 = vadd.f32 %v6858_v1, %v6292_v58  ;;  %v6862_v9 = vadd.f32 %v6861_v50, %v11022_v23  ;;  %v6863_v54 = vpop.f32.mrb[15].mxu1 }
 0x706   : > { %v6989_v11 = vadd.f32 %v6860_v12, %v6293_v42  ;;  %v6864_v10 = vadd.f32 %v6863_v54, %v11025_v39 }
 0x707   : > { %v7116_v63 = vmax.f32 %v6988_v18, 0.0  ;;  %v6992_v49 = vadd.f32 %v6862_v9, %v6296_v22 }
 0x708   : > { %v7117_v35 = vmax.f32 %v6989_v11, 0.0  ;;  %v6993_v27 = vadd.f32 %v6864_v10, %v6297_v4 }
 0x709   : > { %7244 = vst [vmem:[%s10861_s23 + $0x3d0] sm:$0xff] %v7116_v63  ;;  %v7120_v7 = vmax.f32 %v6992_v49, 0.0 }
 0x70a   : > { %7245 = vst [vmem:[%s10861_s23 + $0x3d8] sm:$0xff] %v7117_v35  ;;  %v7121_v23 = vmax.f32 %v6993_v27, 0.0 }
 0x70b   : > { %7248 = vst [vmem:[%s10861_s23 + $0x3f0] sm:$0xff] %v7120_v7 }
 0x70c   : > { %7249 = vst [vmem:[%s10861_s23 + $0x3f8] sm:$0xff] %v7121_v23 }
 0x70d   : > { %9345 = shalt.err (!%p9342_p7)
}
 0x70e   : > { %s9346_s1 = scalar_lea.hbm %s11192_s13, 16384  ;;  %s9350_s8 = scalar_lea.hbm %s11247_s7, 131072 }
 0x70f   : > { %p9347_p9 = scmp.ne.s32.totalorder %s11192_s13, %s9346_s1  ;;  %p9351_p0 = scmp.lt.u32.totalorder %s11192_s13, %s11247_s7 }
 0x710   : > { %p9352_p4 = scmp.lt.u32.totalorder %s9350_s8, %s9346_s1  ;;  %p9354_p5 = scmp.lt.u32.totalorder %s9346_s1, %s11192_s13 }
 0x711   : > { %p9348_p10 = pnand %p9347_p9, %p11269_p8 }
 0x712   : > { %p9353_p6 = por %p9352_p4, %p9351_p0 }
 0x713   : > { %p9349_p11 = pneg %p9348_p10 }
 0x714   : > { %p9355_p12 = por %p9354_p5, %p9353_p6 }
 0x716   : > { %p9356_p13 = pnand %p9355_p12, %p9349_p11 }
 0x718   : > { %9359 = shalt.err (!%p9356_p13)
}
 0x719   : > { %s9425_s10 = smov 512   ;;  %s9426_s19 = smov 32  }
 0x71a   : > { %8794 = dma.vmem_to_hbm [thread:$0]  (%p11269_p8), %s11194_s22, 16384, %s11192_s13, %s7251_s30, %s9425_s10, %s9425_s10, %s9426_s19  }
 0x71b PF: > { %p8836_p1 = scmp.ge.s32.totalorder %s9410_s27, 2  ;;  %s7279_s21 = sand.u32 1, %s9398_s24  }
 0x71c   : > { %p11270_p3 = scmp.ne.s32.totalorder %s11260_s16, 0  ;;  %s7280_s17 = scalar_lea.sflag [#allocation5], %s7279_s21 }
 0x71e   : > { %p8820_p2 = pnand %p8836_p1, %p11270_p3 }
 0x720   : > { %9393 = dma.done.wait (!%p8820_p2), %s7280_s17, 16384  }
 0x721   : > { %9395 = vsyncadd (!%p8820_p2), %s7280_s17, 4294950912  ;;  %p23_p7 = scmp.ge.s32.totalorder %s9645_s11, 10   ;;  %s11271_s24 = smov %s9402_s25 }
 0x722   : > { %s11272_s25 = smov %s9406_s26  ;;  %s11273_s26 = smov %s9656_s29 }
 0x723   : > { %s11274_s27 = smov %s9645_s11  ;;  %25 = sbr.rel (!%p23_p7) target bundleno = 10 (0xa), region = 128 }
 0x72a   :  { %7285 = vsyncpa [#allocation4], 1 }
 0x72b   :  { %7287 = vsyncpa [#allocation4 + $0x1], 1 }
 0x72c   :  { %7288 = vsyncpa [#allocation7], 1 }
 0x72d   :  { %7289 = vsyncpa [#allocation10], 1 }
 0x72e   :  { %7290 = vsyncpa [#allocation13], 1 }
 0x72f   :  { %7291 = vsyncpa [#allocation5], 1 }
 0x730   :  { %7293 = vsyncpa [#allocation5 + $0x1], 1 }

</bundles_post_ra>
